<compile_context>
chip_gen: v6e
topology: v6e:2x2x1
jax: 0.10.0
libtpu: 0.0.40
codegen_flags: <defaults>
</compile_context>

<pallas_src>
import functools

import jax
import jax.numpy as jnp
from jax.experimental import pallas as pl
from jax.experimental.pallas import tpu as pltpu

EPS = 1e-5
NUM_HIDDEN_LAYERS = 5
OUT_PAD = 128        # lane-dense padded width of the final H->1 head
BATCH_ALIGN = 128    # pad batch rows to a multiple of this for MXU utilization


def _tabmlp5_kernel(*refs, n_valid, use_mask):
    """Fused forward pass; every ref is a whole-array VMEM resident.

    refs = [x, (row_mask if use_mask),
            (w1, b1, gamma1, beta1), ..., (w5, b5, gamma5, beta5),
            w_out_padded, b_out_padded, out]
    Weights are pre-transposed [in, out] and stored bf16; biases / BN affine
    parameters are f32 rows of shape (1, H).
    """
    x_ref = refs[0]
    o_ref = refs[-1]
    if use_mask:
        mask_ref = refs[1]
        params = refs[2:-1]
    else:
        mask_ref = None
        params = refs[1:-1]

    inv_n = jnp.float32(1.0 / n_valid)
    h = x_ref[...].astype(jnp.float32)                       # (Bp, in)

    for l in range(NUM_HIDDEN_LAYERS):
        w, b, g, be = params[4 * l:4 * l + 4]
        # Linear: bf16 MXU operands, f32 accumulation; bias + ReLU in f32.
        h = jnp.dot(h.astype(jnp.bfloat16), w[...],
                    preferred_element_type=jnp.float32) + b[...]
        h = jnp.maximum(h, 0.0)
        if use_mask:
            # Zero padded rows so they contribute nothing to the batch stats.
            h = h * mask_ref[...]
        # BatchNorm1d training-mode stats, single pass (biased batch variance).
        s = jnp.sum(h, axis=0, keepdims=True)                # (1, H)
        s2 = jnp.sum(h * h, axis=0, keepdims=True)           # (1, H)
        mean = s * inv_n
        var = s2 * inv_n - mean * mean
        scale = g[...] * jax.lax.rsqrt(var + EPS)
        shift = be[...] - mean * scale
        h = h * scale + shift                                # one FMA pass

    w_out, b_out = params[-2], params[-1]                    # (H,128) bf16 / (1,128) f32
    out = jnp.dot(h.astype(jnp.bfloat16), w_out[...],
                  preferred_element_type=jnp.float32) + b_out[...]
    o_ref[...] = out.astype(o_ref.dtype)                     # lane-dense (Bp, 128) store


def tabmlp5_forward(x, params):
    """Wrapper: pad batch, flatten/cast params, call the fused kernel."""
    B, _ = x.shape
    H = params["layers"][0][0].shape[1]
    Bp = max(BATCH_ALIGN, pl.cdiv(B, BATCH_ALIGN) * BATCH_ALIGN)
    use_mask = (Bp != B)

    x_p = x.astype(jnp.float32)
    if use_mask:
        x_p = jnp.pad(x_p, ((0, Bp - B), (0, 0)))

    inputs = [x_p]
    if use_mask:
        mask = (jnp.arange(Bp, dtype=jnp.int32) < B).astype(jnp.float32)
        inputs.append(mask.reshape(Bp, 1))

    for (w, b, g, be) in params["layers"]:
        inputs += [w.astype(jnp.bfloat16),
                   b.reshape(1, -1).astype(jnp.float32),
                   g.reshape(1, -1).astype(jnp.float32),
                   be.reshape(1, -1).astype(jnp.float32)]

    # Pad the H->1 head to H->OUT_PAD (zero extra columns) for lane-dense stores.
    w_out = jnp.zeros((H, OUT_PAD), jnp.float32).at[:, 0].set(params["w_out"][:, 0])
    b_out = jnp.zeros((1, OUT_PAD), jnp.float32).at[0, 0].set(params["b_out"][0])
    inputs += [w_out.astype(jnp.bfloat16), b_out]

    kernel = functools.partial(_tabmlp5_kernel, n_valid=float(B), use_mask=use_mask)
    out = pl.pallas_call(
        kernel,
        out_shape=jax.ShapeDtypeStruct((Bp, OUT_PAD), jnp.float32),
        in_specs=[pl.BlockSpec(memory_space=pltpu.MemorySpace.VMEM)] * len(inputs),
        out_specs=pl.BlockSpec(memory_space=pltpu.MemorySpace.VMEM),
        compiler_params=pltpu.CompilerParams(
            vmem_limit_bytes=48 * 1024 * 1024),
    )(*inputs)
    return out[:B, :1]


def init_params(key, input_shape, H):
    """PyTorch-style init (uniform +/- 1/sqrt(fan_in); BN gamma=1, beta=0)."""
    layers = []
    fan_ins = [input_shape] + [H] * (NUM_HIDDEN_LAYERS - 1)
    for l, fan_in in enumerate(fan_ins):
        kw, kb = jax.random.split(jax.random.fold_in(key, l))
        bound = 1.0 / jnp.sqrt(fan_in)
        w = jax.random.uniform(kw, (fan_in, H), jnp.float32, -bound, bound)  # pre-transposed
        b = jax.random.uniform(kb, (H,), jnp.float32, -bound, bound)
        g = jnp.ones((H,), jnp.float32)
        be = jnp.zeros((H,), jnp.float32)
        layers.append((w, b, g, be))
    kw, kb = jax.random.split(jax.random.fold_in(key, 100))
    bound = 1.0 / jnp.sqrt(H)
    w_out = jax.random.uniform(kw, (H, 1), jnp.float32, -bound, bound)       # pre-transposed
    b_out = jax.random.uniform(kb, (1,), jnp.float32, -bound, bound)
    return {"layers": layers, "w_out": w_out, "b_out": b_out}


def tabmlp5_reference(x, params):
    """Pure-JAX reference with the same precision policy (bf16 matmul operands,
    f32 accumulation & elementwise), classic two-pass BN formulation."""
    h = x.astype(jnp.float32)
    for (w, b, g, be) in params["layers"]:
        h = jnp.dot(h.astype(jnp.bfloat16), w.astype(jnp.bfloat16),
                    preferred_element_type=jnp.float32) + b
        h = jnp.maximum(h, 0.0)
        mean = jnp.mean(h, axis=0, keepdims=True)
        var = jnp.mean(jnp.square(h - mean), axis=0, keepdims=True)
        h = (h - mean) * jax.lax.rsqrt(var + EPS) * g + be
    return jnp.dot(h.astype(jnp.bfloat16), params["w_out"].astype(jnp.bfloat16),
                   preferred_element_type=jnp.float32) + params["b_out"]


if __name__ == "__main__":
    # TODO(synk): BatchNorm running_mean/var buffer updates are training-side
    # state, not part of the forward output, so they are not computed here.
    BATCH = 128          # multiple of 128: full MXU rows, no padding/masking needed
    INPUT_SHAPE = 12     # TabMLP5 default input_shape
    H = 256              # hidden width (module default is 1024; kept small for the demo)

    key = jax.random.PRNGKey(0)
    kx, kp = jax.random.split(key)
    x = jax.random.normal(kx, (BATCH, INPUT_SHAPE), jnp.float32)
    params = init_params(kp, INPUT_SHAPE, H)

    out = jax.block_until_ready(tabmlp5_forward(x, params))
    ref = tabmlp5_reference(x, params)

    assert out.shape == (BATCH, 1)
    assert jnp.allclose(out, ref, atol=1e-2, rtol=1e-2), float(jnp.max(jnp.abs(out - ref)))
    print("KERNEL_OK")
</pallas_src>

<mosaic_0001>
module attributes {stable_mosaic.version = 11 : i64} {
  func.func @_tabmlp5_kernel(%arg0: memref<128x12xf32, #tpu.memory_space<vmem>>, %arg1: memref<12x256xbf16, #tpu.memory_space<vmem>>, %arg2: memref<1x256xf32, #tpu.memory_space<vmem>>, %arg3: memref<1x256xf32, #tpu.memory_space<vmem>>, %arg4: memref<1x256xf32, #tpu.memory_space<vmem>>, %arg5: memref<256x256xbf16, #tpu.memory_space<vmem>>, %arg6: memref<1x256xf32, #tpu.memory_space<vmem>>, %arg7: memref<1x256xf32, #tpu.memory_space<vmem>>, %arg8: memref<1x256xf32, #tpu.memory_space<vmem>>, %arg9: memref<256x256xbf16, #tpu.memory_space<vmem>>, %arg10: memref<1x256xf32, #tpu.memory_space<vmem>>, %arg11: memref<1x256xf32, #tpu.memory_space<vmem>>, %arg12: memref<1x256xf32, #tpu.memory_space<vmem>>, %arg13: memref<256x256xbf16, #tpu.memory_space<vmem>>, %arg14: memref<1x256xf32, #tpu.memory_space<vmem>>, %arg15: memref<1x256xf32, #tpu.memory_space<vmem>>, %arg16: memref<1x256xf32, #tpu.memory_space<vmem>>, %arg17: memref<256x256xbf16, #tpu.memory_space<vmem>>, %arg18: memref<1x256xf32, #tpu.memory_space<vmem>>, %arg19: memref<1x256xf32, #tpu.memory_space<vmem>>, %arg20: memref<1x256xf32, #tpu.memory_space<vmem>>, %arg21: memref<256x128xbf16, #tpu.memory_space<vmem>>, %arg22: memref<1x128xf32, #tpu.memory_space<vmem>>, %arg23: memref<128x128xf32, #tpu.memory_space<vmem>>) attributes {dimension_semantics = [], scalar_prefetch = 0 : i64, scratch_operands = 0 : i64, tpu.core_type = #tpu.core_type<tc>} {
    %c0 = arith.constant 0 : index
    %c0_0 = arith.constant 0 : index
    %0 = vector.load %arg0[%c0, %c0_0] : memref<128x12xf32, #tpu.memory_space<vmem>>, vector<128x12xf32>
    %1 = arith.truncf %0 : vector<128x12xf32> to vector<128x12xbf16>
    %c0_1 = arith.constant 0 : index
    %c0_2 = arith.constant 0 : index
    %2 = vector.load %arg1[%c0_1, %c0_2] : memref<12x256xbf16, #tpu.memory_space<vmem>>, vector<12x256xbf16>
    %cst = arith.constant dense<0.000000e+00> : vector<128x256xf32>
    %3 = tpu.matmul %1, %2, %cst {dimension_numbers = #tpu.dot_dimension_numbers<[1], [0], [0], [1], [0, 0, 1, 1], [], []>} : vector<128x12xbf16>, vector<12x256xbf16>, vector<128x256xf32> -> vector<128x256xf32>
    %c0_3 = arith.constant 0 : index
    %c0_4 = arith.constant 0 : index
    %4 = vector.load %arg2[%c0_3, %c0_4] : memref<1x256xf32, #tpu.memory_space<vmem>>, vector<1x256xf32>
    %5 = vector.broadcast %4 : vector<1x256xf32> to vector<128x256xf32>
    %6 = arith.addf %3, %5 : vector<128x256xf32>
    %cst_5 = arith.constant 0.000000e+00 : f32
    %7 = vector.broadcast %cst_5 : f32 to vector<128x256xf32>
    %8 = arith.maximumf %6, %7 : vector<128x256xf32>
    %cst_6 = arith.constant dense<0.000000e+00> : vector<256xf32>
    %9 = vector.multi_reduction <add>, %8, %cst_6 [0] : vector<128x256xf32> to vector<256xf32>
    %10 = vector.shape_cast %9 : vector<256xf32> to vector<1x256xf32>
    %11 = arith.mulf %8, %8 : vector<128x256xf32>
    %cst_7 = arith.constant dense<0.000000e+00> : vector<256xf32>
    %12 = vector.multi_reduction <add>, %11, %cst_7 [0] : vector<128x256xf32> to vector<256xf32>
    %13 = vector.shape_cast %12 : vector<256xf32> to vector<1x256xf32>
    %cst_8 = arith.constant 7.812500e-03 : f32
    %14 = vector.broadcast %cst_8 : f32 to vector<1x256xf32>
    %15 = arith.mulf %10, %14 : vector<1x256xf32>
    %cst_9 = arith.constant 7.812500e-03 : f32
    %16 = vector.broadcast %cst_9 : f32 to vector<1x256xf32>
    %17 = arith.mulf %13, %16 : vector<1x256xf32>
    %18 = arith.mulf %15, %15 : vector<1x256xf32>
    %19 = arith.subf %17, %18 : vector<1x256xf32>
    %c0_10 = arith.constant 0 : index
    %c0_11 = arith.constant 0 : index
    %20 = vector.load %arg3[%c0_10, %c0_11] : memref<1x256xf32, #tpu.memory_space<vmem>>, vector<1x256xf32>
    %cst_12 = arith.constant 9.99999974E-6 : f32
    %21 = vector.broadcast %cst_12 : f32 to vector<1x256xf32>
    %22 = arith.addf %19, %21 : vector<1x256xf32>
    %23 = math.rsqrt %22 : vector<1x256xf32>
    %24 = arith.mulf %20, %23 : vector<1x256xf32>
    %c0_13 = arith.constant 0 : index
    %c0_14 = arith.constant 0 : index
    %25 = vector.load %arg4[%c0_13, %c0_14] : memref<1x256xf32, #tpu.memory_space<vmem>>, vector<1x256xf32>
    %26 = arith.mulf %15, %24 : vector<1x256xf32>
    %27 = arith.subf %25, %26 : vector<1x256xf32>
    %28 = vector.broadcast %24 : vector<1x256xf32> to vector<128x256xf32>
    %29 = arith.mulf %8, %28 : vector<128x256xf32>
    %30 = vector.broadcast %27 : vector<1x256xf32> to vector<128x256xf32>
    %31 = arith.addf %29, %30 : vector<128x256xf32>
    %32 = arith.truncf %31 : vector<128x256xf32> to vector<128x256xbf16>
    %c0_15 = arith.constant 0 : index
    %c0_16 = arith.constant 0 : index
    %33 = vector.load %arg5[%c0_15, %c0_16] : memref<256x256xbf16, #tpu.memory_space<vmem>>, vector<256x256xbf16>
    %cst_17 = arith.constant dense<0.000000e+00> : vector<128x256xf32>
    %34 = tpu.matmul %32, %33, %cst_17 {dimension_numbers = #tpu.dot_dimension_numbers<[1], [0], [0], [1], [0, 0, 1, 1], [], []>} : vector<128x256xbf16>, vector<256x256xbf16>, vector<128x256xf32> -> vector<128x256xf32>
    %c0_18 = arith.constant 0 : index
    %c0_19 = arith.constant 0 : index
    %35 = vector.load %arg6[%c0_18, %c0_19] : memref<1x256xf32, #tpu.memory_space<vmem>>, vector<1x256xf32>
    %36 = vector.broadcast %35 : vector<1x256xf32> to vector<128x256xf32>
    %37 = arith.addf %34, %36 : vector<128x256xf32>
    %cst_20 = arith.constant 0.000000e+00 : f32
    %38 = vector.broadcast %cst_20 : f32 to vector<128x256xf32>
    %39 = arith.maximumf %37, %38 : vector<128x256xf32>
    %cst_21 = arith.constant dense<0.000000e+00> : vector<256xf32>
    %40 = vector.multi_reduction <add>, %39, %cst_21 [0] : vector<128x256xf32> to vector<256xf32>
    %41 = vector.shape_cast %40 : vector<256xf32> to vector<1x256xf32>
    %42 = arith.mulf %39, %39 : vector<128x256xf32>
    %cst_22 = arith.constant dense<0.000000e+00> : vector<256xf32>
    %43 = vector.multi_reduction <add>, %42, %cst_22 [0] : vector<128x256xf32> to vector<256xf32>
    %44 = vector.shape_cast %43 : vector<256xf32> to vector<1x256xf32>
    %cst_23 = arith.constant 7.812500e-03 : f32
    %45 = vector.broadcast %cst_23 : f32 to vector<1x256xf32>
    %46 = arith.mulf %41, %45 : vector<1x256xf32>
    %cst_24 = arith.constant 7.812500e-03 : f32
    %47 = vector.broadcast %cst_24 : f32 to vector<1x256xf32>
    %48 = arith.mulf %44, %47 : vector<1x256xf32>
    %49 = arith.mulf %46, %46 : vector<1x256xf32>
    %50 = arith.subf %48, %49 : vector<1x256xf32>
    %c0_25 = arith.constant 0 : index
    %c0_26 = arith.constant 0 : index
    %51 = vector.load %arg7[%c0_25, %c0_26] : memref<1x256xf32, #tpu.memory_space<vmem>>, vector<1x256xf32>
    %cst_27 = arith.constant 9.99999974E-6 : f32
    %52 = vector.broadcast %cst_27 : f32 to vector<1x256xf32>
    %53 = arith.addf %50, %52 : vector<1x256xf32>
    %54 = math.rsqrt %53 : vector<1x256xf32>
    %55 = arith.mulf %51, %54 : vector<1x256xf32>
    %c0_28 = arith.constant 0 : index
    %c0_29 = arith.constant 0 : index
    %56 = vector.load %arg8[%c0_28, %c0_29] : memref<1x256xf32, #tpu.memory_space<vmem>>, vector<1x256xf32>
    %57 = arith.mulf %46, %55 : vector<1x256xf32>
    %58 = arith.subf %56, %57 : vector<1x256xf32>
    %59 = vector.broadcast %55 : vector<1x256xf32> to vector<128x256xf32>
    %60 = arith.mulf %39, %59 : vector<128x256xf32>
    %61 = vector.broadcast %58 : vector<1x256xf32> to vector<128x256xf32>
    %62 = arith.addf %60, %61 : vector<128x256xf32>
    %63 = arith.truncf %62 : vector<128x256xf32> to vector<128x256xbf16>
    %c0_30 = arith.constant 0 : index
    %c0_31 = arith.constant 0 : index
    %64 = vector.load %arg9[%c0_30, %c0_31] : memref<256x256xbf16, #tpu.memory_space<vmem>>, vector<256x256xbf16>
    %cst_32 = arith.constant dense<0.000000e+00> : vector<128x256xf32>
    %65 = tpu.matmul %63, %64, %cst_32 {dimension_numbers = #tpu.dot_dimension_numbers<[1], [0], [0], [1], [0, 0, 1, 1], [], []>} : vector<128x256xbf16>, vector<256x256xbf16>, vector<128x256xf32> -> vector<128x256xf32>
    %c0_33 = arith.constant 0 : index
    %c0_34 = arith.constant 0 : index
    %66 = vector.load %arg10[%c0_33, %c0_34] : memref<1x256xf32, #tpu.memory_space<vmem>>, vector<1x256xf32>
    %67 = vector.broadcast %66 : vector<1x256xf32> to vector<128x256xf32>
    %68 = arith.addf %65, %67 : vector<128x256xf32>
    %cst_35 = arith.constant 0.000000e+00 : f32
    %69 = vector.broadcast %cst_35 : f32 to vector<128x256xf32>
    %70 = arith.maximumf %68, %69 : vector<128x256xf32>
    %cst_36 = arith.constant dense<0.000000e+00> : vector<256xf32>
    %71 = vector.multi_reduction <add>, %70, %cst_36 [0] : vector<128x256xf32> to vector<256xf32>
    %72 = vector.shape_cast %71 : vector<256xf32> to vector<1x256xf32>
    %73 = arith.mulf %70, %70 : vector<128x256xf32>
    %cst_37 = arith.constant dense<0.000000e+00> : vector<256xf32>
    %74 = vector.multi_reduction <add>, %73, %cst_37 [0] : vector<128x256xf32> to vector<256xf32>
    %75 = vector.shape_cast %74 : vector<256xf32> to vector<1x256xf32>
    %cst_38 = arith.constant 7.812500e-03 : f32
    %76 = vector.broadcast %cst_38 : f32 to vector<1x256xf32>
    %77 = arith.mulf %72, %76 : vector<1x256xf32>
    %cst_39 = arith.constant 7.812500e-03 : f32
    %78 = vector.broadcast %cst_39 : f32 to vector<1x256xf32>
    %79 = arith.mulf %75, %78 : vector<1x256xf32>
    %80 = arith.mulf %77, %77 : vector<1x256xf32>
    %81 = arith.subf %79, %80 : vector<1x256xf32>
    %c0_40 = arith.constant 0 : index
    %c0_41 = arith.constant 0 : index
    %82 = vector.load %arg11[%c0_40, %c0_41] : memref<1x256xf32, #tpu.memory_space<vmem>>, vector<1x256xf32>
    %cst_42 = arith.constant 9.99999974E-6 : f32
    %83 = vector.broadcast %cst_42 : f32 to vector<1x256xf32>
    %84 = arith.addf %81, %83 : vector<1x256xf32>
    %85 = math.rsqrt %84 : vector<1x256xf32>
    %86 = arith.mulf %82, %85 : vector<1x256xf32>
    %c0_43 = arith.constant 0 : index
    %c0_44 = arith.constant 0 : index
    %87 = vector.load %arg12[%c0_43, %c0_44] : memref<1x256xf32, #tpu.memory_space<vmem>>, vector<1x256xf32>
    %88 = arith.mulf %77, %86 : vector<1x256xf32>
    %89 = arith.subf %87, %88 : vector<1x256xf32>
    %90 = vector.broadcast %86 : vector<1x256xf32> to vector<128x256xf32>
    %91 = arith.mulf %70, %90 : vector<128x256xf32>
    %92 = vector.broadcast %89 : vector<1x256xf32> to vector<128x256xf32>
    %93 = arith.addf %91, %92 : vector<128x256xf32>
    %94 = arith.truncf %93 : vector<128x256xf32> to vector<128x256xbf16>
    %c0_45 = arith.constant 0 : index
    %c0_46 = arith.constant 0 : index
    %95 = vector.load %arg13[%c0_45, %c0_46] : memref<256x256xbf16, #tpu.memory_space<vmem>>, vector<256x256xbf16>
    %cst_47 = arith.constant dense<0.000000e+00> : vector<128x256xf32>
    %96 = tpu.matmul %94, %95, %cst_47 {dimension_numbers = #tpu.dot_dimension_numbers<[1], [0], [0], [1], [0, 0, 1, 1], [], []>} : vector<128x256xbf16>, vector<256x256xbf16>, vector<128x256xf32> -> vector<128x256xf32>
    %c0_48 = arith.constant 0 : index
    %c0_49 = arith.constant 0 : index
    %97 = vector.load %arg14[%c0_48, %c0_49] : memref<1x256xf32, #tpu.memory_space<vmem>>, vector<1x256xf32>
    %98 = vector.broadcast %97 : vector<1x256xf32> to vector<128x256xf32>
    %99 = arith.addf %96, %98 : vector<128x256xf32>
    %cst_50 = arith.constant 0.000000e+00 : f32
    %100 = vector.broadcast %cst_50 : f32 to vector<128x256xf32>
    %101 = arith.maximumf %99, %100 : vector<128x256xf32>
    %cst_51 = arith.constant dense<0.000000e+00> : vector<256xf32>
    %102 = vector.multi_reduction <add>, %101, %cst_51 [0] : vector<128x256xf32> to vector<256xf32>
    %103 = vector.shape_cast %102 : vector<256xf32> to vector<1x256xf32>
    %104 = arith.mulf %101, %101 : vector<128x256xf32>
    %cst_52 = arith.constant dense<0.000000e+00> : vector<256xf32>
    %105 = vector.multi_reduction <add>, %104, %cst_52 [0] : vector<128x256xf32> to vector<256xf32>
    %106 = vector.shape_cast %105 : vector<256xf32> to vector<1x256xf32>
    %cst_53 = arith.constant 7.812500e-03 : f32
    %107 = vector.broadcast %cst_53 : f32 to vector<1x256xf32>
    %108 = arith.mulf %103, %107 : vector<1x256xf32>
    %cst_54 = arith.constant 7.812500e-03 : f32
    %109 = vector.broadcast %cst_54 : f32 to vector<1x256xf32>
    %110 = arith.mulf %106, %109 : vector<1x256xf32>
    %111 = arith.mulf %108, %108 : vector<1x256xf32>
    %112 = arith.subf %110, %111 : vector<1x256xf32>
    %c0_55 = arith.constant 0 : index
    %c0_56 = arith.constant 0 : index
    %113 = vector.load %arg15[%c0_55, %c0_56] : memref<1x256xf32, #tpu.memory_space<vmem>>, vector<1x256xf32>
    %cst_57 = arith.constant 9.99999974E-6 : f32
    %114 = vector.broadcast %cst_57 : f32 to vector<1x256xf32>
    %115 = arith.addf %112, %114 : vector<1x256xf32>
    %116 = math.rsqrt %115 : vector<1x256xf32>
    %117 = arith.mulf %113, %116 : vector<1x256xf32>
    %c0_58 = arith.constant 0 : index
    %c0_59 = arith.constant 0 : index
    %118 = vector.load %arg16[%c0_58, %c0_59] : memref<1x256xf32, #tpu.memory_space<vmem>>, vector<1x256xf32>
    %119 = arith.mulf %108, %117 : vector<1x256xf32>
    %120 = arith.subf %118, %119 : vector<1x256xf32>
    %121 = vector.broadcast %117 : vector<1x256xf32> to vector<128x256xf32>
    %122 = arith.mulf %101, %121 : vector<128x256xf32>
    %123 = vector.broadcast %120 : vector<1x256xf32> to vector<128x256xf32>
    %124 = arith.addf %122, %123 : vector<128x256xf32>
    %125 = arith.truncf %124 : vector<128x256xf32> to vector<128x256xbf16>
    %c0_60 = arith.constant 0 : index
    %c0_61 = arith.constant 0 : index
    %126 = vector.load %arg17[%c0_60, %c0_61] : memref<256x256xbf16, #tpu.memory_space<vmem>>, vector<256x256xbf16>
    %cst_62 = arith.constant dense<0.000000e+00> : vector<128x256xf32>
    %127 = tpu.matmul %125, %126, %cst_62 {dimension_numbers = #tpu.dot_dimension_numbers<[1], [0], [0], [1], [0, 0, 1, 1], [], []>} : vector<128x256xbf16>, vector<256x256xbf16>, vector<128x256xf32> -> vector<128x256xf32>
    %c0_63 = arith.constant 0 : index
    %c0_64 = arith.constant 0 : index
    %128 = vector.load %arg18[%c0_63, %c0_64] : memref<1x256xf32, #tpu.memory_space<vmem>>, vector<1x256xf32>
    %129 = vector.broadcast %128 : vector<1x256xf32> to vector<128x256xf32>
    %130 = arith.addf %127, %129 : vector<128x256xf32>
    %cst_65 = arith.constant 0.000000e+00 : f32
    %131 = vector.broadcast %cst_65 : f32 to vector<128x256xf32>
    %132 = arith.maximumf %130, %131 : vector<128x256xf32>
    %cst_66 = arith.constant dense<0.000000e+00> : vector<256xf32>
    %133 = vector.multi_reduction <add>, %132, %cst_66 [0] : vector<128x256xf32> to vector<256xf32>
    %134 = vector.shape_cast %133 : vector<256xf32> to vector<1x256xf32>
    %135 = arith.mulf %132, %132 : vector<128x256xf32>
    %cst_67 = arith.constant dense<0.000000e+00> : vector<256xf32>
    %136 = vector.multi_reduction <add>, %135, %cst_67 [0] : vector<128x256xf32> to vector<256xf32>
    %137 = vector.shape_cast %136 : vector<256xf32> to vector<1x256xf32>
    %cst_68 = arith.constant 7.812500e-03 : f32
    %138 = vector.broadcast %cst_68 : f32 to vector<1x256xf32>
    %139 = arith.mulf %134, %138 : vector<1x256xf32>
    %cst_69 = arith.constant 7.812500e-03 : f32
    %140 = vector.broadcast %cst_69 : f32 to vector<1x256xf32>
    %141 = arith.mulf %137, %140 : vector<1x256xf32>
    %142 = arith.mulf %139, %139 : vector<1x256xf32>
    %143 = arith.subf %141, %142 : vector<1x256xf32>
    %c0_70 = arith.constant 0 : index
    %c0_71 = arith.constant 0 : index
    %144 = vector.load %arg19[%c0_70, %c0_71] : memref<1x256xf32, #tpu.memory_space<vmem>>, vector<1x256xf32>
    %cst_72 = arith.constant 9.99999974E-6 : f32
    %145 = vector.broadcast %cst_72 : f32 to vector<1x256xf32>
    %146 = arith.addf %143, %145 : vector<1x256xf32>
    %147 = math.rsqrt %146 : vector<1x256xf32>
    %148 = arith.mulf %144, %147 : vector<1x256xf32>
    %c0_73 = arith.constant 0 : index
    %c0_74 = arith.constant 0 : index
    %149 = vector.load %arg20[%c0_73, %c0_74] : memref<1x256xf32, #tpu.memory_space<vmem>>, vector<1x256xf32>
    %150 = arith.mulf %139, %148 : vector<1x256xf32>
    %151 = arith.subf %149, %150 : vector<1x256xf32>
    %152 = vector.broadcast %148 : vector<1x256xf32> to vector<128x256xf32>
    %153 = arith.mulf %132, %152 : vector<128x256xf32>
    %154 = vector.broadcast %151 : vector<1x256xf32> to vector<128x256xf32>
    %155 = arith.addf %153, %154 : vector<128x256xf32>
    %156 = arith.truncf %155 : vector<128x256xf32> to vector<128x256xbf16>
    %c0_75 = arith.constant 0 : index
    %c0_76 = arith.constant 0 : index
    %157 = vector.load %arg21[%c0_75, %c0_76] : memref<256x128xbf16, #tpu.memory_space<vmem>>, vector<256x128xbf16>
    %cst_77 = arith.constant dense<0.000000e+00> : vector<128x128xf32>
    %158 = tpu.matmul %156, %157, %cst_77 {dimension_numbers = #tpu.dot_dimension_numbers<[1], [0], [0], [1], [0, 0, 1, 1], [], []>} : vector<128x256xbf16>, vector<256x128xbf16>, vector<128x128xf32> -> vector<128x128xf32>
    %c0_78 = arith.constant 0 : index
    %c0_79 = arith.constant 0 : index
    %159 = vector.load %arg22[%c0_78, %c0_79] : memref<1x128xf32, #tpu.memory_space<vmem>>, vector<1x128xf32>
    %160 = vector.broadcast %159 : vector<1x128xf32> to vector<128x128xf32>
    %161 = arith.addf %158, %160 : vector<128x128xf32>
    %c0_80 = arith.constant 0 : index
    %c0_81 = arith.constant 0 : index
    %162 = vector.load %arg23[%c0_80, %c0_81] : memref<128x128xf32, #tpu.memory_space<vmem>>, vector<128x128xf32>
    tpu.vector_store %arg23[%c0_80, %c0_81], %161 {strides = array<i32>} : memref<128x128xf32, #tpu.memory_space<vmem>>, vector<128x128xf32>,
    return
  }
}

</mosaic_0001>

<bundles_post_ra>
// kernel: tpu_custom_call.1
= control target key start
LH: loop header
LB: loop body
LE: loop exit
PB: predicated region body
PF: predicated region fallthrough
CT: control target
= control target key end

     0   :  { %s5827_s0 = inlined_call_operand.vmem [shape: f32[128,12], index: 0, kind: input, shape index: {}]   ;;  %s5828_s1 = inlined_call_operand.vmem [shape: bf16[12,256], index: 1, kind: input, shape index: {}]   ;;  %s5829_s2 = inlined_call_operand.vmem [shape: f32[1,256], index: 2, kind: input, shape index: {}]   ;;  %s5830_s3 = inlined_call_operand.vmem [shape: f32[1,256], index: 3, kind: input, shape index: {}]   ;;  %s5831_s4 = inlined_call_operand.vmem [shape: f32[1,256], index: 4, kind: input, shape index: {}]   ;;  %s5832_s5 = inlined_call_operand.hbm [shape: bf16[256,256], index: 5, kind: input, shape index: {}]   ;;  %s5833_s6 = inlined_call_operand.vmem [shape: f32[1,256], index: 6, kind: input, shape index: {}]   ;;  %s5834_s7 = inlined_call_operand.vmem [shape: f32[1,256], index: 7, kind: input, shape index: {}]   ;;  %s5835_s8 = inlined_call_operand.vmem [shape: f32[1,256], index: 8, kind: input, shape index: {}]   ;;  %s5836_s9 = inlined_call_operand.hbm [shape: bf16[256,256], index: 9, kind: input, shape index: {}]   ;;  %s5837_s10 = inlined_call_operand.vmem [shape: f32[1,256], index: 10, kind: input, shape index: {}]   ;;  %s5838_s11 = inlined_call_operand.vmem [shape: f32[1,256], index: 11, kind: input, shape index: {}]   ;;  %s5839_s12 = inlined_call_operand.vmem [shape: f32[1,256], index: 12, kind: input, shape index: {}]   ;;  %s5840_s13 = inlined_call_operand.hbm [shape: bf16[256,256], index: 13, kind: input, shape index: {}]   ;;  %s5841_s14 = inlined_call_operand.vmem [shape: f32[1,256], index: 14, kind: input, shape index: {}]   ;;  %s5842_s15 = inlined_call_operand.vmem [shape: f32[1,256], index: 15, kind: input, shape index: {}]   ;;  %s5843_s16 = inlined_call_operand.vmem [shape: f32[1,256], index: 16, kind: input, shape index: {}]   ;;  %s5844_s17 = inlined_call_operand.hbm [shape: bf16[256,256], index: 17, kind: input, shape index: {}]   ;;  %s5845_s18 = inlined_call_operand.vmem [shape: f32[1,256], index: 18, kind: input, shape index: {}]   ;;  %s5846_s19 = inlined_call_operand.vmem [shape: f32[1,256], index: 19, kind: input, shape index: {}]   ;;  %s5847_s20 = inlined_call_operand.vmem [shape: f32[1,256], index: 20, kind: input, shape index: {}]   ;;  %s5848_s21 = inlined_call_operand.vmem [shape: bf16[256,128], index: 21, kind: input, shape index: {}]   ;;  %s5849_s22 = inlined_call_operand.vmem [shape: f32[1,128], index: 22, kind: input, shape index: {}]   ;;  %s5850_s23 = inlined_call_operand.hbm [shape: f32[128,128], index: 23, kind: output, shape index: {}]  }
   0x1   :  { %5853 = sst [smem:[#allocation15_spill]] %s5827_s0 }
   0x2   :  { %5854 = sst [smem:[#allocation16_spill]] %s5828_s1 }
   0x3   :  { %5855 = sst [smem:[#allocation17_spill]] %s5829_s2 }
   0x4   :  { %5856 = sst [smem:[#allocation18_spill]] %s5830_s3 }
   0x5   :  { %5857 = sst [smem:[#allocation19_spill]] %s5831_s4 }
   0x6   :  { %5858 = sst [smem:[#allocation20_spill]] %s5832_s5 }
   0x7   :  { %5859 = sst [smem:[#allocation21_spill]] %s5833_s6 }
   0x8   :  { %5860 = sst [smem:[#allocation22_spill]] %s5834_s7 }
   0x9   :  { %28 = vsyncpa [#allocation3], 0 }
   0xa   :  { %29 = vsyncpa [#allocation6], 0 }
   0xb   :  { %30 = vsyncpa [#allocation9], 0 }
   0xc   :  { %31 = vsyncpa [#allocation4], 0  ;;  %s3961_s4 = smov [#allocation5]   ;;  %s3962_s24 = smov [#allocation2]  }
   0xd   :  { %s65_s30 = sshll.u32 %s3961_s4, 4  ;;  %s47_s25 = sshll.u32 %s3962_s24, 4  ;;  %s66_s30 = int_to_ptr.vmem [resolvable:$true] %s65_s30  ;;  %s48_s25 = int_to_ptr.vmem [resolvable:$true] %s47_s25 }
   0xe   :  { %s3861_s5 = scalar_lea.vmem %s66_s30, 4096  ;;  %p3866_p1 = scmp.lt.s32.totalorder %s66_s30, %s66_s30 }
   0xf   :  { %p3862_p0 = scmp.ne.s32.totalorder %s66_s30, %s3861_s5  ;;  %p3867_p2 = scmp.lt.s32.totalorder %s3861_s5, %s3861_s5 }
  0x11   :  { %p3868_p3 = por %p3867_p2, %p3866_p1 }
  0x13   :  { %p3869_p4 = pnand %p3868_p3, %p3862_p0 }
  0x15   :  { %3872 = shalt.err (!%p3869_p4)
}
  0x16   :  { %s3963_s1 = smov 128   ;;  %s3964_s26 = smov 8  }
  0x17   :  { %71 = dma.hbm_to_vmem [thread:$0]  %s5836_s9, 4096, %s66_s30, [#allocation6], %s3963_s1, %s3963_s1, %s3964_s26  }
  0x18   :  { %s3881_s27 = scalar_lea.vmem %s48_s25, 4096  ;;  %p3886_p6 = scmp.lt.s32.totalorder %s48_s25, %s48_s25 }
  0x19   :  { %p3882_p5 = scmp.ne.s32.totalorder %s48_s25, %s3881_s27  ;;  %p3887_p7 = scmp.lt.s32.totalorder %s3881_s27, %s3881_s27 }
  0x1b   :  { %p3888_p8 = por %p3887_p7, %p3886_p6 }
  0x1d   :  { %p3889_p9 = pnand %p3888_p8, %p3882_p5 }
  0x1f   :  { %3892 = shalt.err (!%p3889_p9)
}
  0x20   :  { %s5861_s29 = sld [smem:[#allocation20_spill]]  ;;  %s3965_s3 = smov [#allocation7]  }
  0x21   :  { %s83_s0 = sshll.u32 %s3965_s3, 4  ;;  %s3966_s4 = smov [#allocation8]   ;;  %s84_s0 = int_to_ptr.vmem [resolvable:$true] %s83_s0 }
  0x22   :  { %s101_s24 = sshll.u32 %s3966_s4, 4  ;;  %s3901_s9 = scalar_lea.vmem %s84_s0, 4096  ;;  %s102_s24 = int_to_ptr.vmem [resolvable:$true] %s101_s24 }
  0x23   :  { %p3902_p10 = scmp.ne.s32.totalorder %s84_s0, %s3901_s9  ;;  %p3906_p11 = scmp.lt.s32.totalorder %s84_s0, %s84_s0 }
  0x24   :  { %p3907_p12 = scmp.lt.s32.totalorder %s3901_s9, %s3901_s9 }
  0x26   :  { %53 = dma.hbm_to_vmem [thread:$0]  %s5861_s29, 4096, %s48_s25, [#allocation3], %s3963_s1, %s3963_s1, %s3964_s26  }
  0x27   :  { %p3908_p13 = por %p3907_p12, %p3906_p11 }
  0x29   :  { %p3909_p0 = pnand %p3908_p13, %p3902_p10 }
  0x2b   :  { %3912 = shalt.err (!%p3909_p0)
}
  0x2c   :  { %89 = dma.hbm_to_vmem [thread:$0]  %s5840_s13, 4096, %s84_s0, [#allocation6], %s3963_s1, %s3963_s1, %s3964_s26  }
  0x2d   :  { %s3921_s25 = scalar_lea.vmem %s102_s24, 4096  ;;  %p3926_p2 = scmp.lt.s32.totalorder %s102_s24, %s102_s24 }
  0x2e   :  { %p3922_p1 = scmp.ne.s32.totalorder %s102_s24, %s3921_s25  ;;  %p3927_p3 = scmp.lt.s32.totalorder %s3921_s25, %s3921_s25 }
  0x30   :  { %p3928_p4 = por %p3927_p3, %p3926_p2 }
  0x32   :  { %p3929_p5 = pnand %p3928_p4, %p3922_p1 }
  0x34   :  { %3932 = shalt.err (!%p3929_p5)
}
  0x35   :  { %107 = dma.hbm_to_vmem [thread:$0]  %s5844_s17, 4096, %s102_s24, [#allocation9], %s3963_s1, %s3963_s1, %s3964_s26  }
  0x36   :  { %3953 = dma.done.wait [#allocation3], 4096  }
  0x37   :  { %3954 = vsyncadd [#allocation3], 4294963200 }
  0x38   :  { %3955 = dma.done.wait [#allocation6], 8192  }
  0x39   :  { %3956 = vsyncadd [#allocation6], 4294959104 }
  0x3a   :  { %3957 = dma.done.wait [#allocation9], 4096  }
  0x3b   :  { %3958 = vsyncadd [#allocation9], 4294963200  ;;  %v3967_v0 = vmov 0   ;;  %vm202_vm0 = vcmask 1045504   ;;  %s5862_s7 = sld [smem:[#allocation16_spill]]  ;;  %vm177_vm1 = vcmask 97280  }
  0x3c   :  { %241 = vmatprep.mubr.bf16.mxu0 %v3967_v0  ;;  %s5863_s17 = sld [smem:[#allocation15_spill]]  ;;  %v3625_v28 = vld [vmem:[#allocation2 + $0x74] ss:$8 sps:$4 sm:$0xff]   ;;  %v3627_v29 = vld [vmem:[#allocation2 + $0x70] ss:$8 sps:$4 sm:$0xff]  }
  0x3d   :  { %830 = vmatprep.subr.bf16.mxu1 %v3625_v28  ;;  %v3628_v30 = vld [vmem:[#allocation2 + $0x64] ss:$8 sps:$4 sm:$0xff]   ;;  %v3630_v31 = vld [vmem:[#allocation2 + $0x60] ss:$8 sps:$4 sm:$0xff]   ;;  %v3631_v32 = vld [vmem:[#allocation2 + $0x54] ss:$8 sps:$4 sm:$0xff]  }
  0x3e   :  { %831 = vmatpush1.bf16.msra.mxu1 %v3627_v29  ;;  %v3633_v33 = vld [vmem:[#allocation2 + $0x50] ss:$8 sps:$4 sm:$0xff]   ;;  %v3634_v34 = vld [vmem:[#allocation2 + $0x44] ss:$8 sps:$4 sm:$0xff]   ;;  %v3636_v35 = vld [vmem:[#allocation2 + $0x40] ss:$8 sps:$4 sm:$0xff]  }
  0x3f   :  { %832 = vmatprep.subr.bf16.mxu1 %v3628_v30  ;;  %v3637_v36 = vld [vmem:[#allocation2 + $0x34] ss:$8 sps:$4 sm:$0xff]   ;;  %v3639_v37 = vld [vmem:[#allocation2 + $0x30] ss:$8 sps:$4 sm:$0xff]   ;;  %v3640_v38 = vld [vmem:[#allocation2 + $0x24] ss:$8 sps:$4 sm:$0xff]  }
  0x40   :  { %v3642_v39 = vld [vmem:[#allocation2 + $0x20] ss:$8 sps:$4 sm:$0xff]   ;;  %v3643_v40 = vld [vmem:[#allocation2 + $0x14] ss:$8 sps:$4 sm:$0xff]   ;;  %v3645_v41 = vld [vmem:[#allocation2 + $0x10] ss:$8 sps:$4 sm:$0xff]  }
  0x41   :  { %v3622_v1 = vld [vmem:[%s5862_s7 + $0x4] ss:$8 sps:$4 sm:$0x3f]   ;;  %v3624_v2 = vld [vmem:[%s5862_s7] ss:$8 sps:$4 sm:$0x3f]  }
  0x42   :  { %v131_v3 = vld [vmem:[%s5863_s17] sm:$0xff]  ;;  %v132_v4 = vld [vmem:[%s5863_s17 + $0x8] sm:$0xff]  ;;  %3379 = vmatprep.subr.msk.bf16.mxu0 %vm202_vm0, %v3622_v1  ;;  %v204_v5 = vsel %vm202_vm0, %v3624_v2, 0  ;;  %v133_v7 = vld [vmem:[%s5863_s17 + $0x10] sm:$0xff]  ;;  %833 = vmatpush1.bf16.msra.mxu1 %v3630_v31  ;;  %s5864_s24 = sld [smem:[#allocation17_spill]] }
  0x43   :  { %v147_v6 = vpack.c.bf16 %v132_v4, %v131_v3  ;;  %224 = vmatpush1.bf16.msra.mxu0 %v204_v5  ;;  %v134_v8 = vld [vmem:[%s5863_s17 + $0x18] sm:$0xff]  ;;  %v135_v10 = vld [vmem:[%s5863_s17 + $0x20] sm:$0xff]  ;;  %v136_v11 = vld [vmem:[%s5863_s17 + $0x28] sm:$0xff]  ;;  %834 = vmatprep.subr.bf16.mxu1 %v3631_v32  ;;  %s5865_s5 = sld [smem:[#allocation18_spill]] }
  0x44   :  { %v148_v9 = vpack.c.bf16 %v134_v8, %v133_v7  ;;  %v149_v12 = vpack.c.bf16 %v136_v11, %v135_v10  ;;  %v137_v13 = vld [vmem:[%s5863_s17 + $0x30] sm:$0xff]  ;;  %v138_v14 = vld [vmem:[%s5863_s17 + $0x38] sm:$0xff]  ;;  %v139_v16 = vld [vmem:[%s5863_s17 + $0x40] sm:$0xff]  ;;  %s5866_s6 = sld [smem:[#allocation19_spill]] }
  0x45   :  { %v150_v15 = vpack.c.bf16 %v138_v14, %v137_v13  ;;  %v140_v17 = vld [vmem:[%s5863_s17 + $0x48] sm:$0xff]  ;;  %v141_v19 = vld [vmem:[%s5863_s17 + $0x50] sm:$0xff]  ;;  %v142_v20 = vld [vmem:[%s5863_s17 + $0x58] sm:$0xff]  ;;  %s5867_s7 = sld [smem:[#allocation21_spill]] }
  0x46   :  { %3380 = vmatmul.mubr.msk.bf16.vlgmr.msra.gmra.mxu0 %vm177_vm1, %v147_v6  ;;  %v151_v18 = vpack.c.bf16 %v140_v17, %v139_v16  ;;  %v152_v21 = vpack.c.bf16 %v142_v20, %v141_v19  ;;  %v143_v22 = vld [vmem:[%s5863_s17 + $0x60] sm:$0xff]  ;;  %v144_v23 = vld [vmem:[%s5863_s17 + $0x68] sm:$0xff]  ;;  %v145_v25 = vld [vmem:[%s5863_s17 + $0x70] sm:$0xff]  ;;  %835 = vmatpush1.bf16.msra.mxu1 %v3633_v33  ;;  %s5868_s3 = sld [smem:[#allocation22_spill]] }
  0x47   :  { %251 = vmatprep.mubr.bf16.mxu0 %v3967_v0  ;;  %v153_v24 = vpack.c.bf16 %v144_v23, %v143_v22  ;;  %v146_v26 = vld [vmem:[%s5863_s17 + $0x78] sm:$0xff]  ;;  %836 = vmatprep.subr.bf16.mxu1 %v3634_v34  ;;  %v3646_v42 = vld [vmem:[#allocation2 + $0x4] ss:$8 sps:$4 sm:$0xff]   ;;  %v3648_v43 = vld [vmem:[#allocation2] ss:$8 sps:$4 sm:$0xff]  }
  0x48   :  { %v154_v27 = vpack.c.bf16 %v146_v26, %v145_v25  ;;  %v3649_v44 = vld [vmem:[#allocation2 + $0xf4] ss:$8 sps:$4 sm:$0xff]   ;;  %v3651_v45 = vld [vmem:[#allocation2 + $0xf0] ss:$8 sps:$4 sm:$0xff]   ;;  %v3652_v46 = vld [vmem:[#allocation2 + $0xe4] ss:$8 sps:$4 sm:$0xff]  }
  0x49   :  { %v3654_v47 = vld [vmem:[#allocation2 + $0xe0] ss:$8 sps:$4 sm:$0xff]   ;;  %v3655_v48 = vld [vmem:[#allocation2 + $0xd4] ss:$8 sps:$4 sm:$0xff]   ;;  %v3657_v49 = vld [vmem:[#allocation2 + $0xd0] ss:$8 sps:$4 sm:$0xff]  }
  0x4a   :  { %837 = vmatpush1.bf16.msra.mxu1 %v3636_v35  ;;  %v3658_v50 = vld [vmem:[#allocation2 + $0xc4] ss:$8 sps:$4 sm:$0xff]   ;;  %v3660_v51 = vld [vmem:[#allocation2 + $0xc0] ss:$8 sps:$4 sm:$0xff]   ;;  %v3661_v52 = vld [vmem:[#allocation2 + $0xb4] ss:$8 sps:$4 sm:$0xff]  }
  0x4b   :  { %838 = vmatprep.subr.bf16.mxu1 %v3637_v36  ;;  %v3663_v53 = vld [vmem:[#allocation2 + $0xb0] ss:$8 sps:$4 sm:$0xff]   ;;  %v3664_v54 = vld [vmem:[#allocation2 + $0xa4] ss:$8 sps:$4 sm:$0xff]   ;;  %v3666_v55 = vld [vmem:[#allocation2 + $0xa0] ss:$8 sps:$4 sm:$0xff]  }
  0x4c   :  { %v3667_v56 = vld [vmem:[#allocation2 + $0x94] ss:$8 sps:$4 sm:$0xff]   ;;  %v3669_v57 = vld [vmem:[#allocation2 + $0x90] ss:$8 sps:$4 sm:$0xff]   ;;  %v3670_v58 = vld [vmem:[#allocation2 + $0x84] ss:$8 sps:$4 sm:$0xff]  }
  0x4d   :  { %v3672_v59 = vld [vmem:[#allocation2 + $0x80] ss:$8 sps:$4 sm:$0xff]  }
  0x4e   :  { %3381 = vmatmul.mubr.msk.bf16.gmra.mxu0 %vm177_vm1, %v148_v9  ;;  %839 = vmatpush1.bf16.msra.mxu1 %v3639_v37  ;;  %v157_v8 = vld [vmem:[%s5864_s24] sm:$0x3] }
  0x4f   :  { %261 = vmatprep.mubr.bf16.mxu0 %v3967_v0  ;;  %840 = vmatprep.subr.bf16.mxu1 %v3640_v38 }
  0x52   :  { %841 = vmatpush1.bf16.msra.mxu1 %v3642_v39 }
  0x53   :  { %842 = vmatprep.subr.bf16.mxu1 %v3643_v40 }
  0x56   :  { %3382 = vmatmul.mubr.msk.bf16.gmra.mxu0 %vm177_vm1, %v149_v12  ;;  %843 = vmatpush1.bf16.msra.mxu1 %v3645_v41 }
  0x57   :  { %271 = vmatprep.mubr.bf16.mxu0 %v3967_v0  ;;  %844 = vmatprep.subr.bf16.mxu1 %v3646_v42 }
  0x5a   :  { %845 = vmatpush1.bf16.msra.mxu1 %v3648_v43 }
  0x5b   :  { %846 = vmatprep.subr.bf16.mxu1 %v3649_v44 }
  0x5e   :  { %3383 = vmatmul.mubr.msk.bf16.gmra.mxu0 %vm177_vm1, %v150_v15  ;;  %847 = vmatpush2.bf16.msra.mxu1 %v3651_v45 }
  0x5f   :  { %281 = vmatprep.mubr.bf16.mxu0 %v3967_v0  ;;  %848 = vmatprep.subr.bf16.mxu1 %v3652_v46 }
  0x62   :  { %849 = vmatpush2.bf16.msra.mxu1 %v3654_v47 }
  0x63   :  { %850 = vmatprep.subr.bf16.mxu1 %v3655_v48 }
  0x66   :  { %3384 = vmatmul.mubr.msk.bf16.gmra.mxu0 %vm177_vm1, %v151_v18  ;;  %851 = vmatpush2.bf16.msra.mxu1 %v3657_v49 }
  0x67   :  { %291 = vmatprep.mubr.bf16.mxu0 %v3967_v0  ;;  %852 = vmatprep.subr.bf16.mxu1 %v3658_v50 }
  0x6a   :  { %853 = vmatpush2.bf16.msra.mxu1 %v3660_v51 }
  0x6b   :  { %854 = vmatprep.subr.bf16.mxu1 %v3661_v52 }
  0x6e   :  { %3385 = vmatmul.mubr.msk.bf16.gmra.mxu0 %vm177_vm1, %v152_v21  ;;  %855 = vmatpush2.bf16.msra.mxu1 %v3663_v53 }
  0x6f   :  { %301 = vmatprep.mubr.bf16.mxu0 %v3967_v0  ;;  %856 = vmatprep.subr.bf16.mxu1 %v3664_v54 }
  0x72   :  { %857 = vmatpush2.bf16.msra.mxu1 %v3666_v55 }
  0x73   :  { %858 = vmatprep.subr.bf16.mxu1 %v3667_v56 }
  0x76   :  { %3386 = vmatmul.mubr.msk.bf16.gmra.mxu0 %vm177_vm1, %v153_v24  ;;  %859 = vmatpush2.bf16.msra.mxu1 %v3669_v57 }
  0x77   :  { %311 = vmatprep.mubr.bf16.mxu0 %v3967_v0  ;;  %860 = vmatprep.subr.bf16.mxu1 %v3670_v58  ;;  %v159_v0 = vlaneseq }
  0x79   :  { %v4176_v3 = vshrl.u32 %v159_v0, 7 }
  0x7a   :  { %861 = vmatpush2.bf16.msra.mxu1 %v3672_v59 }
  0x7b   :  { %v4179_v6 = vsub.s32 0, %v4176_v3  ;;  %v4185_v9 = vsub.s32 1, %v4176_v3 }
  0x7d   :  { %v4188_v11 = vrot.slane %v157_v8, %v4179_v6  ;;  %v4191_v13 = vrot.slane %v157_v8, %v4185_v9 }
  0x7e   :  { %3387 = vmatmul.mubr.msk.bf16.gmra.mxu0 %vm177_vm1, %v154_v27 }
 0x106   :  { %v243_v60 = vpop.f32.mrf.mxu0 }
 0x107   :  { %v244_v17 = vadd.f32 %v243_v60, %v4188_v11 }
 0x108   :  { %v245_v61 = vpop.f32.mrf.mxu0 }
 0x109   :  { %v246_v20 = vadd.f32 %v245_v61, %v4191_v13  ;;  %v4204_v26 = vmax.f32 %v244_v17, 0.0 }
 0x10a   :  { %v247_v62 = vpop.f32.mrf.mxu0 }
 0x10b   :  { %v248_v14 = vadd.f32 %v247_v62, %v4188_v11  ;;  %v4209_v30 = vmax.f32 %v246_v20, 0.0  ;;  %v396_v38 = vmul.f32 %v4204_v26, %v4204_v26 }
 0x10c   :  { %v249_v63 = vpop.f32.mrf.mxu0 }
 0x10d   :  { %v250_v16 = vadd.f32 %v249_v63, %v4191_v13  ;;  %v4198_v21 = vmax.f32 %v248_v14, 0.0  ;;  %v397_v43 = vmul.f32 %v4209_v30, %v4209_v30 }
 0x10e   :  { %v253_v1 = vpop.f32.mrf.mxu0 }
 0x10f   :  { %v254_v18 = vadd.f32 %v253_v1, %v4188_v11  ;;  %v4201_v24 = vmax.f32 %v250_v16, 0.0  ;;  %v398_v31 = vmul.f32 %v4198_v21, %v4198_v21  ;;  %v354_v44 = vadd.f32 %v4198_v21, %v4204_v26 }
 0x110   :  { %v255_v2 = vpop.f32.mrf.mxu0 }
 0x111   :  { %v256_v22 = vadd.f32 %v255_v2, %v4191_v13  ;;  %v4206_v27 = vmax.f32 %v254_v18, 0.0  ;;  %v399_v36 = vmul.f32 %v4201_v24, %v4201_v24  ;;  %v428_v46 = vadd.f32 %v398_v31, %v396_v38 }
 0x112   :  { %v257_v4 = vpop.f32.mrf.mxu0  ;;  %v375_v51 = vadd.f32 %v4201_v24, %v4209_v30 }
 0x113   :  { %v258_v25 = vadd.f32 %v257_v4, %v4188_v11  ;;  %v4213_v32 = vmax.f32 %v256_v22, 0.0  ;;  %v400_v39 = vmul.f32 %v4206_v27, %v4206_v27  ;;  %v449_v52 = vadd.f32 %v399_v36, %v397_v43 }
 0x114   :  { %v259_v5 = vpop.f32.mrf.mxu0  ;;  %v355_v55 = vadd.f32 %v354_v44, %v4206_v27 }
 0x115   :  { %v260_v28 = vadd.f32 %v259_v5, %v4191_v13  ;;  %v4219_v37 = vmax.f32 %v258_v25, 0.0  ;;  %v401_v47 = vmul.f32 %v4213_v32, %v4213_v32  ;;  %v429_v56 = vadd.f32 %v428_v46, %v400_v39 }
 0x116   :  { %v263_v7 = vpop.f32.mrf.mxu0  ;;  %v376_v60 = vadd.f32 %v375_v51, %v4213_v32 }
 0x117   :  { %v264_v33 = vadd.f32 %v263_v7, %v4188_v11  ;;  %v4225_v40 = vmax.f32 %v260_v28, 0.0  ;;  %v402_v53 = vmul.f32 %v4219_v37, %v4219_v37  ;;  %v450_v0 = vadd.f32 %v449_v52, %v401_v47 }
 0x118   :  { %v265_v10 = vpop.f32.mrf.mxu0  ;;  %v356_v1 = vadd.f32 %v355_v55, %v4219_v37 }
 0x119   :  { %v266_v34 = vadd.f32 %v265_v10, %v4191_v13  ;;  %v4235_v48 = vmax.f32 %v264_v33, 0.0  ;;  %v403_v57 = vmul.f32 %v4225_v40, %v4225_v40  ;;  %v430_v7 = vadd.f32 %v429_v56, %v402_v53 }
 0x11a   :  { %v267_v12 = vpop.f32.mrf.mxu0  ;;  %v377_v14 = vadd.f32 %v376_v60, %v4225_v40 }
 0x11b   :  { %v268_v41 = vadd.f32 %v267_v12, %v4188_v11  ;;  %v4237_v49 = vmax.f32 %v266_v34, 0.0  ;;  %v404_v2 = vmul.f32 %v4235_v48, %v4235_v48  ;;  %v357_v16 = vadd.f32 %v356_v1, %v4235_v48 }
 0x11c   :  { %v269_v15 = vpop.f32.mrf.mxu0 }
 0x11d   :  { %v270_v45 = vadd.f32 %v269_v15, %v4191_v13  ;;  %v4247_v58 = vmax.f32 %v268_v41, 0.0  ;;  %v405_v4 = vmul.f32 %v4237_v49, %v4237_v49  ;;  %v451_v15 = vadd.f32 %v450_v0, %v403_v57 }
 0x11e   :  { %v273_v19 = vpop.f32.mrf.mxu0  ;;  %v431_v25 = vadd.f32 %v430_v7, %v404_v2  ;;  %v378_v28 = vadd.f32 %v377_v14, %v4237_v49 }
 0x11f   :  { %v274_v54 = vadd.f32 %v273_v19, %v4188_v11  ;;  %v4250_v61 = vmax.f32 %v270_v45, 0.0  ;;  %v406_v17 = vmul.f32 %v4247_v58, %v4247_v58  ;;  %v358_v39 = vadd.f32 %v357_v16, %v4247_v58 }
 0x120   :  { %v275_v23 = vpop.f32.mrf.mxu0 }
 0x121   :  { %v276_v62 = vadd.f32 %v275_v23, %v4191_v13  ;;  %v4259_v8 = vmax.f32 %v274_v54, 0.0  ;;  %v407_v19 = vmul.f32 %v4250_v61, %v4250_v61  ;;  %v432_v41 = vadd.f32 %v431_v25, %v406_v17 }
 0x122   :  { %v277_v29 = vpop.f32.mrf.mxu0 }
 0x123   :  { %v278_v63 = vadd.f32 %v277_v29, %v4188_v11  ;;  %v4269_v20 = vmax.f32 %v276_v62, 0.0  ;;  %v452_v29 = vadd.f32 %v451_v15, %v405_v4  ;;  %v408_v34 = vmul.f32 %v4259_v8, %v4259_v8 }
 0x124   :  { %v279_v35 = vpop.f32.mrf.mxu0  ;;  %v359_v51 = vadd.f32 %v358_v39, %v4259_v8 }
 0x125   :  { %v280_v10 = vadd.f32 %v279_v35, %v4191_v13  ;;  %v4271_v22 = vmax.f32 %v278_v63, 0.0  ;;  %v453_v45 = vadd.f32 %v452_v29, %v407_v19  ;;  %v409_v46 = vmul.f32 %v4269_v20, %v4269_v20 }
 0x126   :  { %v283_v42 = vpop.f32.mrf.mxu0  ;;  %v433_v56 = vadd.f32 %v432_v41, %v408_v34 }
 0x127   :  { %v284_v12 = vadd.f32 %v283_v42, %v4188_v11  ;;  %v4278_v35 = vmax.f32 %v280_v10, 0.0  ;;  %v379_v42 = vadd.f32 %v378_v28, %v4250_v61  ;;  %v410_v47 = vmul.f32 %v4271_v22, %v4271_v22 }
 0x128   :  { %v285_v50 = vpop.f32.mrf.mxu0  ;;  %v360_v63 = vadd.f32 %v359_v51, %v4271_v22  ;;  %v454_v4 = vadd.f32 %v453_v45, %v409_v46 }
 0x129   :  { %v286_v23 = vadd.f32 %v285_v50, %v4191_v13  ;;  %v4280_v36 = vmax.f32 %v284_v12, 0.0  ;;  %v411_v57 = vmul.f32 %v4278_v35, %v4278_v35  ;;  %v380_v62 = vadd.f32 %v379_v42, %v4269_v20 }
 0x12a   :  { %v287_v59 = vpop.f32.mrf.mxu0 }
 0x12b   :  { %v288_v31 = vadd.f32 %v287_v59, %v4188_v11  ;;  %v4290_v50 = vmax.f32 %v286_v23, 0.0  ;;  %v412_v59 = vmul.f32 %v4280_v36, %v4280_v36  ;;  %v381_v12 = vadd.f32 %v380_v62, %v4278_v35 }
 0x12c   :  { %v289_v5 = vpop.f32.mrf.mxu0  ;;  %v361_v19 = vadd.f32 %v360_v63, %v4280_v36 }
 0x12d   :  { %v290_v38 = vadd.f32 %v289_v5, %v4191_v13  ;;  %v4293_v52 = vmax.f32 %v288_v31, 0.0  ;;  %v434_v5 = vadd.f32 %v433_v56, %v410_v47  ;;  %v413_v7 = vmul.f32 %v4290_v50, %v4290_v50 }
 0x12e   :  { %v293_v18 = vpop.f32.mrf.mxu0 }
 0x12f   :  { %v294_v43 = vadd.f32 %v293_v18, %v4188_v11  ;;  %v4301_v60 = vmax.f32 %v290_v38, 0.0  ;;  %v414_v14 = vmul.f32 %v4293_v52, %v4293_v52  ;;  %v455_v18 = vadd.f32 %v454_v4, %v411_v57 }
 0x130   :  { %v295_v33 = vpop.f32.mrf.mxu0  ;;  %v435_v23 = vadd.f32 %v434_v5, %v412_v59  ;;  %v382_v38 = vadd.f32 %v381_v12, %v4290_v50  ;;  %v362_v41 = vadd.f32 %v361_v19, %v4293_v52 }
 0x131   :  { %v296_v53 = vadd.f32 %v295_v33, %v4191_v13  ;;  %v4305_v0 = vmax.f32 %v294_v43, 0.0  ;;  %v415_v25 = vmul.f32 %v4301_v60, %v4301_v60  ;;  %v456_v39 = vadd.f32 %v455_v18, %v413_v7 }
 0x132   :  { %v297_v44 = vpop.f32.mrf.mxu0  ;;  %v436_v43 = vadd.f32 %v435_v23, %v414_v14  ;;  %v383_v51 = vadd.f32 %v382_v38, %v4301_v60 }
 0x133   :  { %v298_v54 = vadd.f32 %v297_v44, %v4188_v11  ;;  %v4314_v15 = vmax.f32 %v296_v53, 0.0  ;;  %v416_v28 = vmul.f32 %v4305_v0, %v4305_v0  ;;  %v363_v53 = vadd.f32 %v362_v41, %v4305_v0 }
 0x134   :  { %v299_v55 = vpop.f32.mrf.mxu0  ;;  %v457_v56 = vadd.f32 %v456_v39, %v415_v25 }
 0x135   :  { %v300_v1 = vadd.f32 %v299_v55, %v4191_v13  ;;  %v4316_v16 = vmax.f32 %v298_v54, 0.0  ;;  %v417_v44 = vmul.f32 %v4314_v15, %v4314_v15  ;;  %v437_v57 = vadd.f32 %v436_v43, %v416_v28 }
 0x136   :  { %v303_v2 = vpop.f32.mrf.mxu0 }
 0x137   :  { %v304_v10 = vadd.f32 %v303_v2, %v4188_v11  ;;  %v4323_v29 = vmax.f32 %v300_v1, 0.0  ;;  %v418_v45 = vmul.f32 %v4316_v16, %v4316_v16  ;;  %v384_v1 = vadd.f32 %v383_v51, %v4314_v15 }
 0x138   :  { %v305_v17 = vpop.f32.mrf.mxu0  ;;  %v364_v2 = vadd.f32 %v363_v53, %v4316_v16  ;;  %v458_v7 = vadd.f32 %v457_v56, %v417_v44 }
 0x139   :  { %v4325_v31 = vmax.f32 %v304_v10, 0.0  ;;  %v306_v33 = vadd.f32 %v305_v17, %v4191_v13  ;;  %v419_v59 = vmul.f32 %v4323_v29, %v4323_v29  ;;  %v438_v10 = vadd.f32 %v437_v57, %v418_v45 }
 0x13a   :  { %v307_v34 = vpop.f32.mrf.mxu0  ;;  %v385_v18 = vadd.f32 %v384_v1, %v4323_v29 }
 0x13b   :  { %v308_v42 = vadd.f32 %v307_v34, %v4188_v11  ;;  %v4335_v46 = vmax.f32 %v306_v33, 0.0  ;;  %v420_v62 = vmul.f32 %v4325_v31, %v4325_v31  ;;  %v365_v19 = vadd.f32 %v364_v2, %v4325_v31 }
 0x13c   :  { %v309_v47 = vpop.f32.mrf.mxu0  ;;  %v459_v25 = vadd.f32 %v458_v7, %v419_v59 }
 0x13d   :  { %v4339_v54 = vmax.f32 %v308_v42, 0.0  ;;  %v310_v55 = vadd.f32 %v309_v47, %v4191_v13  ;;  %v421_v12 = vmul.f32 %v4335_v46, %v4335_v46  ;;  %v439_v28 = vadd.f32 %v438_v10, %v420_v62 }
 0x13e   :  { %v313_v63 = vpop.f32.mrf.mxu0  ;;  %v386_v39 = vadd.f32 %v385_v18, %v4335_v46 }
 0x13f   :  { %v4348_v4 = vmax.f32 %v310_v55, 0.0  ;;  %v314_v5 = vadd.f32 %v313_v63, %v4188_v11  ;;  %v422_v14 = vmul.f32 %v4339_v54, %v4339_v54  ;;  %v366_v41 = vadd.f32 %v365_v19, %v4339_v54 }
 0x140   :  { %v315_v17 = vpop.f32.mrf.mxu0  ;;  %v460_v44 = vadd.f32 %v459_v25, %v421_v12 }
 0x141   :  { %v4357_v23 = vmax.f32 %v314_v5, 0.0  ;;  %v423_v33 = vmul.f32 %v4348_v4, %v4348_v4  ;;  %v316_v34 = vadd.f32 %v315_v17, %v4191_v13  ;;  %v440_v45 = vadd.f32 %v439_v28, %v422_v14 }
 0x142   :  { %v317_v38 = vpop.f32.mrf.mxu0  ;;  %v387_v53 = vadd.f32 %v386_v39, %v4348_v4 }
 0x143   :  { %v424_v42 = vmul.f32 %v4357_v23, %v4357_v23  ;;  %v318_v43 = vadd.f32 %v317_v38, %v4188_v11  ;;  %v4367_v47 = vmax.f32 %v316_v34, 0.0  ;;  %v367_v55 = vadd.f32 %v366_v41, %v4357_v23 }
 0x144   :  { %v319_v51 = vpop.f32.mrf.mxu0  ;;  %v461_v59 = vadd.f32 %v460_v44, %v423_v33 }
 0x145   :  { %v4371_v56 = vmax.f32 %v318_v43, 0.0  ;;  %v320_v57 = vadd.f32 %v319_v51, %v4191_v13  ;;  %v441_v62 = vadd.f32 %v440_v45, %v424_v42  ;;  %v425_v63 = vmul.f32 %v4367_v47, %v4367_v47 }
 0x146   :  { %v388_v11 = vadd.f32 %v387_v53, %v4367_v47 }
 0x147   :  { %v368_v1 = vadd.f32 %v367_v55, %v4371_v56  ;;  %v426_v2 = vmul.f32 %v4371_v56, %v4371_v56  ;;  %v4380_v5 = vmax.f32 %v320_v57, 0.0  ;;  %v462_v7 = vadd.f32 %v461_v59, %v425_v63 }
 0x149   :  { %v369_v10 = vrot.slane %v368_v1, 4  ;;  %v442_v12 = vadd.f32 %v441_v62, %v426_v2  ;;  %v389_v14 = vadd.f32 %v388_v11, %v4380_v5  ;;  %v427_v13 = vmul.f32 %v4380_v5, %v4380_v5 }
 0x14b   :  { %v370_v17 = vadd.f32 %v369_v10, %v368_v1  ;;  %v443_v18 = vrot.slane %v442_v12, 4  ;;  %v390_v19 = vrot.slane %v389_v14, 4  ;;  %v463_v25 = vadd.f32 %v462_v7, %v427_v13 }
 0x14d   :  { %v371_v28 = vrot.slane %v370_v17, 2  ;;  %v444_v33 = vadd.f32 %v443_v18, %v442_v12  ;;  %v391_v34 = vadd.f32 %v390_v19, %v389_v14  ;;  %v464_v38 = vrot.slane %v463_v25, 4 }
 0x14f   :  { %v372_v39 = vadd.f32 %v371_v28, %v370_v17  ;;  %v445_v41 = vrot.slane %v444_v33, 2  ;;  %v392_v42 = vrot.slane %v391_v34, 2  ;;  %v465_v43 = vadd.f32 %v464_v38, %v463_v25 }
 0x151   :  { %v373_v44 = vrot.slane %v372_v39, 1  ;;  %v446_v45 = vadd.f32 %v445_v41, %v444_v33  ;;  %v393_v51 = vadd.f32 %v392_v42, %v391_v34  ;;  %v466_v53 = vrot.slane %v465_v43, 2 }
 0x152   :  { %v3968_v33 = vmov 1966171168  }
 0x153   :  { %v374_v55 = vadd.f32 %v373_v44, %v372_v39  ;;  %v447_v57 = vrot.slane %v446_v45, 1  ;;  %v394_v59 = vrot.slane %v393_v51, 1  ;;  %v467_v62 = vadd.f32 %v466_v53, %v465_v43 }
 0x154   :  { %v487_v34 = vunpack.c.l.s4 %v3968_v33 }
 0x155   :  { %v448_v63 = vadd.f32 %v447_v57, %v446_v45  ;;  %v470_v11 = vmul.f32 0.0078125, %v374_v55  ;;  %v395_v1 = vadd.f32 %v394_v59, %v393_v51  ;;  %v468_v2 = vrot.slane %v467_v62, 1  ;;  %v478_v45 = vld [vmem:[%s5865_s5] sm:$0x3] }
 0x156   :  { %v488_v38 = vunpack.c.0.s8 %v487_v34 }
 0x157   :  { %v472_v7 = vmul.f32 0.0078125, %v448_v63  ;;  %v474_v10 = vmul.f32 %v470_v11, %v470_v11  ;;  %v469_v12 = vadd.f32 %v468_v2, %v467_v62  ;;  %v471_v14 = vmul.f32 0.0078125, %v395_v1  ;;  %v502_v1 = vld [vmem:[%s5866_s6] sm:$0x3] }
 0x158   :  { %v4386_v41 = vsub.s32 %v488_v38, %v4176_v3 }
 0x159   :  { %v476_v13 = vsub.f32 %v472_v7, %v474_v10  ;;  %v473_v17 = vmul.f32 0.0078125, %v469_v12  ;;  %v475_v18 = vmul.f32 %v471_v14, %v471_v14 }
 0x15b   :  { %v479_v19 = vadd.f32 1e-05, %v476_v13  ;;  %v477_v25 = vsub.f32 %v473_v17, %v475_v18 }
 0x15d   :  { %v480_v28 = vadd.f32 1e-05, %v477_v25  ;;  %3833 = vrsqrt.f32 %v479_v19 }
 0x15f   :  { %3835 = vrsqrt.f32 %v480_v28 }
 0x16a   :  { %v3834_v39 = vpop.eup %3833 }
 0x16c   :  { %v3836_v42 = vpop.eup %3835 }
 0x16d   :  { %v485_v43 = vcombine.low %v3834_v39, %v3836_v42 }
 0x16f   :  { %v492_v44 = vrot.slane %v485_v43, %v4386_v41 }
 0x171   :  { %v499_v51 = vrot.slane %v492_v44, %v4386_v41 }
 0x173   :  { %v501_v53 = vmul.f32 %v499_v51, %v478_v45 }
 0x175   :  { %v4394_v55 = vrot.slane %v501_v53, %v4179_v6  ;;  %v4397_v57 = vrot.slane %v501_v53, %v4185_v9 }
 0x177   :  { %v514_v3 = vmul.f32 %v4394_v55, %v470_v11  ;;  %v515_v59 = vmul.f32 %v4397_v57, %v471_v14  ;;  %v536_v10 = vmul.f32 %v4397_v57, %v4209_v30  ;;  %v538_v12 = vmul.f32 %v4397_v57, %v4201_v24 }
 0x178   :  { %v563_v11 = vmul.f32 %v4394_v55, %v4357_v23  ;;  %v565_v14 = vmul.f32 %v4394_v55, %v4371_v56  ;;  %v535_v18 = vmul.f32 %v4394_v55, %v4204_v26  ;;  %v537_v30 = vmul.f32 %v4394_v55, %v4198_v21 }
 0x179   :  { %v518_v62 = vcombine.low %v514_v3, %v515_v59  ;;  %v540_v24 = vmul.f32 %v4397_v57, %v4213_v32  ;;  %v542_v23 = vmul.f32 %v4397_v57, %v4225_v40  ;;  %v539_v32 = vmul.f32 %v4394_v55, %v4206_v27 }
 0x17a   :  { %v541_v40 = vmul.f32 %v4394_v55, %v4219_v37  ;;  %v544_v39 = vmul.f32 %v4397_v57, %v4237_v49  ;;  %v546_v42 = vmul.f32 %v4397_v57, %v4250_v61  ;;  %v560_v43 = vmul.f32 %v4397_v57, %v4335_v46 }
 0x17b   :  { %v525_v63 = vrot.slane %v518_v62, %v4386_v41  ;;  %v562_v44 = vmul.f32 %v4397_v57, %v4348_v4  ;;  %v566_v45 = vmul.f32 %v4397_v57, %v4380_v5  ;;  %v564_v51 = vmul.f32 %v4397_v57, %v4367_v47 }
 0x17d   :  { %v532_v2 = vrot.slane %v525_v63, %v4386_v41 }
 0x17f   :  { %v534_v7 = vsub.f32 %v502_v1, %v532_v2  ;;  %v543_v2 = vmul.f32 %v4394_v55, %v4235_v48 }
 0x181   :  { %v4415_v13 = vrot.slane %v534_v7, %v4179_v6  ;;  %v4418_v17 = vrot.slane %v534_v7, %v4185_v9  ;;  %v545_v7 = vmul.f32 %v4394_v55, %v4247_v58  ;;  %v547_v58 = vmul.f32 %v4394_v55, %v4259_v8 }
 0x183   :  { %v579_v56 = vadd.f32 %v4418_v17, %v536_v10  ;;  %v581_v19 = vadd.f32 %v4418_v17, %v538_v12  ;;  %v578_v25 = vadd.f32 %v4415_v13, %v535_v18  ;;  %v580_v28 = vadd.f32 %v4415_v13, %v537_v30 }
 0x184   :  { %v583_v33 = vadd.f32 %v4418_v17, %v540_v24  ;;  %v585_v26 = vadd.f32 %v4418_v17, %v542_v23  ;;  %v582_v27 = vadd.f32 %v4415_v13, %v539_v32  ;;  %v584_v37 = vadd.f32 %v4415_v13, %v541_v40 }
 0x185   :  { %v611_v34 = vpack.c.bf16 %v581_v19, %v579_v56  ;;  %v610_v21 = vpack.c.bf16 %v580_v28, %v578_v25  ;;  %v587_v49 = vadd.f32 %v4418_v17, %v544_v39  ;;  %v589_v61 = vadd.f32 %v4418_v17, %v546_v42 }
 0x186   :  { %v613_v38 = vpack.c.bf16 %v585_v26, %v583_v33  ;;  %v603_v53 = vadd.f32 %v4418_v17, %v560_v43  ;;  %v605_v46 = vadd.f32 %v4418_v17, %v562_v44  ;;  %v607_v4 = vadd.f32 %v4418_v17, %v564_v51  ;;  %v3676_v51 = vld [vmem:[#allocation5 + $0x60] ss:$8 sps:$4 sm:$0xff]  }
 0x187   :  { %862 = vmatprep.mubr.bf16.mxu1 %v611_v34  ;;  %v609_v5 = vadd.f32 %v4418_v17, %v566_v45  ;;  %v606_v59 = vadd.f32 %v4415_v13, %v563_v11  ;;  %v612_v62 = vpack.c.bf16 %v584_v37, %v582_v27  ;;  %v608_v63 = vadd.f32 %v4415_v13, %v565_v14  ;;  %v3673_v27 = vld [vmem:[#allocation5 + $0x70] ss:$8 sps:$4 sm:$0xff]   ;;  %v3678_v37 = vld [vmem:[#allocation5 + $0x64] ss:$8 sps:$4 sm:$0xff]  }
 0x188   :  { %863 = vmatmul.mubr.bf16.vlgmr.msra.gmra.mxu1 %v610_v21  ;;  %v623_v3 = vpack.c.bf16 %v605_v46, %v603_v53  ;;  %v615_v1 = vpack.c.bf16 %v589_v61, %v587_v49  ;;  %v548_v12 = vmul.f32 %v4397_v57, %v4269_v20  ;;  %v550_v11 = vmul.f32 %v4397_v57, %v4278_v35  ;;  %v3679_v49 = vld [vmem:[#allocation5 + $0x50] ss:$8 sps:$4 sm:$0xff]   ;;  %v3690_v53 = vld [vmem:[#allocation5 + $0x24] ss:$8 sps:$4 sm:$0xff]   ;;  %v3688_v46 = vld [vmem:[#allocation5 + $0x20] ss:$8 sps:$4 sm:$0xff]  }
 0x189   :  { %872 = vmatprep.mubr.bf16.mxu1 %v613_v38  ;;  %v625_v47 = vpack.c.bf16 %v609_v5, %v607_v4  ;;  %v624_v10 = vpack.c.bf16 %v608_v63, %v606_v59  ;;  %v586_v18 = vadd.f32 %v4415_v13, %v543_v2  ;;  %v588_v14 = vadd.f32 %v4415_v13, %v545_v7  ;;  %v3685_v61 = vld [vmem:[#allocation5 + $0x30] ss:$8 sps:$4 sm:$0xff]   ;;  %v3693_v4 = vld [vmem:[#allocation5 + $0x14] ss:$8 sps:$4 sm:$0xff]   ;;  %v3696_v5 = vld [vmem:[#allocation5 + $0x4] ss:$8 sps:$4 sm:$0xff]  }
 0x18a   :  { %v591_v30 = vadd.f32 %v4418_v17, %v548_v12  ;;  %v593_v24 = vadd.f32 %v4418_v17, %v550_v11  ;;  %v549_v20 = vmul.f32 %v4394_v55, %v4271_v22  ;;  %v552_v35 = vmul.f32 %v4397_v57, %v4290_v50  ;;  %v3694_v59 = vld [vmem:[#allocation5] ss:$8 sps:$4 sm:$0xff]   ;;  %v3697_v63 = vld [vmem:[#allocation5 + $0xf0] ss:$8 sps:$4 sm:$0xff]   ;;  %v3705_v2 = vld [vmem:[#allocation5 + $0xd4] ss:$8 sps:$4 sm:$0xff]  }
 0x18b   :  { %v614_v48 = vpack.c.bf16 %v588_v14, %v586_v18  ;;  %v554_v56 = vmul.f32 %v4397_v57, %v4301_v60  ;;  %v590_v19 = vadd.f32 %v4415_v13, %v547_v58  ;;  %v551_v22 = vmul.f32 %v4394_v55, %v4280_v36  ;;  %v3703_v7 = vld [vmem:[#allocation5 + $0xd0] ss:$8 sps:$4 sm:$0xff]   ;;  %v3706_v12 = vld [vmem:[#allocation5 + $0xc0] ss:$8 sps:$4 sm:$0xff]   ;;  %v3711_v18 = vld [vmem:[#allocation5 + $0xb4] ss:$8 sps:$4 sm:$0xff]  }
 0x18c   :  { %v617_v23 = vpack.c.bf16 %v593_v24, %v591_v30  ;;  %v592_v25 = vadd.f32 %v4415_v13, %v549_v20  ;;  %v595_v28 = vadd.f32 %v4418_v17, %v552_v35  ;;  %v553_v50 = vmul.f32 %v4394_v55, %v4293_v52  ;;  %v3709_v11 = vld [vmem:[#allocation5 + $0xb0] ss:$8 sps:$4 sm:$0xff]   ;;  %v3714_v14 = vld [vmem:[#allocation5 + $0xa4] ss:$8 sps:$4 sm:$0xff]   ;;  %v3712_v30 = vld [vmem:[#allocation5 + $0xa0] ss:$8 sps:$4 sm:$0xff]  }
 0x18d   :  { %v597_v33 = vadd.f32 %v4418_v17, %v554_v56  ;;  %v556_v60 = vmul.f32 %v4397_v57, %v4314_v15  ;;  %v558_v34 = vmul.f32 %v4397_v57, %v4323_v29  ;;  %v594_v21 = vadd.f32 %v4415_v13, %v551_v22  ;;  %v3717_v24 = vld [vmem:[#allocation5 + $0x94] ss:$8 sps:$4 sm:$0xff]   ;;  %v3715_v58 = vld [vmem:[#allocation5 + $0x90] ss:$8 sps:$4 sm:$0xff]   ;;  %v3720_v20 = vld [vmem:[#allocation5 + $0x84] ss:$8 sps:$4 sm:$0xff]  }
 0x18e   :  { %v616_v26 = vpack.c.bf16 %v592_v25, %v590_v19  ;;  %v596_v38 = vadd.f32 %v4415_v13, %v553_v50  ;;  %v555_v52 = vmul.f32 %v4394_v55, %v4305_v0  ;;  %v557_v15 = vmul.f32 %v4394_v55, %v4316_v16  ;;  %v3675_v16 = vld [vmem:[#allocation5 + $0x74] ss:$8 sps:$4 sm:$0xff]   ;;  %v3718_v19 = vld [vmem:[#allocation5 + $0x80] ss:$8 sps:$4 sm:$0xff]  }
 0x18f   :  { %v619_v8 = vpack.c.bf16 %v597_v33, %v595_v28  ;;  %v599_v32 = vadd.f32 %v4418_v17, %v556_v60  ;;  %v601_v40 = vadd.f32 %v4418_v17, %v558_v34  ;;  %v559_v43 = vmul.f32 %v4394_v55, %v4325_v31  ;;  %1451 = vmatprep.subr.bf16.mxu0 %v3675_v16  ;;  %v3681_v31 = vld [vmem:[#allocation5 + $0x54] ss:$8 sps:$4 sm:$0xff]   ;;  %v658_v22 = vld [vmem:[%s5867_s7] sm:$0x3] }
 0x190   :  { %873 = vmatmul.mubr.bf16.gmra.mxu1 %v612_v62  ;;  %v618_v39 = vpack.c.bf16 %v596_v38, %v594_v21  ;;  %v598_v29 = vadd.f32 %v4415_v13, %v555_v52  ;;  %v600_v57 = vadd.f32 %v4415_v13, %v557_v15  ;;  %v561_v17 = vmul.f32 %v4394_v55, %v4339_v54  ;;  %v3684_v54 = vld [vmem:[#allocation5 + $0x44] ss:$8 sps:$4 sm:$0xff]   ;;  %v3682_v55 = vld [vmem:[#allocation5 + $0x40] ss:$8 sps:$4 sm:$0xff]   ;;  %v3699_v62 = vld [vmem:[#allocation5 + $0xf4] ss:$8 sps:$4 sm:$0xff]  }
 0x191   :  { %882 = vmatprep.mubr.bf16.mxu1 %v615_v1  ;;  %v621_v36 = vpack.c.bf16 %v601_v40, %v599_v32  ;;  %v602_v44 = vadd.f32 %v4415_v13, %v559_v43  ;;  %1452 = vmatpush1.bf16.msra.mxu0 %v3673_v27  ;;  %v3702_v1 = vld [vmem:[#allocation5 + $0xe4] ss:$8 sps:$4 sm:$0xff]   ;;  %v4512_v60 = vrot.slane %v658_v22, %v4179_v6 }
 0x192   :  { %v620_v42 = vpack.c.bf16 %v600_v57, %v598_v29  ;;  %v604_v0 = vadd.f32 %v4415_v13, %v561_v17  ;;  %1453 = vmatprep.subr.bf16.mxu0 %v3678_v37  ;;  %v3687_v13 = vld [vmem:[#allocation5 + $0x34] ss:$8 sps:$4 sm:$0xff]   ;;  %v4515_v21 = vrot.slane %v658_v22, %v4185_v9 }
 0x194   :  { %v622_v45 = vpack.c.bf16 %v604_v0, %v602_v44 }
 0x195   :  { %1454 = vmatpush1.bf16.msra.mxu0 %v3676_v51 }
 0x196   :  { %1455 = vmatprep.subr.bf16.mxu0 %v3681_v31 }
 0x198   :  { %883 = vmatmul.mubr.bf16.gmra.mxu1 %v614_v48 }
 0x199   :  { %892 = vmatprep.mubr.bf16.mxu1 %v617_v23  ;;  %1456 = vmatpush1.bf16.msra.mxu0 %v3679_v49 }
 0x19a   :  { %1457 = vmatprep.subr.bf16.mxu0 %v3684_v54 }
 0x19d   :  { %1458 = vmatpush1.bf16.msra.mxu0 %v3682_v55 }
 0x19e   :  { %1459 = vmatprep.subr.bf16.mxu0 %v3687_v13 }
 0x1a0   :  { %893 = vmatmul.mubr.bf16.gmra.mxu1 %v616_v26 }
 0x1a1   :  { %902 = vmatprep.mubr.bf16.mxu1 %v619_v8  ;;  %1460 = vmatpush1.bf16.msra.mxu0 %v3685_v61 }
 0x1a2   :  { %1461 = vmatprep.subr.bf16.mxu0 %v3690_v53 }
 0x1a5   :  { %1462 = vmatpush1.bf16.msra.mxu0 %v3688_v46 }
 0x1a6   :  { %1463 = vmatprep.subr.bf16.mxu0 %v3693_v4 }
 0x1a8   :  { %903 = vmatmul.mubr.bf16.gmra.mxu1 %v618_v39 }
 0x1a9   :  { %912 = vmatprep.mubr.bf16.mxu1 %v621_v36 }
 0x1b0   :  { %913 = vmatmul.mubr.bf16.gmra.mxu1 %v620_v42 }
 0x1b1   :  { %922 = vmatprep.mubr.bf16.mxu1 %v623_v3  ;;  %v3691_v3 = vld [vmem:[#allocation5 + $0x10] ss:$8 sps:$4 sm:$0xff]  }
 0x1b2   :  { %1464 = vmatpush1.bf16.msra.mxu0 %v3691_v3 }
 0x1b3   :  { %1465 = vmatprep.subr.bf16.mxu0 %v3696_v5 }
 0x1b6   :  { %1466 = vmatpush1.bf16.msra.mxu0 %v3694_v59 }
 0x1b7   :  { %1467 = vmatprep.subr.bf16.mxu0 %v3699_v62 }
 0x1b8   :  { %923 = vmatmul.mubr.bf16.gmra.mxu1 %v622_v45 }
 0x1b9   :  { %932 = vmatprep.mubr.bf16.mxu1 %v625_v47  ;;  %v3700_v47 = vld [vmem:[#allocation5 + $0xe0] ss:$8 sps:$4 sm:$0xff]  }
 0x1ba   :  { %1468 = vmatpush2.bf16.msra.mxu0 %v3697_v63 }
 0x1bb   :  { %1469 = vmatprep.subr.bf16.mxu0 %v3702_v1 }
 0x1be   :  { %1470 = vmatpush2.bf16.msra.mxu0 %v3700_v47 }
 0x1bf   :  { %1471 = vmatprep.subr.bf16.mxu0 %v3705_v2 }
 0x1c0   :  { %933 = vmatmul.mubr.bf16.gmra.mxu1 %v624_v10  ;;  %v3708_v10 = vld [vmem:[#allocation5 + $0xc4] ss:$8 sps:$4 sm:$0xff]  }
 0x1c2   :  { %1472 = vmatpush2.bf16.msra.mxu0 %v3703_v7 }
 0x1c3   :  { %1473 = vmatprep.subr.bf16.mxu0 %v3708_v10 }
 0x1c6   :  { %1474 = vmatpush2.bf16.msra.mxu0 %v3706_v12 }
 0x1c7   :  { %1475 = vmatprep.subr.bf16.mxu0 %v3711_v18 }
 0x1ca   :  { %1476 = vmatpush2.bf16.msra.mxu0 %v3709_v11 }
 0x1cb   :  { %1477 = vmatprep.subr.bf16.mxu0 %v3714_v14 }
 0x1ce   :  { %1478 = vmatpush2.bf16.msra.mxu0 %v3712_v30 }
 0x1cf   :  { %1479 = vmatprep.subr.bf16.mxu0 %v3717_v24 }
 0x1d2   :  { %1480 = vmatpush2.bf16.msra.mxu0 %v3715_v58 }
 0x1d3   :  { %1481 = vmatprep.subr.bf16.mxu0 %v3720_v20 }
 0x1d6   :  { %1482 = vmatpush2.bf16.msra.mxu0 %v3718_v19 }
 0x248   :  { %v864_v48 = vpop.f32.mrf.mxu1 }
 0x249   :  { %v865_v39 = vadd.f32 %v864_v48, %v4512_v60 }
 0x24a   :  { %v866_v23 = vpop.f32.mrf.mxu1 }
 0x24b   :  { %v867_v15 = vadd.f32 %v866_v23, %v4515_v21  ;;  %v4528_v44 = vmax.f32 %v865_v39, 0.0 }
 0x24c   :  { %v868_v35 = vpop.f32.mrf.mxu1 }
 0x24d   :  { %v869_v38 = vadd.f32 %v868_v35, %v4512_v60  ;;  %v4533_v27 = vmax.f32 %v867_v15, 0.0  ;;  %v1017_v61 = vmul.f32 %v4528_v44, %v4528_v44 }
 0x24e   :  { %v870_v56 = vpop.f32.mrf.mxu1 }
 0x24f   :  { %v871_v40 = vadd.f32 %v870_v56, %v4515_v21  ;;  %v4522_v29 = vmax.f32 %v869_v38, 0.0  ;;  %v1018_v5 = vmul.f32 %v4533_v27, %v4533_v27 }
 0x250   :  { %v874_v25 = vpop.f32.mrf.mxu1 }
 0x251   :  { %v875_v36 = vadd.f32 %v874_v25, %v4512_v60  ;;  %v4525_v43 = vmax.f32 %v871_v40, 0.0  ;;  %v1019_v37 = vmul.f32 %v4522_v29, %v4522_v29  ;;  %v975_v59 = vadd.f32 %v4522_v29, %v4528_v44 }
 0x252   :  { %v876_v28 = vpop.f32.mrf.mxu1 }
 0x253   :  { %v877_v57 = vadd.f32 %v876_v28, %v4515_v21  ;;  %v4530_v0 = vmax.f32 %v875_v36, 0.0  ;;  %v1020_v55 = vmul.f32 %v4525_v43, %v4525_v43  ;;  %v1049_v63 = vadd.f32 %v1019_v37, %v1017_v61 }
 0x254   :  { %v878_v33 = vpop.f32.mrf.mxu1  ;;  %v996_v10 = vadd.f32 %v4525_v43, %v4533_v27 }
 0x255   :  { %v879_v17 = vadd.f32 %v878_v33, %v4512_v60  ;;  %v4537_v51 = vmax.f32 %v877_v57, 0.0  ;;  %v1021_v53 = vmul.f32 %v4530_v0, %v4530_v0  ;;  %v1070_v12 = vadd.f32 %v1020_v55, %v1018_v5 }
 0x256   :  { %v880_v26 = vpop.f32.mrf.mxu1  ;;  %v976_v14 = vadd.f32 %v975_v59, %v4530_v0 }
 0x257   :  { %v881_v45 = vadd.f32 %v880_v26, %v4515_v21  ;;  %v4543_v13 = vmax.f32 %v879_v17, 0.0  ;;  %v1022_v1 = vmul.f32 %v4537_v51, %v4537_v51  ;;  %v1050_v30 = vadd.f32 %v1049_v63, %v1021_v53 }
 0x258   :  { %v884_v8 = vpop.f32.mrf.mxu1  ;;  %v997_v58 = vadd.f32 %v996_v10, %v4537_v51 }
 0x259   :  { %v885_v31 = vadd.f32 %v884_v8, %v4512_v60  ;;  %v4549_v46 = vmax.f32 %v881_v45, 0.0  ;;  %v1023_v11 = vmul.f32 %v4543_v13, %v4543_v13  ;;  %v1071_v19 = vadd.f32 %v1070_v12, %v1022_v1 }
 0x25a   :  { %v886_v50 = vpop.f32.mrf.mxu1  ;;  %v977_v25 = vadd.f32 %v976_v14, %v4543_v13 }
 0x25b   :  { %v887_v49 = vadd.f32 %v886_v50, %v4515_v21  ;;  %v4559_v47 = vmax.f32 %v885_v31, 0.0  ;;  %v1024_v24 = vmul.f32 %v4549_v46, %v4549_v46  ;;  %v1051_v8 = vadd.f32 %v1050_v30, %v1023_v11 }
 0x25c   :  { %v888_v34 = vpop.f32.mrf.mxu1  ;;  %v998_v38 = vadd.f32 %v997_v58, %v4549_v46 }
 0x25d   :  { %v889_v4 = vadd.f32 %v888_v34, %v4512_v60  ;;  %v4561_v2 = vmax.f32 %v887_v49, 0.0  ;;  %v1025_v28 = vmul.f32 %v4559_v47, %v4559_v47  ;;  %v978_v40 = vadd.f32 %v977_v25, %v4559_v47 }
 0x25e   :  { %v890_v32 = vpop.f32.mrf.mxu1 }
 0x25f   :  { %v891_v62 = vadd.f32 %v890_v32, %v4515_v21  ;;  %v4571_v48 = vmax.f32 %v889_v4, 0.0  ;;  %v1026_v33 = vmul.f32 %v4561_v2, %v4561_v2  ;;  %v1072_v32 = vadd.f32 %v1071_v19, %v1024_v24 }
 0x260   :  { %v894_v52 = vpop.f32.mrf.mxu1  ;;  %v1052_v17 = vadd.f32 %v1051_v8, %v1025_v28  ;;  %v999_v45 = vadd.f32 %v998_v38, %v4561_v2 }
 0x261   :  { %v895_v18 = vadd.f32 %v894_v52, %v4512_v60  ;;  %v4574_v20 = vmax.f32 %v891_v62, 0.0  ;;  %v1027_v39 = vmul.f32 %v4571_v48, %v4571_v48  ;;  %v979_v53 = vadd.f32 %v978_v40, %v4571_v48 }
 0x262   :  { %v896_v42 = vpop.f32.mrf.mxu1 }
 0x263   :  { %v897_v35 = vadd.f32 %v896_v42, %v4515_v21  ;;  %v4583_v22 = vmax.f32 %v895_v18, 0.0  ;;  %v1028_v52 = vmul.f32 %v4574_v20, %v4574_v20  ;;  %v1053_v4 = vadd.f32 %v1052_v17, %v1027_v39 }
 0x264   :  { %v898_v16 = vpop.f32.mrf.mxu1 }
 0x265   :  { %v899_v56 = vadd.f32 %v898_v16, %v4512_v60  ;;  %v4593_v15 = vmax.f32 %v897_v35, 0.0  ;;  %v1073_v16 = vadd.f32 %v1072_v32, %v1026_v33  ;;  %v1029_v49 = vmul.f32 %v4583_v22, %v4583_v22 }
 0x266   :  { %v900_v54 = vpop.f32.mrf.mxu1  ;;  %v980_v10 = vadd.f32 %v979_v53, %v4583_v22 }
 0x267   :  { %v901_v50 = vadd.f32 %v900_v54, %v4515_v21  ;;  %v4595_v57 = vmax.f32 %v899_v56, 0.0  ;;  %v1074_v62 = vadd.f32 %v1073_v16, %v1028_v52  ;;  %v1030_v63 = vmul.f32 %v4593_v15, %v4593_v15 }
 0x268   :  { %v904_v3 = vpop.f32.mrf.mxu1  ;;  %v1054_v30 = vadd.f32 %v1053_v4, %v1029_v49 }
 0x269   :  { %v905_v34 = vadd.f32 %v904_v3, %v4512_v60  ;;  %v4602_v54 = vmax.f32 %v901_v50, 0.0  ;;  %v1000_v3 = vadd.f32 %v999_v45, %v4574_v20  ;;  %v1031_v1 = vmul.f32 %v4595_v57, %v4595_v57 }
 0x26a   :  { %v906_v7 = vpop.f32.mrf.mxu1  ;;  %v981_v56 = vadd.f32 %v980_v10, %v4595_v57  ;;  %v1075_v33 = vadd.f32 %v1074_v62, %v1030_v63 }
 0x26b   :  { %v907_v42 = vadd.f32 %v906_v7, %v4515_v21  ;;  %v4604_v55 = vmax.f32 %v905_v34, 0.0  ;;  %v1032_v24 = vmul.f32 %v4602_v54, %v4602_v54  ;;  %v1001_v35 = vadd.f32 %v1000_v3, %v4593_v15 }
 0x26c   :  { %v908_v23 = vpop.f32.mrf.mxu1 }
 0x26d   :  { %v909_v37 = vadd.f32 %v908_v23, %v4512_v60  ;;  %v4614_v7 = vmax.f32 %v907_v42, 0.0  ;;  %v1033_v23 = vmul.f32 %v4604_v55, %v4604_v55  ;;  %v1002_v34 = vadd.f32 %v1001_v35, %v4602_v54 }
 0x26e   :  { %v910_v26 = vpop.f32.mrf.mxu1  ;;  %v982_v52 = vadd.f32 %v981_v56, %v4604_v55 }
 0x26f   :  { %v911_v61 = vadd.f32 %v910_v26, %v4515_v21  ;;  %v4617_v12 = vmax.f32 %v909_v37, 0.0  ;;  %v1055_v26 = vadd.f32 %v1054_v30, %v1031_v1  ;;  %v1034_v8 = vmul.f32 %v4614_v7, %v4614_v7 }
 0x270   :  { %v914_v36 = vpop.f32.mrf.mxu1 }
 0x271   :  { %v915_v5 = vadd.f32 %v914_v36, %v4512_v60  ;;  %v4625_v58 = vmax.f32 %v911_v61, 0.0  ;;  %v1035_v38 = vmul.f32 %v4617_v12, %v4617_v12  ;;  %v1076_v36 = vadd.f32 %v1075_v33, %v1032_v24 }
 0x272   :  { %v916_v31 = vpop.f32.mrf.mxu1  ;;  %v1056_v42 = vadd.f32 %v1055_v26, %v1033_v23  ;;  %v1003_v61 = vadd.f32 %v1002_v34, %v4614_v7  ;;  %v983_v4 = vadd.f32 %v982_v52, %v4617_v12 }
 0x273   :  { %v917_v11 = vadd.f32 %v916_v31, %v4515_v21  ;;  %v4629_v19 = vmax.f32 %v915_v5, 0.0  ;;  %v1036_v17 = vmul.f32 %v4625_v58, %v4625_v58  ;;  %v1077_v53 = vadd.f32 %v1076_v36, %v1034_v8 }
 0x274   :  { %v918_v59 = vpop.f32.mrf.mxu1  ;;  %v1057_v5 = vadd.f32 %v1056_v42, %v1035_v38  ;;  %v1004_v10 = vadd.f32 %v1003_v61, %v4625_v58 }
 0x275   :  { %v919_v18 = vadd.f32 %v918_v59, %v4512_v60  ;;  %v4638_v32 = vmax.f32 %v917_v11, 0.0  ;;  %v1037_v45 = vmul.f32 %v4629_v19, %v4629_v19  ;;  %v984_v11 = vadd.f32 %v983_v4, %v4629_v19 }
 0x276   :  { %v920_v14 = vpop.f32.mrf.mxu1  ;;  %v1078_v30 = vadd.f32 %v1077_v53, %v1036_v17 }
 0x277   :  { %v921_v25 = vadd.f32 %v920_v14, %v4515_v21  ;;  %v4640_v40 = vmax.f32 %v919_v18, 0.0  ;;  %v1038_v59 = vmul.f32 %v4638_v32, %v4638_v32  ;;  %v1058_v24 = vadd.f32 %v1057_v5, %v1037_v45 }
 0x278   :  { %v924_v28 = vpop.f32.mrf.mxu1 }
 0x279   :  { %v925_v50 = vadd.f32 %v924_v28, %v4512_v60  ;;  %v4647_v16 = vmax.f32 %v921_v25, 0.0  ;;  %v1039_v62 = vmul.f32 %v4640_v40, %v4640_v40  ;;  %v1005_v25 = vadd.f32 %v1004_v10, %v4638_v32 }
 0x27a   :  { %v926_v39 = vpop.f32.mrf.mxu1  ;;  %v985_v28 = vadd.f32 %v984_v11, %v4640_v40  ;;  %v1079_v8 = vadd.f32 %v1078_v30, %v1038_v59 }
 0x27b   :  { %v4649_v37 = vmax.f32 %v925_v50, 0.0  ;;  %v927_v31 = vadd.f32 %v926_v39, %v4515_v21  ;;  %v1040_v23 = vmul.f32 %v4647_v16, %v4647_v16  ;;  %v1059_v50 = vadd.f32 %v1058_v24, %v1039_v62 }
 0x27c   :  { %v928_v49 = vpop.f32.mrf.mxu1  ;;  %v1006_v36 = vadd.f32 %v1005_v25, %v4647_v16 }
 0x27d   :  { %v929_v3 = vadd.f32 %v928_v49, %v4512_v60  ;;  %v4659_v63 = vmax.f32 %v927_v31, 0.0  ;;  %v1041_v35 = vmul.f32 %v4649_v37, %v4649_v37  ;;  %v986_v52 = vadd.f32 %v985_v28, %v4649_v37 }
 0x27e   :  { %v930_v1 = vpop.f32.mrf.mxu1  ;;  %v1080_v17 = vadd.f32 %v1079_v8, %v1040_v23 }
 0x27f   :  { %v4663_v18 = vmax.f32 %v929_v3, 0.0  ;;  %v931_v14 = vadd.f32 %v930_v1, %v4515_v21  ;;  %v1042_v34 = vmul.f32 %v4659_v63, %v4659_v63  ;;  %v1060_v45 = vadd.f32 %v1059_v50, %v1041_v35 }
 0x280   :  { %v934_v56 = vpop.f32.mrf.mxu1  ;;  %v1007_v53 = vadd.f32 %v1006_v36, %v4659_v63 }
 0x281   :  { %v4672_v33 = vmax.f32 %v931_v14, 0.0  ;;  %v935_v26 = vadd.f32 %v934_v56, %v4512_v60  ;;  %v1043_v38 = vmul.f32 %v4663_v18, %v4663_v18  ;;  %v987_v4 = vadd.f32 %v986_v52, %v4663_v18 }
 0x282   :  { %v936_v39 = vpop.f32.mrf.mxu1  ;;  %v1081_v59 = vadd.f32 %v1080_v17, %v1042_v34 }
 0x283   :  { %v4681_v42 = vmax.f32 %v935_v26, 0.0  ;;  %v1044_v31 = vmul.f32 %v4672_v33, %v4672_v33  ;;  %v937_v49 = vadd.f32 %v936_v39, %v4515_v21  ;;  %v1061_v62 = vadd.f32 %v1060_v45, %v1043_v38 }
 0x284   :  { %v938_v61 = vpop.f32.mrf.mxu1  ;;  %v1008_v11 = vadd.f32 %v1007_v53, %v4672_v33 }
 0x285   :  { %v1045_v3 = vmul.f32 %v4681_v42, %v4681_v42  ;;  %v939_v5 = vadd.f32 %v938_v61, %v4512_v60  ;;  %v4691_v1 = vmax.f32 %v937_v49, 0.0  ;;  %v988_v14 = vadd.f32 %v987_v4, %v4681_v42 }
 0x286   :  { %v940_v10 = vpop.f32.mrf.mxu1  ;;  %v1082_v23 = vadd.f32 %v1081_v59, %v1044_v31 }
 0x287   :  { %v4695_v30 = vmax.f32 %v939_v5, 0.0  ;;  %v941_v24 = vadd.f32 %v940_v10, %v4515_v21  ;;  %v1062_v35 = vadd.f32 %v1061_v62, %v1045_v3  ;;  %v1046_v56 = vmul.f32 %v4691_v1, %v4691_v1 }
 0x288   :  { %v1009_v60 = vadd.f32 %v1008_v11, %v4691_v1 }
 0x289   :  { %v989_v25 = vadd.f32 %v988_v14, %v4695_v30  ;;  %v1047_v28 = vmul.f32 %v4695_v30, %v4695_v30  ;;  %v4704_v26 = vmax.f32 %v941_v24, 0.0  ;;  %v1083_v8 = vadd.f32 %v1082_v23, %v1046_v56 }
 0x28b   :  { %v990_v50 = vrot.slane %v989_v25, 4  ;;  %v1063_v34 = vadd.f32 %v1062_v35, %v1047_v28  ;;  %v1010_v38 = vadd.f32 %v1009_v60, %v4704_v26  ;;  %v1048_v21 = vmul.f32 %v4704_v26, %v4704_v26 }
 0x28d   :  { %v991_v39 = vadd.f32 %v990_v50, %v989_v25  ;;  %v1064_v36 = vrot.slane %v1063_v34, 4  ;;  %v1011_v52 = vrot.slane %v1010_v38, 4  ;;  %v1084_v17 = vadd.f32 %v1083_v8, %v1048_v21 }
 0x28f   :  { %v992_v45 = vrot.slane %v991_v39, 2  ;;  %v1065_v31 = vadd.f32 %v1064_v36, %v1063_v34  ;;  %v1012_v49 = vadd.f32 %v1011_v52, %v1010_v38  ;;  %v1085_v61 = vrot.slane %v1084_v17, 4 }
 0x291   :  { %v993_v53 = vadd.f32 %v992_v45, %v991_v39  ;;  %v1066_v4 = vrot.slane %v1065_v31, 2  ;;  %v1013_v3 = vrot.slane %v1012_v49, 2  ;;  %v1086_v5 = vadd.f32 %v1085_v61, %v1084_v17 }
 0x293   :  { %v994_v59 = vrot.slane %v993_v53, 1  ;;  %v1067_v62 = vadd.f32 %v1066_v4, %v1065_v31  ;;  %v1014_v10 = vadd.f32 %v1013_v3, %v1012_v49  ;;  %v1087_v11 = vrot.slane %v1086_v5, 2  ;;  %v1099_v4 = vld [vmem:[%s5868_s3] sm:$0x3] }
 0x295   :  { %v995_v14 = vadd.f32 %v994_v59, %v993_v53  ;;  %v1068_v24 = vrot.slane %v1067_v62, 1  ;;  %v1015_v23 = vrot.slane %v1014_v10, 1  ;;  %v1088_v35 = vadd.f32 %v1087_v11, %v1086_v5 }
 0x297   :  { %v1069_v56 = vadd.f32 %v1068_v24, %v1067_v62  ;;  %v1091_v60 = vmul.f32 0.0078125, %v995_v14  ;;  %v1016_v25 = vadd.f32 %v1015_v23, %v1014_v10  ;;  %v1089_v28 = vrot.slane %v1088_v35, 1  ;;  %v1123_v23 = vld [vmem:[%s5835_s8] sm:$0x3] }
 0x299   :  { %v1093_v8 = vmul.f32 0.0078125, %v1069_v56  ;;  %v1095_v50 = vmul.f32 %v1091_v60, %v1091_v60  ;;  %v1090_v34 = vadd.f32 %v1089_v28, %v1088_v35  ;;  %v1092_v38 = vmul.f32 0.0078125, %v1016_v25 }
 0x29b   :  { %v1097_v21 = vsub.f32 %v1093_v8, %v1095_v50  ;;  %v1094_v39 = vmul.f32 0.0078125, %v1090_v34  ;;  %v1096_v36 = vmul.f32 %v1092_v38, %v1092_v38 }
 0x29d   :  { %v1100_v52 = vadd.f32 1e-05, %v1097_v21  ;;  %v1098_v17 = vsub.f32 %v1094_v39, %v1096_v36 }
 0x29f   :  { %v1101_v45 = vadd.f32 1e-05, %v1098_v17  ;;  %3837 = vrsqrt.f32 %v1100_v52 }
 0x2a1   :  { %3839 = vrsqrt.f32 %v1101_v45 }
 0x2ac   :  { %v3838_v31 = vpop.eup %3837 }
 0x2ae   :  { %v3840_v49 = vpop.eup %3839 }
 0x2af   :  { %v1106_v61 = vcombine.low %v3838_v31, %v3840_v49 }
 0x2b1   :  { %v1113_v53 = vrot.slane %v1106_v61, %v4386_v41 }
 0x2b3   :  { %v1120_v3 = vrot.slane %v1113_v53, %v4386_v41 }
 0x2b5   :  { %v1122_v5 = vmul.f32 %v1120_v3, %v1099_v4 }
 0x2b7   :  { %v4715_v59 = vrot.slane %v1122_v5, %v4179_v6  ;;  %v4718_v62 = vrot.slane %v1122_v5, %v4185_v9 }
 0x2b9   :  { %v1135_v10 = vmul.f32 %v4715_v59, %v1091_v60  ;;  %v1136_v11 = vmul.f32 %v4718_v62, %v1092_v38  ;;  %v1157_v25 = vmul.f32 %v4718_v62, %v4533_v27  ;;  %v1159_v28 = vmul.f32 %v4718_v62, %v4525_v43 }
 0x2ba   :  { %v1184_v60 = vmul.f32 %v4715_v59, %v4681_v42  ;;  %v1186_v8 = vmul.f32 %v4715_v59, %v4695_v30  ;;  %v1156_v38 = vmul.f32 %v4715_v59, %v4528_v44  ;;  %v1158_v27 = vmul.f32 %v4715_v59, %v4522_v29 }
 0x2bb   :  { %v1139_v14 = vcombine.low %v1135_v10, %v1136_v11  ;;  %v1161_v43 = vmul.f32 %v4718_v62, %v4537_v51  ;;  %v1163_v42 = vmul.f32 %v4718_v62, %v4549_v46  ;;  %v1160_v51 = vmul.f32 %v4715_v59, %v4530_v0 }
 0x2bc   :  { %v1162_v46 = vmul.f32 %v4715_v59, %v4543_v13  ;;  %v1165_v31 = vmul.f32 %v4718_v62, %v4561_v2  ;;  %v1167_v49 = vmul.f32 %v4718_v62, %v4574_v20  ;;  %v1181_v61 = vmul.f32 %v4718_v62, %v4659_v63 }
 0x2bd   :  { %v1146_v24 = vrot.slane %v1139_v14, %v4386_v41  ;;  %v1183_v53 = vmul.f32 %v4718_v62, %v4672_v33  ;;  %v1187_v4 = vmul.f32 %v4718_v62, %v4704_v26  ;;  %v1185_v3 = vmul.f32 %v4718_v62, %v4691_v1 }
 0x2bf   :  { %v1153_v35 = vrot.slane %v1146_v24, %v4386_v41 }
 0x2c1   :  { %v1155_v56 = vsub.f32 %v1123_v23, %v1153_v35  ;;  %v1164_v35 = vmul.f32 %v4715_v59, %v4559_v47 }
 0x2c3   :  { %v4736_v50 = vrot.slane %v1155_v56, %v4179_v6  ;;  %v4739_v34 = vrot.slane %v1155_v56, %v4185_v9  ;;  %v1166_v56 = vmul.f32 %v4715_v59, %v4571_v48  ;;  %v1168_v48 = vmul.f32 %v4715_v59, %v4583_v22 }
 0x2c5   :  { %v1200_v30 = vadd.f32 %v4739_v34, %v1157_v25  ;;  %v1202_v21 = vadd.f32 %v4739_v34, %v1159_v28  ;;  %v1199_v39 = vadd.f32 %v4736_v50, %v1156_v38  ;;  %v1201_v36 = vadd.f32 %v4736_v50, %v1158_v27 }
 0x2c6   :  { %v1204_v52 = vadd.f32 %v4739_v34, %v1161_v43  ;;  %v1206_v44 = vadd.f32 %v4739_v34, %v1163_v42  ;;  %v1203_v0 = vadd.f32 %v4736_v50, %v1160_v51  ;;  %v1205_v13 = vadd.f32 %v4736_v50, %v1162_v46 }
 0x2c7   :  { %v1232_v17 = vpack.c.bf16 %v1202_v21, %v1200_v30  ;;  %v1231_v29 = vpack.c.bf16 %v1201_v36, %v1199_v39  ;;  %v1208_v2 = vadd.f32 %v4739_v34, %v1165_v31  ;;  %v1210_v20 = vadd.f32 %v4739_v34, %v1167_v49 }
 0x2c8   :  { %v1234_v45 = vpack.c.bf16 %v1206_v44, %v1204_v52  ;;  %v1224_v5 = vadd.f32 %v4739_v34, %v1181_v61  ;;  %v1226_v63 = vadd.f32 %v4739_v34, %v1183_v53  ;;  %v1228_v33 = vadd.f32 %v4739_v34, %v1185_v3  ;;  %v3724_v3 = vld [vmem:[#allocation7 + $0x60] ss:$8 sps:$4 sm:$0xff]  }
 0x2c9   :  { %1483 = vmatprep.mubr.bf16.mxu0 %v1232_v17  ;;  %v1230_v26 = vadd.f32 %v4739_v34, %v1187_v4  ;;  %v1227_v11 = vadd.f32 %v4736_v50, %v1184_v60  ;;  %v1233_v14 = vpack.c.bf16 %v1205_v13, %v1203_v0  ;;  %v1229_v24 = vadd.f32 %v4736_v50, %v1186_v8  ;;  %v3721_v0 = vld [vmem:[#allocation7 + $0x70] ss:$8 sps:$4 sm:$0xff]   ;;  %v3726_v13 = vld [vmem:[#allocation7 + $0x64] ss:$8 sps:$4 sm:$0xff]  }
 0x2ca   :  { %1484 = vmatmul.mubr.bf16.vlgmr.msra.gmra.mxu0 %v1231_v29  ;;  %v1244_v10 = vpack.c.bf16 %v1226_v63, %v1224_v5  ;;  %v1236_v23 = vpack.c.bf16 %v1210_v20, %v1208_v2  ;;  %v1169_v28 = vmul.f32 %v4718_v62, %v4593_v15  ;;  %v1171_v60 = vmul.f32 %v4718_v62, %v4602_v54  ;;  %v3727_v2 = vld [vmem:[#allocation7 + $0x50] ss:$8 sps:$4 sm:$0xff]   ;;  %v3738_v5 = vld [vmem:[#allocation7 + $0x24] ss:$8 sps:$4 sm:$0xff]   ;;  %v3736_v63 = vld [vmem:[#allocation7 + $0x20] ss:$8 sps:$4 sm:$0xff]  }
 0x2cb   :  { %1493 = vmatprep.mubr.bf16.mxu0 %v1234_v45  ;;  %v1246_v1 = vpack.c.bf16 %v1230_v26, %v1228_v33  ;;  %v1245_v25 = vpack.c.bf16 %v1229_v24, %v1227_v11  ;;  %v1207_v38 = vadd.f32 %v4736_v50, %v1164_v35  ;;  %v1209_v8 = vadd.f32 %v4736_v50, %v1166_v56  ;;  %v3733_v20 = vld [vmem:[#allocation7 + $0x30] ss:$8 sps:$4 sm:$0xff]   ;;  %v3741_v33 = vld [vmem:[#allocation7 + $0x14] ss:$8 sps:$4 sm:$0xff]   ;;  %v3744_v26 = vld [vmem:[#allocation7 + $0x4] ss:$8 sps:$4 sm:$0xff]  }
 0x2cc   :  { %v1212_v27 = vadd.f32 %v4739_v34, %v1169_v28  ;;  %v1214_v43 = vadd.f32 %v4739_v34, %v1171_v60  ;;  %v1170_v15 = vmul.f32 %v4715_v59, %v4595_v57  ;;  %v1173_v54 = vmul.f32 %v4718_v62, %v4614_v7  ;;  %v3742_v11 = vld [vmem:[#allocation7] ss:$8 sps:$4 sm:$0xff]   ;;  %v3745_v24 = vld [vmem:[#allocation7 + $0xf0] ss:$8 sps:$4 sm:$0xff]   ;;  %v3753_v35 = vld [vmem:[#allocation7 + $0xd4] ss:$8 sps:$4 sm:$0xff]  }
 0x2cd   :  { %v1235_v47 = vpack.c.bf16 %v1209_v8, %v1207_v38  ;;  %v1175_v30 = vmul.f32 %v4718_v62, %v4625_v58  ;;  %v1211_v21 = vadd.f32 %v4736_v50, %v1168_v48  ;;  %v1172_v57 = vmul.f32 %v4715_v59, %v4604_v55  ;;  %v3751_v56 = vld [vmem:[#allocation7 + $0xd0] ss:$8 sps:$4 sm:$0xff]   ;;  %v3754_v28 = vld [vmem:[#allocation7 + $0xc0] ss:$8 sps:$4 sm:$0xff]   ;;  %v3759_v38 = vld [vmem:[#allocation7 + $0xb4] ss:$8 sps:$4 sm:$0xff]  }
 0x2ce   :  { %v1238_v42 = vpack.c.bf16 %v1214_v43, %v1212_v27  ;;  %v1213_v39 = vadd.f32 %v4736_v50, %v1170_v15  ;;  %v1216_v36 = vadd.f32 %v4739_v34, %v1173_v54  ;;  %v1174_v7 = vmul.f32 %v4715_v59, %v4617_v12  ;;  %v3757_v60 = vld [vmem:[#allocation7 + $0xb0] ss:$8 sps:$4 sm:$0xff]   ;;  %v3762_v8 = vld [vmem:[#allocation7 + $0xa4] ss:$8 sps:$4 sm:$0xff]   ;;  %v3760_v27 = vld [vmem:[#allocation7 + $0xa0] ss:$8 sps:$4 sm:$0xff]  }
 0x2cf   :  { %v1218_v52 = vadd.f32 %v4739_v34, %v1175_v30  ;;  %v1177_v58 = vmul.f32 %v4718_v62, %v4638_v32  ;;  %v1179_v17 = vmul.f32 %v4718_v62, %v4647_v16  ;;  %v1215_v29 = vadd.f32 %v4736_v50, %v1172_v57  ;;  %v3765_v43 = vld [vmem:[#allocation7 + $0x94] ss:$8 sps:$4 sm:$0xff]   ;;  %v3763_v48 = vld [vmem:[#allocation7 + $0x90] ss:$8 sps:$4 sm:$0xff]   ;;  %v3768_v15 = vld [vmem:[#allocation7 + $0x84] ss:$8 sps:$4 sm:$0xff]  }
 0x2d0   :  { %v1237_v44 = vpack.c.bf16 %v1213_v39, %v1211_v21  ;;  %v1217_v45 = vadd.f32 %v4736_v50, %v1174_v7  ;;  %v1176_v12 = vmul.f32 %v4715_v59, %v4629_v19  ;;  %v1178_v32 = vmul.f32 %v4715_v59, %v4640_v40  ;;  %v3723_v40 = vld [vmem:[#allocation7 + $0x74] ss:$8 sps:$4 sm:$0xff]   ;;  %v3766_v21 = vld [vmem:[#allocation7 + $0x80] ss:$8 sps:$4 sm:$0xff]  }
 0x2d1   :  { %v1240_v22 = vpack.c.bf16 %v1218_v52, %v1216_v36  ;;  %v1220_v51 = vadd.f32 %v4739_v34, %v1177_v58  ;;  %v1222_v46 = vadd.f32 %v4739_v34, %v1179_v17  ;;  %v1180_v61 = vmul.f32 %v4715_v59, %v4649_v37  ;;  %2072 = vmatprep.subr.bf16.mxu1 %v3723_v40  ;;  %v3729_v37 = vld [vmem:[#allocation7 + $0x54] ss:$8 sps:$4 sm:$0xff]   ;;  %v1279_v57 = vld [vmem:[%s5837_s10] sm:$0x3] }
 0x2d2   :  { %1494 = vmatmul.mubr.bf16.gmra.mxu0 %v1233_v14  ;;  %v1239_v31 = vpack.c.bf16 %v1217_v45, %v1215_v29  ;;  %v1219_v16 = vadd.f32 %v4736_v50, %v1176_v12  ;;  %v1221_v62 = vadd.f32 %v4736_v50, %v1178_v32  ;;  %v1182_v34 = vmul.f32 %v4715_v59, %v4663_v18  ;;  %v3732_v18 = vld [vmem:[#allocation7 + $0x44] ss:$8 sps:$4 sm:$0xff]   ;;  %v3730_v59 = vld [vmem:[#allocation7 + $0x40] ss:$8 sps:$4 sm:$0xff]   ;;  %v3747_v14 = vld [vmem:[#allocation7 + $0xf4] ss:$8 sps:$4 sm:$0xff]  }
 0x2d3   :  { %1503 = vmatprep.mubr.bf16.mxu0 %v1236_v23  ;;  %v1242_v55 = vpack.c.bf16 %v1222_v46, %v1220_v51  ;;  %v1223_v53 = vadd.f32 %v4736_v50, %v1180_v61  ;;  %2073 = vmatpush1.bf16.msra.mxu1 %v3721_v0  ;;  %v3750_v23 = vld [vmem:[#allocation7 + $0xe4] ss:$8 sps:$4 sm:$0xff]   ;;  %v4833_v58 = vrot.slane %v1279_v57, %v4179_v6 }
 0x2d4   :  { %v1241_v49 = vpack.c.bf16 %v1221_v62, %v1219_v16  ;;  %v1225_v19 = vadd.f32 %v4736_v50, %v1182_v34  ;;  %2074 = vmatprep.subr.bf16.mxu1 %v3726_v13  ;;  %v3735_v50 = vld [vmem:[#allocation7 + $0x34] ss:$8 sps:$4 sm:$0xff]   ;;  %v4836_v29 = vrot.slane %v1279_v57, %v4185_v9 }
 0x2d6   :  { %v1243_v4 = vpack.c.bf16 %v1225_v19, %v1223_v53 }
 0x2d7   :  { %2075 = vmatpush1.bf16.msra.mxu1 %v3724_v3 }
 0x2d8   :  { %2076 = vmatprep.subr.bf16.mxu1 %v3729_v37 }
 0x2da   :  { %1504 = vmatmul.mubr.bf16.gmra.mxu0 %v1235_v47 }
 0x2db   :  { %1513 = vmatprep.mubr.bf16.mxu0 %v1238_v42  ;;  %2077 = vmatpush1.bf16.msra.mxu1 %v3727_v2 }
 0x2dc   :  { %2078 = vmatprep.subr.bf16.mxu1 %v3732_v18 }
 0x2df   :  { %2079 = vmatpush1.bf16.msra.mxu1 %v3730_v59 }
 0x2e0   :  { %2080 = vmatprep.subr.bf16.mxu1 %v3735_v50 }
 0x2e2   :  { %1514 = vmatmul.mubr.bf16.gmra.mxu0 %v1237_v44 }
 0x2e3   :  { %1523 = vmatprep.mubr.bf16.mxu0 %v1240_v22  ;;  %2081 = vmatpush1.bf16.msra.mxu1 %v3733_v20 }
 0x2e4   :  { %2082 = vmatprep.subr.bf16.mxu1 %v3738_v5 }
 0x2e7   :  { %2083 = vmatpush1.bf16.msra.mxu1 %v3736_v63 }
 0x2e8   :  { %2084 = vmatprep.subr.bf16.mxu1 %v3741_v33 }
 0x2ea   :  { %1524 = vmatmul.mubr.bf16.gmra.mxu0 %v1239_v31 }
 0x2eb   :  { %1533 = vmatprep.mubr.bf16.mxu0 %v1242_v55 }
 0x2f2   :  { %1534 = vmatmul.mubr.bf16.gmra.mxu0 %v1241_v49 }
 0x2f3   :  { %1543 = vmatprep.mubr.bf16.mxu0 %v1244_v10  ;;  %v3739_v10 = vld [vmem:[#allocation7 + $0x10] ss:$8 sps:$4 sm:$0xff]  }
 0x2f4   :  { %2085 = vmatpush1.bf16.msra.mxu1 %v3739_v10 }
 0x2f5   :  { %2086 = vmatprep.subr.bf16.mxu1 %v3744_v26 }
 0x2f8   :  { %2087 = vmatpush1.bf16.msra.mxu1 %v3742_v11 }
 0x2f9   :  { %2088 = vmatprep.subr.bf16.mxu1 %v3747_v14 }
 0x2fa   :  { %1544 = vmatmul.mubr.bf16.gmra.mxu0 %v1243_v4 }
 0x2fb   :  { %1553 = vmatprep.mubr.bf16.mxu0 %v1246_v1  ;;  %v3748_v1 = vld [vmem:[#allocation7 + $0xe0] ss:$8 sps:$4 sm:$0xff]  }
 0x2fc   :  { %2089 = vmatpush2.bf16.msra.mxu1 %v3745_v24 }
 0x2fd   :  { %2090 = vmatprep.subr.bf16.mxu1 %v3750_v23 }
 0x300   :  { %2091 = vmatpush2.bf16.msra.mxu1 %v3748_v1 }
 0x301   :  { %2092 = vmatprep.subr.bf16.mxu1 %v3753_v35 }
 0x302   :  { %1554 = vmatmul.mubr.bf16.gmra.mxu0 %v1245_v25  ;;  %v3756_v25 = vld [vmem:[#allocation7 + $0xc4] ss:$8 sps:$4 sm:$0xff]  }
 0x304   :  { %2093 = vmatpush2.bf16.msra.mxu1 %v3751_v56 }
 0x305   :  { %2094 = vmatprep.subr.bf16.mxu1 %v3756_v25 }
 0x308   :  { %2095 = vmatpush2.bf16.msra.mxu1 %v3754_v28 }
 0x309   :  { %2096 = vmatprep.subr.bf16.mxu1 %v3759_v38 }
 0x30c   :  { %2097 = vmatpush2.bf16.msra.mxu1 %v3757_v60 }
 0x30d   :  { %2098 = vmatprep.subr.bf16.mxu1 %v3762_v8 }
 0x310   :  { %2099 = vmatpush2.bf16.msra.mxu1 %v3760_v27 }
 0x311   :  { %2100 = vmatprep.subr.bf16.mxu1 %v3765_v43 }
 0x314   :  { %2101 = vmatpush2.bf16.msra.mxu1 %v3763_v48 }
 0x315   :  { %2102 = vmatprep.subr.bf16.mxu1 %v3768_v15 }
 0x318   :  { %2103 = vmatpush2.bf16.msra.mxu1 %v3766_v21 }
 0x38a   :  { %v1485_v47 = vpop.f32.mrf.mxu0 }
 0x38b   :  { %v1486_v31 = vadd.f32 %v1485_v47, %v4833_v58 }
 0x38c   :  { %v1487_v42 = vpop.f32.mrf.mxu0 }
 0x38d   :  { %v1488_v32 = vadd.f32 %v1487_v42, %v4836_v29  ;;  %v4849_v53 = vmax.f32 %v1486_v31, 0.0 }
 0x38e   :  { %v1489_v54 = vpop.f32.mrf.mxu0 }
 0x38f   :  { %v1490_v45 = vadd.f32 %v1489_v54, %v4833_v58  ;;  %v4854_v0 = vmax.f32 %v1488_v32, 0.0  ;;  %v1638_v20 = vmul.f32 %v4849_v53, %v4849_v53 }
 0x390   :  { %v1491_v30 = vpop.f32.mrf.mxu0 }
 0x391   :  { %v1492_v46 = vadd.f32 %v1491_v30, %v4836_v29  ;;  %v4843_v16 = vmax.f32 %v1490_v45, 0.0  ;;  %v1639_v26 = vmul.f32 %v4854_v0, %v4854_v0 }
 0x392   :  { %v1495_v39 = vpop.f32.mrf.mxu0 }
 0x393   :  { %v1496_v55 = vadd.f32 %v1495_v39, %v4833_v58  ;;  %v4846_v61 = vmax.f32 %v1492_v46, 0.0  ;;  %v1640_v13 = vmul.f32 %v4843_v16, %v4843_v16  ;;  %v1596_v11 = vadd.f32 %v4843_v16, %v4849_v53 }
 0x394   :  { %v1497_v36 = vpop.f32.mrf.mxu0 }
 0x395   :  { %v1498_v62 = vadd.f32 %v1497_v36, %v4836_v29  ;;  %v4851_v19 = vmax.f32 %v1496_v55, 0.0  ;;  %v1641_v59 = vmul.f32 %v4846_v61, %v4846_v61  ;;  %v1670_v24 = vadd.f32 %v1640_v13, %v1638_v20 }
 0x396   :  { %v1499_v52 = vpop.f32.mrf.mxu0  ;;  %v1617_v25 = vadd.f32 %v4846_v61, %v4854_v0 }
 0x397   :  { %v1500_v34 = vadd.f32 %v1499_v52, %v4833_v58  ;;  %v4858_v3 = vmax.f32 %v1498_v62, 0.0  ;;  %v1642_v5 = vmul.f32 %v4851_v19, %v4851_v19  ;;  %v1691_v28 = vadd.f32 %v1641_v59, %v1639_v26 }
 0x398   :  { %v1501_v44 = vpop.f32.mrf.mxu0  ;;  %v1597_v8 = vadd.f32 %v1596_v11, %v4851_v19 }
 0x399   :  { %v1502_v4 = vadd.f32 %v1501_v44, %v4836_v29  ;;  %v4864_v50 = vmax.f32 %v1500_v34, 0.0  ;;  %v1643_v23 = vmul.f32 %v4858_v3, %v4858_v3  ;;  %v1671_v27 = vadd.f32 %v1670_v24, %v1642_v5 }
 0x39a   :  { %v1505_v22 = vpop.f32.mrf.mxu0  ;;  %v1618_v48 = vadd.f32 %v1617_v25, %v4858_v3 }
 0x39b   :  { %v1506_v37 = vadd.f32 %v1505_v22, %v4833_v58  ;;  %v4870_v63 = vmax.f32 %v1502_v4, 0.0  ;;  %v1644_v60 = vmul.f32 %v4864_v50, %v4864_v50  ;;  %v1692_v21 = vadd.f32 %v1691_v28, %v1643_v23 }
 0x39c   :  { %v1507_v7 = vpop.f32.mrf.mxu0  ;;  %v1598_v39 = vadd.f32 %v1597_v8, %v4864_v50 }
 0x39d   :  { %v1508_v2 = vadd.f32 %v1507_v7, %v4836_v29  ;;  %v4880_v1 = vmax.f32 %v1506_v37, 0.0  ;;  %v1645_v43 = vmul.f32 %v4870_v63, %v4870_v63  ;;  %v1672_v22 = vadd.f32 %v1671_v27, %v1644_v60 }
 0x39e   :  { %v1509_v17 = vpop.f32.mrf.mxu0  ;;  %v1619_v45 = vadd.f32 %v1618_v48, %v4870_v63 }
 0x39f   :  { %v1510_v33 = vadd.f32 %v1509_v17, %v4833_v58  ;;  %v4882_v35 = vmax.f32 %v1508_v2, 0.0  ;;  %v1646_v36 = vmul.f32 %v4880_v1, %v4880_v1  ;;  %v1599_v46 = vadd.f32 %v1598_v39, %v4880_v1 }
 0x3a0   :  { %v1511_v51 = vpop.f32.mrf.mxu0 }
 0x3a1   :  { %v1512_v14 = vadd.f32 %v1511_v51, %v4836_v29  ;;  %v4892_v47 = vmax.f32 %v1510_v33, 0.0  ;;  %v1647_v52 = vmul.f32 %v4882_v35, %v4882_v35  ;;  %v1693_v51 = vadd.f32 %v1692_v21, %v1645_v43 }
 0x3a2   :  { %v1515_v12 = vpop.f32.mrf.mxu0  ;;  %v1673_v34 = vadd.f32 %v1672_v22, %v1646_v36  ;;  %v1620_v4 = vadd.f32 %v1619_v45, %v4882_v35 }
 0x3a3   :  { %v1516_v38 = vadd.f32 %v1515_v12, %v4833_v58  ;;  %v4895_v15 = vmax.f32 %v1512_v14, 0.0  ;;  %v1648_v31 = vmul.f32 %v4892_v47, %v4892_v47  ;;  %v1600_v5 = vadd.f32 %v1599_v46, %v4892_v47 }
 0x3a4   :  { %v1517_v49 = vpop.f32.mrf.mxu0 }
 0x3a5   :  { %v1518_v54 = vadd.f32 %v1517_v49, %v4836_v29  ;;  %v4904_v57 = vmax.f32 %v1516_v38, 0.0  ;;  %v1649_v12 = vmul.f32 %v4895_v15, %v4895_v15  ;;  %v1674_v33 = vadd.f32 %v1673_v34, %v1648_v31 }
 0x3a6   :  { %v1519_v40 = vpop.f32.mrf.mxu0 }
 0x3a7   :  { %v1520_v30 = vadd.f32 %v1519_v40, %v4833_v58  ;;  %v4914_v32 = vmax.f32 %v1518_v54, 0.0  ;;  %v1694_v40 = vadd.f32 %v1693_v51, %v1647_v52  ;;  %v1650_v2 = vmul.f32 %v4904_v57, %v4904_v57 }
 0x3a8   :  { %v1521_v18 = vpop.f32.mrf.mxu0  ;;  %v1601_v25 = vadd.f32 %v1600_v5, %v4904_v57 }
 0x3a9   :  { %v1522_v7 = vadd.f32 %v1521_v18, %v4836_v29  ;;  %v4916_v62 = vmax.f32 %v1520_v30, 0.0  ;;  %v1695_v14 = vadd.f32 %v1694_v40, %v1649_v12  ;;  %v1651_v24 = vmul.f32 %v4914_v32, %v4914_v32 }
 0x3aa   :  { %v1525_v10 = vpop.f32.mrf.mxu0  ;;  %v1675_v27 = vadd.f32 %v1674_v33, %v1650_v2 }
 0x3ab   :  { %v1526_v17 = vadd.f32 %v1525_v10, %v4833_v58  ;;  %v4923_v18 = vmax.f32 %v1522_v7, 0.0  ;;  %v1621_v10 = vadd.f32 %v1620_v4, %v4895_v15  ;;  %v1652_v23 = vmul.f32 %v4916_v62, %v4916_v62 }
 0x3ac   :  { %v1527_v56 = vpop.f32.mrf.mxu0  ;;  %v1602_v30 = vadd.f32 %v1601_v25, %v4916_v62  ;;  %v1696_v52 = vadd.f32 %v1695_v14, %v1651_v24 }
 0x3ad   :  { %v1528_v49 = vadd.f32 %v1527_v56, %v4836_v29  ;;  %v4925_v59 = vmax.f32 %v1526_v17, 0.0  ;;  %v1653_v43 = vmul.f32 %v4923_v18, %v4923_v18  ;;  %v1622_v54 = vadd.f32 %v1621_v10, %v4914_v32 }
 0x3ae   :  { %v1529_v42 = vpop.f32.mrf.mxu0 }
 0x3af   :  { %v1530_v13 = vadd.f32 %v1529_v42, %v4833_v58  ;;  %v4935_v56 = vmax.f32 %v1528_v49, 0.0  ;;  %v1654_v42 = vmul.f32 %v4925_v59, %v4925_v59  ;;  %v1623_v17 = vadd.f32 %v1622_v54, %v4923_v18 }
 0x3b0   :  { %v1531_v44 = vpop.f32.mrf.mxu0  ;;  %v1603_v12 = vadd.f32 %v1602_v30, %v4925_v59 }
 0x3b1   :  { %v1532_v20 = vadd.f32 %v1531_v44, %v4836_v29  ;;  %v4938_v28 = vmax.f32 %v1530_v13, 0.0  ;;  %v1676_v44 = vadd.f32 %v1675_v27, %v1652_v23  ;;  %v1655_v22 = vmul.f32 %v4935_v56, %v4935_v56 }
 0x3b2   :  { %v1535_v55 = vpop.f32.mrf.mxu0 }
 0x3b3   :  { %v1536_v26 = vadd.f32 %v1535_v55, %v4833_v58  ;;  %v4946_v48 = vmax.f32 %v1532_v20, 0.0  ;;  %v1656_v45 = vmul.f32 %v4938_v28, %v4938_v28  ;;  %v1697_v55 = vadd.f32 %v1696_v52, %v1653_v43 }
 0x3b4   :  { %v1537_v37 = vpop.f32.mrf.mxu0  ;;  %v1677_v49 = vadd.f32 %v1676_v44, %v1654_v42  ;;  %v1624_v20 = vadd.f32 %v1623_v17, %v4935_v56  ;;  %v1604_v33 = vadd.f32 %v1603_v12, %v4938_v28 }
 0x3b5   :  { %v1538_v60 = vadd.f32 %v1537_v37, %v4836_v29  ;;  %v4950_v21 = vmax.f32 %v1536_v26, 0.0  ;;  %v1657_v34 = vmul.f32 %v4946_v48, %v4946_v48  ;;  %v1698_v5 = vadd.f32 %v1697_v55, %v1655_v22 }
 0x3b6   :  { %v1539_v11 = vpop.f32.mrf.mxu0  ;;  %v1678_v26 = vadd.f32 %v1677_v49, %v1656_v45  ;;  %v1625_v25 = vadd.f32 %v1624_v20, %v4946_v48 }
 0x3b7   :  { %v1540_v38 = vadd.f32 %v1539_v11, %v4833_v58  ;;  %v4959_v51 = vmax.f32 %v1538_v60, 0.0  ;;  %v1658_v4 = vmul.f32 %v4950_v21, %v4950_v21  ;;  %v1605_v60 = vadd.f32 %v1604_v33, %v4950_v21 }
 0x3b8   :  { %v1541_v8 = vpop.f32.mrf.mxu0  ;;  %v1699_v27 = vadd.f32 %v1698_v5, %v1657_v34 }
 0x3b9   :  { %v1542_v39 = vadd.f32 %v1541_v8, %v4836_v29  ;;  %v4961_v46 = vmax.f32 %v1540_v38, 0.0  ;;  %v1659_v11 = vmul.f32 %v4959_v51, %v4959_v51  ;;  %v1679_v43 = vadd.f32 %v1678_v26, %v1658_v4 }
 0x3ba   :  { %v1545_v36 = vpop.f32.mrf.mxu0 }
 0x3bb   :  { %v1546_v7 = vadd.f32 %v1545_v36, %v4833_v58  ;;  %v4968_v40 = vmax.f32 %v1542_v39, 0.0  ;;  %v1660_v14 = vmul.f32 %v4961_v46, %v4961_v46  ;;  %v1626_v39 = vadd.f32 %v1625_v25, %v4959_v51 }
 0x3bc   :  { %v1547_v31 = vpop.f32.mrf.mxu0  ;;  %v1606_v36 = vadd.f32 %v1605_v60, %v4961_v46  ;;  %v1700_v22 = vadd.f32 %v1699_v27, %v1659_v11 }
 0x3bd   :  { %v4970_v13 = vmax.f32 %v1546_v7, 0.0  ;;  %v1548_v37 = vadd.f32 %v1547_v31, %v4836_v29  ;;  %v1661_v42 = vmul.f32 %v4968_v40, %v4968_v40  ;;  %v1680_v7 = vadd.f32 %v1679_v43, %v1660_v14 }
 0x3be   :  { %v1549_v2 = vpop.f32.mrf.mxu0  ;;  %v1627_v55 = vadd.f32 %v1626_v39, %v4968_v40 }
 0x3bf   :  { %v1550_v10 = vadd.f32 %v1549_v2, %v4833_v58  ;;  %v4980_v24 = vmax.f32 %v1548_v37, 0.0  ;;  %v1662_v54 = vmul.f32 %v4970_v13, %v4970_v13  ;;  %v1607_v12 = vadd.f32 %v1606_v36, %v4970_v13 }
 0x3c0   :  { %v1551_v23 = vpop.f32.mrf.mxu0  ;;  %v1701_v34 = vadd.f32 %v1700_v22, %v1661_v42 }
 0x3c1   :  { %v4984_v38 = vmax.f32 %v1550_v10, 0.0  ;;  %v1552_v8 = vadd.f32 %v1551_v23, %v4836_v29  ;;  %v1663_v17 = vmul.f32 %v4980_v24, %v4980_v24  ;;  %v1681_v4 = vadd.f32 %v1680_v7, %v1662_v54 }
 0x3c2   :  { %v1555_v30 = vpop.f32.mrf.mxu0  ;;  %v1628_v5 = vadd.f32 %v1627_v55, %v4980_v24 }
 0x3c3   :  { %v4993_v52 = vmax.f32 %v1552_v8, 0.0  ;;  %v1556_v44 = vadd.f32 %v1555_v30, %v4833_v58  ;;  %v1664_v45 = vmul.f32 %v4984_v38, %v4984_v38  ;;  %v1608_v33 = vadd.f32 %v1607_v12, %v4984_v38 }
 0x3c4   :  { %v1557_v31 = vpop.f32.mrf.mxu0  ;;  %v1702_v11 = vadd.f32 %v1701_v34, %v1663_v17 }
 0x3c5   :  { %v5002_v49 = vmax.f32 %v1556_v44, 0.0  ;;  %v1665_v37 = vmul.f32 %v4993_v52, %v4993_v52  ;;  %v1558_v2 = vadd.f32 %v1557_v31, %v4836_v29  ;;  %v1682_v14 = vadd.f32 %v1681_v4, %v1664_v45 }
 0x3c6   :  { %v1559_v20 = vpop.f32.mrf.mxu0  ;;  %v1629_v60 = vadd.f32 %v1628_v5, %v4993_v52 }
 0x3c7   :  { %v1666_v10 = vmul.f32 %v5002_v49, %v5002_v49  ;;  %v1560_v26 = vadd.f32 %v1559_v20, %v4833_v58  ;;  %v5012_v23 = vmax.f32 %v1558_v2, 0.0  ;;  %v1609_v8 = vadd.f32 %v1608_v33, %v5002_v49 }
 0x3c8   :  { %v1561_v25 = vpop.f32.mrf.mxu0  ;;  %v1703_v42 = vadd.f32 %v1702_v11, %v1665_v37 }
 0x3c9   :  { %v5016_v27 = vmax.f32 %v1560_v26, 0.0  ;;  %v1562_v43 = vadd.f32 %v1561_v25, %v4836_v29  ;;  %v1683_v54 = vadd.f32 %v1682_v14, %v1666_v10  ;;  %v1667_v30 = vmul.f32 %v5012_v23, %v5012_v23 }
 0x3ca   :  { %v1630_v58 = vadd.f32 %v1629_v60, %v5012_v23 }
 0x3cb   :  { %v1610_v39 = vadd.f32 %v1609_v8, %v5016_v27  ;;  %v1668_v36 = vmul.f32 %v5016_v27, %v5016_v27  ;;  %v5025_v44 = vmax.f32 %v1562_v43, 0.0  ;;  %v1704_v22 = vadd.f32 %v1703_v42, %v1667_v30 }
 0x3cd   :  { %v1611_v7 = vrot.slane %v1610_v39, 4  ;;  %v1684_v17 = vadd.f32 %v1683_v54, %v1668_v36  ;;  %v1631_v45 = vadd.f32 %v1630_v58, %v5025_v44  ;;  %v1669_v29 = vmul.f32 %v5025_v44, %v5025_v44 }
 0x3cf   :  { %v1612_v31 = vadd.f32 %v1611_v7, %v1610_v39  ;;  %v1685_v55 = vrot.slane %v1684_v17, 4  ;;  %v1632_v12 = vrot.slane %v1631_v45, 4  ;;  %v1705_v34 = vadd.f32 %v1704_v22, %v1669_v29 }
 0x3d1   :  { %v1613_v4 = vrot.slane %v1612_v31, 2  ;;  %v1686_v37 = vadd.f32 %v1685_v55, %v1684_v17  ;;  %v1633_v2 = vadd.f32 %v1632_v12, %v1631_v45  ;;  %v1706_v20 = vrot.slane %v1705_v34, 4 }
 0x3d3   :  { %v1614_v5 = vadd.f32 %v1613_v4, %v1612_v31  ;;  %v1687_v33 = vrot.slane %v1686_v37, 2  ;;  %v1634_v10 = vrot.slane %v1633_v2, 2  ;;  %v1707_v26 = vadd.f32 %v1706_v20, %v1705_v34 }
 0x3d5   :  { %v1615_v11 = vrot.slane %v1614_v5, 1  ;;  %v1688_v14 = vadd.f32 %v1687_v33, %v1686_v37  ;;  %v1635_v25 = vadd.f32 %v1634_v10, %v1633_v2  ;;  %v1708_v60 = vrot.slane %v1707_v26, 2  ;;  %v1720_v33 = vld [vmem:[%s5838_s11] sm:$0x3] }
 0x3d7   :  { %v1616_v8 = vadd.f32 %v1615_v11, %v1614_v5  ;;  %v1689_v43 = vrot.slane %v1688_v14, 1  ;;  %v1636_v42 = vrot.slane %v1635_v25, 1  ;;  %v1709_v54 = vadd.f32 %v1708_v60, %v1707_v26 }
 0x3d9   :  { %v1690_v30 = vadd.f32 %v1689_v43, %v1688_v14  ;;  %v1712_v58 = vmul.f32 0.0078125, %v1616_v8  ;;  %v1637_v39 = vadd.f32 %v1636_v42, %v1635_v25  ;;  %v1710_v36 = vrot.slane %v1709_v54, 1  ;;  %v1744_v42 = vld [vmem:[%s5839_s12] sm:$0x3] }
 0x3db   :  { %v1714_v22 = vmul.f32 0.0078125, %v1690_v30  ;;  %v1716_v7 = vmul.f32 %v1712_v58, %v1712_v58  ;;  %v1711_v17 = vadd.f32 %v1710_v36, %v1709_v54  ;;  %v1713_v45 = vmul.f32 0.0078125, %v1637_v39 }
 0x3dd   :  { %v1718_v29 = vsub.f32 %v1714_v22, %v1716_v7  ;;  %v1715_v31 = vmul.f32 0.0078125, %v1711_v17  ;;  %v1717_v55 = vmul.f32 %v1713_v45, %v1713_v45 }
 0x3df   :  { %v1721_v12 = vadd.f32 1e-05, %v1718_v29  ;;  %v1719_v34 = vsub.f32 %v1715_v31, %v1717_v55 }
 0x3e1   :  { %v1722_v4 = vadd.f32 1e-05, %v1719_v34  ;;  %3841 = vrsqrt.f32 %v1721_v12 }
 0x3e3   :  { %3843 = vrsqrt.f32 %v1722_v4 }
 0x3ee   :  { %v3842_v37 = vpop.eup %3841 }
 0x3f0   :  { %v3844_v2 = vpop.eup %3843 }
 0x3f1   :  { %v1727_v20 = vcombine.low %v3842_v37, %v3844_v2 }
 0x3f3   :  { %v1734_v5 = vrot.slane %v1727_v20, %v4386_v41 }
 0x3f5   :  { %v1741_v10 = vrot.slane %v1734_v5, %v4386_v41 }
 0x3f7   :  { %v1743_v26 = vmul.f32 %v1741_v10, %v1720_v33 }
 0x3f9   :  { %v5036_v11 = vrot.slane %v1743_v26, %v4179_v6  ;;  %v5039_v14 = vrot.slane %v1743_v26, %v4185_v9 }
 0x3fb   :  { %v1756_v25 = vmul.f32 %v5036_v11, %v1712_v58  ;;  %v1757_v60 = vmul.f32 %v5039_v14, %v1713_v45  ;;  %v1778_v39 = vmul.f32 %v5039_v14, %v4854_v0  ;;  %v1780_v36 = vmul.f32 %v5039_v14, %v4846_v61 }
 0x3fc   :  { %v1805_v58 = vmul.f32 %v5036_v11, %v5002_v49  ;;  %v1807_v22 = vmul.f32 %v5036_v11, %v5016_v27  ;;  %v1777_v45 = vmul.f32 %v5036_v11, %v4849_v53  ;;  %v1779_v0 = vmul.f32 %v5036_v11, %v4843_v16 }
 0x3fd   :  { %v1760_v8 = vcombine.low %v1756_v25, %v1757_v60  ;;  %v1782_v61 = vmul.f32 %v5039_v14, %v4858_v3  ;;  %v1784_v49 = vmul.f32 %v5039_v14, %v4870_v63  ;;  %v1781_v3 = vmul.f32 %v5036_v11, %v4851_v19 }
 0x3fe   :  { %v1783_v63 = vmul.f32 %v5036_v11, %v4864_v50  ;;  %v1786_v37 = vmul.f32 %v5039_v14, %v4882_v35  ;;  %v1788_v2 = vmul.f32 %v5039_v14, %v4895_v15  ;;  %v1802_v20 = vmul.f32 %v5039_v14, %v4980_v24 }
 0x3ff   :  { %v1767_v43 = vrot.slane %v1760_v8, %v4386_v41  ;;  %v1804_v5 = vmul.f32 %v5039_v14, %v4993_v52  ;;  %v1808_v33 = vmul.f32 %v5039_v14, %v5025_v44  ;;  %v1806_v10 = vmul.f32 %v5039_v14, %v5012_v23 }
 0x401   :  { %v1774_v54 = vrot.slane %v1767_v43, %v4386_v41 }
 0x403   :  { %v1776_v30 = vsub.f32 %v1744_v42, %v1774_v54  ;;  %v1785_v54 = vmul.f32 %v5036_v11, %v4880_v1 }
 0x405   :  { %v5057_v7 = vrot.slane %v1776_v30, %v4179_v6  ;;  %v5060_v17 = vrot.slane %v1776_v30, %v4185_v9  ;;  %v1787_v30 = vmul.f32 %v5036_v11, %v4892_v47  ;;  %v1789_v47 = vmul.f32 %v5036_v11, %v4904_v57 }
 0x407   :  { %v1821_v27 = vadd.f32 %v5060_v17, %v1778_v39  ;;  %v1823_v29 = vadd.f32 %v5060_v17, %v1780_v36  ;;  %v1820_v31 = vadd.f32 %v5057_v7, %v1777_v45  ;;  %v1822_v55 = vadd.f32 %v5057_v7, %v1779_v0 }
 0x408   :  { %v1825_v12 = vadd.f32 %v5060_v17, %v1782_v61  ;;  %v1827_v53 = vadd.f32 %v5060_v17, %v1784_v49  ;;  %v1824_v19 = vadd.f32 %v5057_v7, %v1781_v3  ;;  %v1826_v50 = vadd.f32 %v5057_v7, %v1783_v63 }
 0x409   :  { %v1853_v34 = vpack.c.bf16 %v1823_v29, %v1821_v27  ;;  %v1852_v16 = vpack.c.bf16 %v1822_v55, %v1820_v31  ;;  %v1829_v35 = vadd.f32 %v5060_v17, %v1786_v37  ;;  %v1831_v15 = vadd.f32 %v5060_v17, %v1788_v2 }
 0x40a   :  { %v1855_v4 = vpack.c.bf16 %v1827_v53, %v1825_v12  ;;  %v1845_v26 = vadd.f32 %v5060_v17, %v1802_v20  ;;  %v1847_v24 = vadd.f32 %v5060_v17, %v1804_v5  ;;  %v1849_v52 = vadd.f32 %v5060_v17, %v1806_v10  ;;  %v3772_v10 = vld [vmem:[#allocation8 + $0x60] ss:$8 sps:$4 sm:$0xff]  }
 0x40b   :  { %2104 = vmatprep.mubr.bf16.mxu1 %v1853_v34  ;;  %v1851_v44 = vadd.f32 %v5060_v17, %v1808_v33  ;;  %v1848_v60 = vadd.f32 %v5057_v7, %v1805_v58  ;;  %v1854_v8 = vpack.c.bf16 %v1826_v50, %v1824_v19  ;;  %v1850_v43 = vadd.f32 %v5057_v7, %v1807_v22  ;;  %v3769_v19 = vld [vmem:[#allocation8 + $0x70] ss:$8 sps:$4 sm:$0xff]   ;;  %v3774_v50 = vld [vmem:[#allocation8 + $0x64] ss:$8 sps:$4 sm:$0xff]  }
 0x40c   :  { %2105 = vmatmul.mubr.bf16.vlgmr.msra.gmra.mxu1 %v1852_v16  ;;  %v1865_v25 = vpack.c.bf16 %v1847_v24, %v1845_v26  ;;  %v1857_v42 = vpack.c.bf16 %v1831_v15, %v1829_v35  ;;  %v1790_v36 = vmul.f32 %v5039_v14, %v4914_v32  ;;  %v1792_v58 = vmul.f32 %v5039_v14, %v4923_v18  ;;  %v3775_v35 = vld [vmem:[#allocation8 + $0x50] ss:$8 sps:$4 sm:$0xff]   ;;  %v3786_v26 = vld [vmem:[#allocation8 + $0x24] ss:$8 sps:$4 sm:$0xff]   ;;  %v3784_v24 = vld [vmem:[#allocation8 + $0x20] ss:$8 sps:$4 sm:$0xff]  }
 0x40d   :  { %2114 = vmatprep.mubr.bf16.mxu1 %v1855_v4  ;;  %v1867_v23 = vpack.c.bf16 %v1851_v44, %v1849_v52  ;;  %v1866_v39 = vpack.c.bf16 %v1850_v43, %v1848_v60  ;;  %v1828_v45 = vadd.f32 %v5057_v7, %v1785_v54  ;;  %v1830_v22 = vadd.f32 %v5057_v7, %v1787_v30  ;;  %v3781_v15 = vld [vmem:[#allocation8 + $0x30] ss:$8 sps:$4 sm:$0xff]   ;;  %v3789_v52 = vld [vmem:[#allocation8 + $0x14] ss:$8 sps:$4 sm:$0xff]   ;;  %v3792_v44 = vld [vmem:[#allocation8 + $0x4] ss:$8 sps:$4 sm:$0xff]  }
 0x40e   :  { %v1833_v0 = vadd.f32 %v5060_v17, %v1790_v36  ;;  %v1835_v61 = vadd.f32 %v5060_v17, %v1792_v58  ;;  %v1791_v32 = vmul.f32 %v5036_v11, %v4916_v62  ;;  %v1794_v18 = vmul.f32 %v5039_v14, %v4935_v56  ;;  %v3790_v60 = vld [vmem:[#allocation8] ss:$8 sps:$4 sm:$0xff]   ;;  %v3793_v43 = vld [vmem:[#allocation8 + $0xf0] ss:$8 sps:$4 sm:$0xff]   ;;  %v3801_v54 = vld [vmem:[#allocation8 + $0xd4] ss:$8 sps:$4 sm:$0xff]  }
 0x40f   :  { %v1856_v1 = vpack.c.bf16 %v1830_v22, %v1828_v45  ;;  %v1796_v27 = vmul.f32 %v5039_v14, %v4946_v48  ;;  %v1832_v29 = vadd.f32 %v5057_v7, %v1789_v47  ;;  %v1793_v62 = vmul.f32 %v5036_v11, %v4925_v59  ;;  %v3799_v30 = vld [vmem:[#allocation8 + $0xd0] ss:$8 sps:$4 sm:$0xff]   ;;  %v3802_v36 = vld [vmem:[#allocation8 + $0xc0] ss:$8 sps:$4 sm:$0xff]   ;;  %v3807_v45 = vld [vmem:[#allocation8 + $0xb4] ss:$8 sps:$4 sm:$0xff]  }
 0x410   :  { %v1859_v49 = vpack.c.bf16 %v1835_v61, %v1833_v0  ;;  %v1834_v31 = vadd.f32 %v5057_v7, %v1791_v32  ;;  %v1837_v55 = vadd.f32 %v5060_v17, %v1794_v18  ;;  %v1795_v56 = vmul.f32 %v5036_v11, %v4938_v28  ;;  %v3805_v58 = vld [vmem:[#allocation8 + $0xb0] ss:$8 sps:$4 sm:$0xff]   ;;  %v3810_v22 = vld [vmem:[#allocation8 + $0xa4] ss:$8 sps:$4 sm:$0xff]   ;;  %v3808_v0 = vld [vmem:[#allocation8 + $0xa0] ss:$8 sps:$4 sm:$0xff]  }
 0x411   :  { %v1839_v12 = vadd.f32 %v5060_v17, %v1796_v27  ;;  %v1798_v48 = vmul.f32 %v5039_v14, %v4959_v51  ;;  %v1800_v34 = vmul.f32 %v5039_v14, %v4968_v40  ;;  %v1836_v16 = vadd.f32 %v5057_v7, %v1793_v62  ;;  %v3813_v61 = vld [vmem:[#allocation8 + $0x94] ss:$8 sps:$4 sm:$0xff]   ;;  %v3811_v47 = vld [vmem:[#allocation8 + $0x90] ss:$8 sps:$4 sm:$0xff]   ;;  %v3816_v32 = vld [vmem:[#allocation8 + $0x84] ss:$8 sps:$4 sm:$0xff]  }
 0x412   :  { %v1858_v53 = vpack.c.bf16 %v1834_v31, %v1832_v29  ;;  %v1838_v4 = vadd.f32 %v5057_v7, %v1795_v56  ;;  %v1797_v28 = vmul.f32 %v5036_v11, %v4950_v21  ;;  %v1799_v51 = vmul.f32 %v5036_v11, %v4961_v46  ;;  %v3771_v46 = vld [vmem:[#allocation8 + $0x74] ss:$8 sps:$4 sm:$0xff]   ;;  %v3814_v29 = vld [vmem:[#allocation8 + $0x80] ss:$8 sps:$4 sm:$0xff]  }
 0x413   :  { %v1861_v57 = vpack.c.bf16 %v1839_v12, %v1837_v55  ;;  %v1841_v3 = vadd.f32 %v5060_v17, %v1798_v48  ;;  %v1843_v63 = vadd.f32 %v5060_v17, %v1800_v34  ;;  %v1801_v20 = vmul.f32 %v5036_v11, %v4970_v13  ;;  %2693 = vmatprep.subr.bf16.mxu0 %v3771_v46  ;;  %v3777_v13 = vld [vmem:[#allocation8 + $0x54] ss:$8 sps:$4 sm:$0xff]   ;;  %v1900_v62 = vld [vmem:[%s5841_s14] sm:$0x3] }
 0x414   :  { %2115 = vmatmul.mubr.bf16.gmra.mxu1 %v1854_v8  ;;  %v1860_v37 = vpack.c.bf16 %v1838_v4, %v1836_v16  ;;  %v1840_v40 = vadd.f32 %v5057_v7, %v1797_v28  ;;  %v1842_v14 = vadd.f32 %v5057_v7, %v1799_v51  ;;  %v1803_v17 = vmul.f32 %v5036_v11, %v4984_v38  ;;  %v3780_v38 = vld [vmem:[#allocation8 + $0x44] ss:$8 sps:$4 sm:$0xff]   ;;  %v3778_v11 = vld [vmem:[#allocation8 + $0x40] ss:$8 sps:$4 sm:$0xff]   ;;  %v3795_v8 = vld [vmem:[#allocation8 + $0xf4] ss:$8 sps:$4 sm:$0xff]  }
 0x415   :  { %2124 = vmatprep.mubr.bf16.mxu1 %v1857_v42  ;;  %v1863_v59 = vpack.c.bf16 %v1843_v63, %v1841_v3  ;;  %v1844_v5 = vadd.f32 %v5057_v7, %v1801_v20  ;;  %2694 = vmatpush1.bf16.msra.mxu0 %v3769_v19  ;;  %v3798_v42 = vld [vmem:[#allocation8 + $0xe4] ss:$8 sps:$4 sm:$0xff]   ;;  %v5154_v48 = vrot.slane %v1900_v62, %v4179_v6 }
 0x416   :  { %v1862_v2 = vpack.c.bf16 %v1842_v14, %v1840_v40  ;;  %v1846_v21 = vadd.f32 %v5057_v7, %v1803_v17  ;;  %2695 = vmatprep.subr.bf16.mxu0 %v3774_v50  ;;  %v3783_v7 = vld [vmem:[#allocation8 + $0x34] ss:$8 sps:$4 sm:$0xff]   ;;  %v5157_v16 = vrot.slane %v1900_v62, %v4185_v9 }
 0x418   :  { %v1864_v33 = vpack.c.bf16 %v1846_v21, %v1844_v5 }
 0x419   :  { %2696 = vmatpush1.bf16.msra.mxu0 %v3772_v10 }
 0x41a   :  { %2697 = vmatprep.subr.bf16.mxu0 %v3777_v13 }
 0x41c   :  { %2125 = vmatmul.mubr.bf16.gmra.mxu1 %v1856_v1 }
 0x41d   :  { %2134 = vmatprep.mubr.bf16.mxu1 %v1859_v49  ;;  %2698 = vmatpush1.bf16.msra.mxu0 %v3775_v35 }
 0x41e   :  { %2699 = vmatprep.subr.bf16.mxu0 %v3780_v38 }
 0x421   :  { %2700 = vmatpush1.bf16.msra.mxu0 %v3778_v11 }
 0x422   :  { %2701 = vmatprep.subr.bf16.mxu0 %v3783_v7 }
 0x424   :  { %2135 = vmatmul.mubr.bf16.gmra.mxu1 %v1858_v53 }
 0x425   :  { %2144 = vmatprep.mubr.bf16.mxu1 %v1861_v57  ;;  %2702 = vmatpush1.bf16.msra.mxu0 %v3781_v15 }
 0x426   :  { %2703 = vmatprep.subr.bf16.mxu0 %v3786_v26 }
 0x429   :  { %2704 = vmatpush1.bf16.msra.mxu0 %v3784_v24 }
 0x42a   :  { %2705 = vmatprep.subr.bf16.mxu0 %v3789_v52 }
 0x42c   :  { %2145 = vmatmul.mubr.bf16.gmra.mxu1 %v1860_v37 }
 0x42d   :  { %2154 = vmatprep.mubr.bf16.mxu1 %v1863_v59 }
 0x434   :  { %2155 = vmatmul.mubr.bf16.gmra.mxu1 %v1862_v2 }
 0x435   :  { %2164 = vmatprep.mubr.bf16.mxu1 %v1865_v25  ;;  %v3787_v25 = vld [vmem:[#allocation8 + $0x10] ss:$8 sps:$4 sm:$0xff]  }
 0x436   :  { %2706 = vmatpush1.bf16.msra.mxu0 %v3787_v25 }
 0x437   :  { %2707 = vmatprep.subr.bf16.mxu0 %v3792_v44 }
 0x43a   :  { %2708 = vmatpush1.bf16.msra.mxu0 %v3790_v60 }
 0x43b   :  { %2709 = vmatprep.subr.bf16.mxu0 %v3795_v8 }
 0x43c   :  { %2165 = vmatmul.mubr.bf16.gmra.mxu1 %v1864_v33 }
 0x43d   :  { %2174 = vmatprep.mubr.bf16.mxu1 %v1867_v23  ;;  %v3796_v23 = vld [vmem:[#allocation8 + $0xe0] ss:$8 sps:$4 sm:$0xff]  }
 0x43e   :  { %2710 = vmatpush2.bf16.msra.mxu0 %v3793_v43 }
 0x43f   :  { %2711 = vmatprep.subr.bf16.mxu0 %v3798_v42 }
 0x442   :  { %2712 = vmatpush2.bf16.msra.mxu0 %v3796_v23 }
 0x443   :  { %2713 = vmatprep.subr.bf16.mxu0 %v3801_v54 }
 0x444   :  { %2175 = vmatmul.mubr.bf16.gmra.mxu1 %v1866_v39  ;;  %v3804_v39 = vld [vmem:[#allocation8 + $0xc4] ss:$8 sps:$4 sm:$0xff]  }
 0x446   :  { %2714 = vmatpush2.bf16.msra.mxu0 %v3799_v30 }
 0x447   :  { %2715 = vmatprep.subr.bf16.mxu0 %v3804_v39 }
 0x44a   :  { %2716 = vmatpush2.bf16.msra.mxu0 %v3802_v36 }
 0x44b   :  { %2717 = vmatprep.subr.bf16.mxu0 %v3807_v45 }
 0x44e   :  { %2718 = vmatpush2.bf16.msra.mxu0 %v3805_v58 }
 0x44f   :  { %2719 = vmatprep.subr.bf16.mxu0 %v3810_v22 }
 0x452   :  { %2720 = vmatpush2.bf16.msra.mxu0 %v3808_v0 }
 0x453   :  { %2721 = vmatprep.subr.bf16.mxu0 %v3813_v61 }
 0x456   :  { %2722 = vmatpush2.bf16.msra.mxu0 %v3811_v47 }
 0x457   :  { %2723 = vmatprep.subr.bf16.mxu0 %v3816_v32 }
 0x45a   :  { %2724 = vmatpush2.bf16.msra.mxu0 %v3814_v29 }
 0x4cc   :  { %v2106_v1 = vpop.f32.mrf.mxu1 }
 0x4cd   :  { %v2107_v37 = vadd.f32 %v2106_v1, %v5154_v48 }
 0x4ce   :  { %v2108_v49 = vpop.f32.mrf.mxu1 }
 0x4cf   :  { %v2109_v51 = vadd.f32 %v2108_v49, %v5157_v16  ;;  %v5170_v5 = vmax.f32 %v2107_v37, 0.0 }
 0x4d0   :  { %v2110_v18 = vpop.f32.mrf.mxu1 }
 0x4d1   :  { %v2111_v4 = vadd.f32 %v2110_v18, %v5154_v48  ;;  %v5175_v19 = vmax.f32 %v2109_v51, 0.0  ;;  %v2259_v15 = vmul.f32 %v5170_v5, %v5170_v5 }
 0x4d2   :  { %v2112_v27 = vpop.f32.mrf.mxu1 }
 0x4d3   :  { %v2113_v63 = vadd.f32 %v2112_v27, %v5157_v16  ;;  %v5164_v40 = vmax.f32 %v2111_v4, 0.0  ;;  %v2260_v44 = vmul.f32 %v5175_v19, %v5175_v19 }
 0x4d4   :  { %v2116_v31 = vpop.f32.mrf.mxu1 }
 0x4d5   :  { %v2117_v59 = vadd.f32 %v2116_v31, %v5154_v48  ;;  %v5167_v20 = vmax.f32 %v2113_v63, 0.0  ;;  %v2261_v50 = vmul.f32 %v5164_v40, %v5164_v40  ;;  %v2217_v60 = vadd.f32 %v5164_v40, %v5170_v5 }
 0x4d6   :  { %v2118_v55 = vpop.f32.mrf.mxu1 }
 0x4d7   :  { %v2119_v14 = vadd.f32 %v2118_v55, %v5157_v16  ;;  %v5172_v21 = vmax.f32 %v2117_v59, 0.0  ;;  %v2262_v11 = vmul.f32 %v5167_v20, %v5167_v20  ;;  %v2291_v43 = vadd.f32 %v2261_v50, %v2259_v15 }
 0x4d8   :  { %v2120_v12 = vpop.f32.mrf.mxu1  ;;  %v2238_v39 = vadd.f32 %v5167_v20, %v5175_v19 }
 0x4d9   :  { %v2121_v17 = vadd.f32 %v2120_v12, %v5154_v48  ;;  %v5179_v10 = vmax.f32 %v2119_v14, 0.0  ;;  %v2263_v26 = vmul.f32 %v5172_v21, %v5172_v21  ;;  %v2312_v36 = vadd.f32 %v2262_v11, %v2260_v44 }
 0x4da   :  { %v2122_v53 = vpop.f32.mrf.mxu1  ;;  %v2218_v22 = vadd.f32 %v2217_v60, %v5172_v21 }
 0x4db   :  { %v2123_v33 = vadd.f32 %v2122_v53, %v5157_v16  ;;  %v5185_v7 = vmax.f32 %v2121_v17, 0.0  ;;  %v2264_v42 = vmul.f32 %v5179_v10, %v5179_v10  ;;  %v2292_v0 = vadd.f32 %v2291_v43, %v2263_v26 }
 0x4dc   :  { %v2126_v57 = vpop.f32.mrf.mxu1  ;;  %v2239_v47 = vadd.f32 %v2238_v39, %v5179_v10 }
 0x4dd   :  { %v2127_v13 = vadd.f32 %v2126_v57, %v5154_v48  ;;  %v5191_v24 = vmax.f32 %v2123_v33, 0.0  ;;  %v2265_v58 = vmul.f32 %v5185_v7, %v5185_v7  ;;  %v2313_v29 = vadd.f32 %v2312_v36, %v2264_v42 }
 0x4de   :  { %v2128_v56 = vpop.f32.mrf.mxu1  ;;  %v2219_v31 = vadd.f32 %v2218_v22, %v5185_v7 }
 0x4df   :  { %v2129_v35 = vadd.f32 %v2128_v56, %v5157_v16  ;;  %v5201_v23 = vmax.f32 %v2127_v13, 0.0  ;;  %v2266_v61 = vmul.f32 %v5191_v24, %v5191_v24  ;;  %v2293_v57 = vadd.f32 %v2292_v0, %v2265_v58 }
 0x4e0   :  { %v2130_v34 = vpop.f32.mrf.mxu1  ;;  %v2240_v4 = vadd.f32 %v2239_v47, %v5191_v24 }
 0x4e1   :  { %v2131_v52 = vadd.f32 %v2130_v34, %v5154_v48  ;;  %v5203_v54 = vmax.f32 %v2129_v35, 0.0  ;;  %v2267_v55 = vmul.f32 %v5201_v23, %v5201_v23  ;;  %v2220_v63 = vadd.f32 %v2219_v31, %v5201_v23 }
 0x4e2   :  { %v2132_v3 = vpop.f32.mrf.mxu1 }
 0x4e3   :  { %v2133_v8 = vadd.f32 %v2132_v3, %v5157_v16  ;;  %v5213_v1 = vmax.f32 %v2131_v52, 0.0  ;;  %v2268_v12 = vmul.f32 %v5203_v54, %v5203_v54  ;;  %v2314_v3 = vadd.f32 %v2313_v29, %v2266_v61 }
 0x4e4   :  { %v2136_v28 = vpop.f32.mrf.mxu1  ;;  %v2294_v17 = vadd.f32 %v2293_v57, %v2267_v55  ;;  %v2241_v33 = vadd.f32 %v2240_v4, %v5203_v54 }
 0x4e5   :  { %v2137_v45 = vadd.f32 %v2136_v28, %v5154_v48  ;;  %v5216_v32 = vmax.f32 %v2133_v8, 0.0  ;;  %v2269_v37 = vmul.f32 %v5213_v1, %v5213_v1  ;;  %v2221_v26 = vadd.f32 %v2220_v63, %v5213_v1 }
 0x4e6   :  { %v2138_v2 = vpop.f32.mrf.mxu1 }
 0x4e7   :  { %v2139_v18 = vadd.f32 %v2138_v2, %v5157_v16  ;;  %v5225_v62 = vmax.f32 %v2137_v45, 0.0  ;;  %v2270_v28 = vmul.f32 %v5216_v32, %v5216_v32  ;;  %v2295_v52 = vadd.f32 %v2294_v17, %v2269_v37 }
 0x4e8   :  { %v2140_v46 = vpop.f32.mrf.mxu1 }
 0x4e9   :  { %v2141_v27 = vadd.f32 %v2140_v46, %v5154_v48  ;;  %v5235_v51 = vmax.f32 %v2139_v18, 0.0  ;;  %v2315_v46 = vadd.f32 %v2314_v3, %v2268_v12  ;;  %v2271_v35 = vmul.f32 %v5225_v62, %v5225_v62 }
 0x4ea   :  { %v2142_v38 = vpop.f32.mrf.mxu1  ;;  %v2222_v39 = vadd.f32 %v2221_v26, %v5225_v62 }
 0x4eb   :  { %v2143_v56 = vadd.f32 %v2142_v38, %v5157_v16  ;;  %v5237_v14 = vmax.f32 %v2141_v27, 0.0  ;;  %v2316_v8 = vadd.f32 %v2315_v46, %v2270_v28  ;;  %v2272_v43 = vmul.f32 %v5235_v51, %v5235_v51 }
 0x4ec   :  { %v2146_v25 = vpop.f32.mrf.mxu1  ;;  %v2296_v0 = vadd.f32 %v2295_v52, %v2271_v35 }
 0x4ed   :  { %v2147_v34 = vadd.f32 %v2146_v25, %v5154_v48  ;;  %v5244_v38 = vmax.f32 %v2143_v56, 0.0  ;;  %v2242_v25 = vadd.f32 %v2241_v33, %v5216_v32  ;;  %v2273_v42 = vmul.f32 %v5237_v14, %v5237_v14 }
 0x4ee   :  { %v2148_v30 = vpop.f32.mrf.mxu1  ;;  %v2223_v27 = vadd.f32 %v2222_v39, %v5237_v14  ;;  %v2317_v12 = vadd.f32 %v2316_v8, %v2272_v43 }
 0x4ef   :  { %v2149_v2 = vadd.f32 %v2148_v30, %v5157_v16  ;;  %v5246_v11 = vmax.f32 %v2147_v34, 0.0  ;;  %v2274_v61 = vmul.f32 %v5244_v38, %v5244_v38  ;;  %v2243_v18 = vadd.f32 %v2242_v25, %v5235_v51 }
 0x4f0   :  { %v2150_v49 = vpop.f32.mrf.mxu1 }
 0x4f1   :  { %v2151_v50 = vadd.f32 %v2150_v49, %v5154_v48  ;;  %v5256_v30 = vmax.f32 %v2149_v2, 0.0  ;;  %v2275_v49 = vmul.f32 %v5246_v11, %v5246_v11  ;;  %v2244_v34 = vadd.f32 %v2243_v18, %v5244_v38 }
 0x4f2   :  { %v2152_v53 = vpop.f32.mrf.mxu1  ;;  %v2224_v28 = vadd.f32 %v2223_v27, %v5246_v11 }
 0x4f3   :  { %v2153_v15 = vadd.f32 %v2152_v53, %v5157_v16  ;;  %v5259_v36 = vmax.f32 %v2151_v50, 0.0  ;;  %v2297_v53 = vadd.f32 %v2296_v0, %v2273_v42  ;;  %v2276_v57 = vmul.f32 %v5256_v30, %v5256_v30 }
 0x4f4   :  { %v2156_v59 = vpop.f32.mrf.mxu1 }
 0x4f5   :  { %v2157_v44 = vadd.f32 %v2156_v59, %v5154_v48  ;;  %v5267_v47 = vmax.f32 %v2153_v15, 0.0  ;;  %v2277_v4 = vmul.f32 %v5259_v36, %v5259_v36  ;;  %v2318_v59 = vadd.f32 %v2317_v12, %v2274_v61 }
 0x4f6   :  { %v2158_v13 = vpop.f32.mrf.mxu1  ;;  %v2298_v2 = vadd.f32 %v2297_v53, %v2275_v49  ;;  %v2245_v15 = vadd.f32 %v2244_v34, %v5256_v30  ;;  %v2225_v52 = vadd.f32 %v2224_v28, %v5259_v36 }
 0x4f7   :  { %v2159_v58 = vadd.f32 %v2158_v13, %v5157_v16  ;;  %v5271_v29 = vmax.f32 %v2157_v44, 0.0  ;;  %v2278_v17 = vmul.f32 %v5267_v47, %v5267_v47  ;;  %v2319_v26 = vadd.f32 %v2318_v59, %v2276_v57 }
 0x4f8   :  { %v2160_v60 = vpop.f32.mrf.mxu1  ;;  %v2299_v44 = vadd.f32 %v2298_v2, %v2277_v4  ;;  %v2246_v39 = vadd.f32 %v2245_v15, %v5267_v47 }
 0x4f9   :  { %v2161_v45 = vadd.f32 %v2160_v60, %v5154_v48  ;;  %v5280_v3 = vmax.f32 %v2159_v58, 0.0  ;;  %v2279_v33 = vmul.f32 %v5271_v29, %v5271_v29  ;;  %v2226_v58 = vadd.f32 %v2225_v52, %v5271_v29 }
 0x4fa   :  { %v2162_v22 = vpop.f32.mrf.mxu1  ;;  %v2320_v0 = vadd.f32 %v2319_v26, %v2278_v17 }
 0x4fb   :  { %v2163_v31 = vadd.f32 %v2162_v22, %v5157_v16  ;;  %v5282_v63 = vmax.f32 %v2161_v45, 0.0  ;;  %v2280_v60 = vmul.f32 %v5280_v3, %v5280_v3  ;;  %v2300_v61 = vadd.f32 %v2299_v44, %v2279_v33 }
 0x4fc   :  { %v2166_v55 = vpop.f32.mrf.mxu1 }
 0x4fd   :  { %v2167_v56 = vadd.f32 %v2166_v55, %v5154_v48  ;;  %v5289_v46 = vmax.f32 %v2163_v31, 0.0  ;;  %v2281_v8 = vmul.f32 %v5282_v63, %v5282_v63  ;;  %v2247_v31 = vadd.f32 %v2246_v39, %v5280_v3 }
 0x4fe   :  { %v2168_v37 = vpop.f32.mrf.mxu1  ;;  %v2227_v55 = vadd.f32 %v2226_v58, %v5282_v63  ;;  %v2321_v57 = vadd.f32 %v2320_v0, %v2280_v60 }
 0x4ff   :  { %v5291_v50 = vmax.f32 %v2167_v56, 0.0  ;;  %v2169_v13 = vadd.f32 %v2168_v37, %v5157_v16  ;;  %v2282_v49 = vmul.f32 %v5289_v46, %v5289_v46  ;;  %v2301_v56 = vadd.f32 %v2300_v61, %v2281_v8 }
 0x500   :  { %v2170_v35 = vpop.f32.mrf.mxu1  ;;  %v2248_v59 = vadd.f32 %v2247_v31, %v5289_v46 }
 0x501   :  { %v2171_v25 = vadd.f32 %v2170_v35, %v5154_v48  ;;  %v5301_v43 = vmax.f32 %v2169_v13, 0.0  ;;  %v2283_v18 = vmul.f32 %v5291_v50, %v5291_v50  ;;  %v2228_v28 = vadd.f32 %v2227_v55, %v5291_v50 }
 0x502   :  { %v2172_v42 = vpop.f32.mrf.mxu1  ;;  %v2322_v17 = vadd.f32 %v2321_v57, %v2282_v49 }
 0x503   :  { %v5305_v45 = vmax.f32 %v2171_v25, 0.0  ;;  %v2173_v22 = vadd.f32 %v2172_v42, %v5157_v16  ;;  %v2284_v34 = vmul.f32 %v5301_v43, %v5301_v43  ;;  %v2302_v33 = vadd.f32 %v2301_v56, %v2283_v18 }
 0x504   :  { %v2176_v27 = vpop.f32.mrf.mxu1  ;;  %v2249_v26 = vadd.f32 %v2248_v59, %v5301_v43 }
 0x505   :  { %v5314_v12 = vmax.f32 %v2173_v22, 0.0  ;;  %v2177_v53 = vadd.f32 %v2176_v27, %v5154_v48  ;;  %v2285_v4 = vmul.f32 %v5305_v45, %v5305_v45  ;;  %v2229_v52 = vadd.f32 %v2228_v28, %v5305_v45 }
 0x506   :  { %v2178_v37 = vpop.f32.mrf.mxu1  ;;  %v2323_v60 = vadd.f32 %v2322_v17, %v2284_v34 }
 0x507   :  { %v5323_v2 = vmax.f32 %v2177_v53, 0.0  ;;  %v2286_v13 = vmul.f32 %v5314_v12, %v5314_v12  ;;  %v2179_v35 = vadd.f32 %v2178_v37, %v5157_v16  ;;  %v2303_v8 = vadd.f32 %v2302_v33, %v2285_v4 }
 0x508   :  { %v2180_v15 = vpop.f32.mrf.mxu1  ;;  %v2250_v58 = vadd.f32 %v2249_v26, %v5314_v12 }
 0x509   :  { %v2287_v25 = vmul.f32 %v5323_v2, %v5323_v2  ;;  %v2181_v44 = vadd.f32 %v2180_v15, %v5154_v48  ;;  %v5333_v42 = vmax.f32 %v2179_v35, 0.0  ;;  %v2230_v22 = vadd.f32 %v2229_v52, %v5323_v2 }
 0x50a   :  { %v2182_v39 = vpop.f32.mrf.mxu1  ;;  %v2324_v49 = vadd.f32 %v2323_v60, %v2286_v13 }
 0x50b   :  { %v5337_v0 = vmax.f32 %v2181_v44, 0.0  ;;  %v2183_v61 = vadd.f32 %v2182_v39, %v5157_v16  ;;  %v2304_v18 = vadd.f32 %v2303_v8, %v2287_v25  ;;  %v2288_v27 = vmul.f32 %v5333_v42, %v5333_v42 }
 0x50c   :  { %v2251_v48 = vadd.f32 %v2250_v58, %v5333_v42 }
 0x50d   :  { %v2231_v31 = vadd.f32 %v2230_v22, %v5337_v0  ;;  %v2289_v55 = vmul.f32 %v5337_v0, %v5337_v0  ;;  %v5346_v53 = vmax.f32 %v2183_v61, 0.0  ;;  %v2325_v57 = vadd.f32 %v2324_v49, %v2288_v27 }
 0x50f   :  { %v2232_v56 = vrot.slane %v2231_v31, 4  ;;  %v2305_v34 = vadd.f32 %v2304_v18, %v2289_v55  ;;  %v2252_v4 = vadd.f32 %v2251_v48, %v5346_v53  ;;  %v2290_v16 = vmul.f32 %v5346_v53, %v5346_v53 }
 0x511   :  { %v2233_v37 = vadd.f32 %v2232_v56, %v2231_v31  ;;  %v2306_v59 = vrot.slane %v2305_v34, 4  ;;  %v2253_v28 = vrot.slane %v2252_v4, 4  ;;  %v2326_v17 = vadd.f32 %v2325_v57, %v2290_v16 }
 0x513   :  { %v2234_v33 = vrot.slane %v2233_v37, 2  ;;  %v2307_v13 = vadd.f32 %v2306_v59, %v2305_v34  ;;  %v2254_v35 = vadd.f32 %v2253_v28, %v2252_v4  ;;  %v2327_v15 = vrot.slane %v2326_v17, 4 }
 0x515   :  { %v2235_v26 = vadd.f32 %v2234_v33, %v2233_v37  ;;  %v2308_v52 = vrot.slane %v2307_v13, 2  ;;  %v2255_v25 = vrot.slane %v2254_v35, 2  ;;  %v2328_v44 = vadd.f32 %v2327_v15, %v2326_v17 }
 0x517   :  { %v2236_v60 = vrot.slane %v2235_v26, 1  ;;  %v2309_v8 = vadd.f32 %v2308_v52, %v2307_v13  ;;  %v2256_v39 = vadd.f32 %v2255_v25, %v2254_v35  ;;  %v2329_v58 = vrot.slane %v2328_v44, 2  ;;  %v2341_v52 = vld [vmem:[%s5842_s15] sm:$0x3] }
 0x519   :  { %v2237_v22 = vadd.f32 %v2236_v60, %v2235_v26  ;;  %v2310_v61 = vrot.slane %v2309_v8, 1  ;;  %v2257_v49 = vrot.slane %v2256_v39, 1  ;;  %v2330_v18 = vadd.f32 %v2329_v58, %v2328_v44 }
 0x51b   :  { %v2311_v27 = vadd.f32 %v2310_v61, %v2309_v8  ;;  %v2333_v48 = vmul.f32 0.0078125, %v2237_v22  ;;  %v2258_v31 = vadd.f32 %v2257_v49, %v2256_v39  ;;  %v2331_v55 = vrot.slane %v2330_v18, 1  ;;  %v2365_v49 = vld [vmem:[%s5843_s16] sm:$0x3] }
 0x51d   :  { %v2335_v57 = vmul.f32 0.0078125, %v2311_v27  ;;  %v2337_v56 = vmul.f32 %v2333_v48, %v2333_v48  ;;  %v2332_v34 = vadd.f32 %v2331_v55, %v2330_v18  ;;  %v2334_v4 = vmul.f32 0.0078125, %v2258_v31 }
 0x51f   :  { %v2339_v16 = vsub.f32 %v2335_v57, %v2337_v56  ;;  %v2336_v37 = vmul.f32 0.0078125, %v2332_v34  ;;  %v2338_v59 = vmul.f32 %v2334_v4, %v2334_v4 }
 0x521   :  { %v2342_v28 = vadd.f32 1e-05, %v2339_v16  ;;  %v2340_v17 = vsub.f32 %v2336_v37, %v2338_v59 }
 0x523   :  { %v2343_v33 = vadd.f32 1e-05, %v2340_v17  ;;  %3845 = vrsqrt.f32 %v2342_v28 }
 0x525   :  { %3847 = vrsqrt.f32 %v2343_v33 }
 0x530   :  { %v3846_v13 = vpop.eup %3845 }
 0x532   :  { %v3848_v35 = vpop.eup %3847 }
 0x533   :  { %v2348_v15 = vcombine.low %v3846_v13, %v3848_v35 }
 0x535   :  { %v2355_v26 = vrot.slane %v2348_v15, %v4386_v41 }
 0x537   :  { %v2362_v25 = vrot.slane %v2355_v26, %v4386_v41 }
 0x539   :  { %v2364_v44 = vmul.f32 %v2362_v25, %v2341_v52 }
 0x53b   :  { %v5357_v60 = vrot.slane %v2364_v44, %v4179_v6  ;;  %v5360_v8 = vrot.slane %v2364_v44, %v4185_v9 }
 0x53d   :  { %v2377_v39 = vmul.f32 %v5357_v60, %v2333_v48  ;;  %v2378_v58 = vmul.f32 %v5360_v8, %v2334_v4  ;;  %v2399_v31 = vmul.f32 %v5360_v8, %v5175_v19  ;;  %v2401_v55 = vmul.f32 %v5360_v8, %v5167_v20 }
 0x53e   :  { %v2426_v48 = vmul.f32 %v5357_v60, %v5323_v2  ;;  %v2428_v57 = vmul.f32 %v5357_v60, %v5337_v0  ;;  %v2398_v4 = vmul.f32 %v5357_v60, %v5170_v5  ;;  %v2400_v19 = vmul.f32 %v5357_v60, %v5164_v40 }
 0x53f   :  { %v2381_v22 = vcombine.low %v2377_v39, %v2378_v58  ;;  %v2403_v20 = vmul.f32 %v5360_v8, %v5179_v10  ;;  %v2405_v2 = vmul.f32 %v5360_v8, %v5191_v24  ;;  %v2402_v10 = vmul.f32 %v5357_v60, %v5172_v21 }
 0x540   :  { %v2404_v24 = vmul.f32 %v5357_v60, %v5185_v7  ;;  %v2407_v13 = vmul.f32 %v5360_v8, %v5203_v54  ;;  %v2409_v35 = vmul.f32 %v5360_v8, %v5216_v32  ;;  %v2423_v15 = vmul.f32 %v5360_v8, %v5301_v43 }
 0x541   :  { %v2388_v61 = vrot.slane %v2381_v22, %v4386_v41  ;;  %v2425_v26 = vmul.f32 %v5360_v8, %v5314_v12  ;;  %v2429_v52 = vmul.f32 %v5360_v8, %v5346_v53  ;;  %v2427_v25 = vmul.f32 %v5360_v8, %v5333_v42 }
 0x543   :  { %v2395_v18 = vrot.slane %v2388_v61, %v4386_v41 }
 0x545   :  { %v2397_v27 = vsub.f32 %v2365_v49, %v2395_v18  ;;  %v2406_v18 = vmul.f32 %v5357_v60, %v5201_v23 }
 0x547   :  { %v5378_v56 = vrot.slane %v2397_v27, %v4179_v6  ;;  %v5381_v34 = vrot.slane %v2397_v27, %v4185_v9  ;;  %v2408_v27 = vmul.f32 %v5357_v60, %v5213_v1  ;;  %v2410_v1 = vmul.f32 %v5357_v60, %v5225_v62 }
 0x549   :  { %v2442_v0 = vadd.f32 %v5381_v34, %v2399_v31  ;;  %v2444_v16 = vadd.f32 %v5381_v34, %v2401_v55  ;;  %v2441_v37 = vadd.f32 %v5378_v56, %v2398_v4  ;;  %v2443_v59 = vadd.f32 %v5378_v56, %v2400_v19 }
 0x54a   :  { %v2446_v28 = vadd.f32 %v5381_v34, %v2403_v20  ;;  %v2448_v5 = vadd.f32 %v5381_v34, %v2405_v2  ;;  %v2445_v21 = vadd.f32 %v5378_v56, %v2402_v10  ;;  %v2447_v7 = vadd.f32 %v5378_v56, %v2404_v24 }
 0x54b   :  { %v2474_v17 = vpack.c.bf16 %v2444_v16, %v2442_v0  ;;  %v2473_v40 = vpack.c.bf16 %v2443_v59, %v2441_v37  ;;  %v2450_v54 = vadd.f32 %v5381_v34, %v2407_v13  ;;  %v2452_v32 = vadd.f32 %v5381_v34, %v2409_v35 }
 0x54c   :  { %v2476_v33 = vpack.c.bf16 %v2448_v5, %v2446_v28  ;;  %v2466_v44 = vadd.f32 %v5381_v34, %v2423_v15  ;;  %v2468_v43 = vadd.f32 %v5381_v34, %v2425_v26  ;;  %v2470_v12 = vadd.f32 %v5381_v34, %v2427_v25  ;;  %v3824_v25 = vld [vmem:[%s5848_s21 + $0x20] sm:$0xff]  }
 0x54d   :  { %2725 = vmatprep.mubr.bf16.mxu0 %v2474_v17  ;;  %v2472_v53 = vadd.f32 %v5381_v34, %v2429_v52  ;;  %v2469_v58 = vadd.f32 %v5378_v56, %v2426_v48  ;;  %v2475_v22 = vpack.c.bf16 %v2447_v7, %v2445_v21  ;;  %v2471_v61 = vadd.f32 %v5378_v56, %v2428_v57  ;;  %v3822_v21 = vld [vmem:[%s5848_s21 + $0x28] sm:$0xff]   ;;  %v3823_v7 = vld [vmem:[%s5848_s21 + $0x60] sm:$0xff]  }
 0x54e   :  { %2726 = vmatmul.mubr.bf16.vlgmr.msra.gmra.mxu0 %v2473_v40  ;;  %v2486_v39 = vpack.c.bf16 %v2468_v43, %v2466_v44  ;;  %v2478_v49 = vpack.c.bf16 %v2452_v32, %v2450_v54  ;;  %v2411_v55 = vmul.f32 %v5360_v8, %v5235_v51  ;;  %v2413_v48 = vmul.f32 %v5360_v8, %v5244_v38  ;;  %v3825_v54 = vld [vmem:[%s5848_s21 + $0x58] sm:$0xff]   ;;  %v3827_v44 = vld [vmem:[%s5848_s21 + $0x50] sm:$0xff]  }
 0x54f   :  { %2735 = vmatprep.mubr.bf16.mxu0 %v2476_v33  ;;  %v2488_v42 = vpack.c.bf16 %v2472_v53, %v2470_v12  ;;  %v2487_v31 = vpack.c.bf16 %v2471_v61, %v2469_v58  ;;  %v2449_v4 = vadd.f32 %v5378_v56, %v2406_v18  ;;  %v2451_v57 = vadd.f32 %v5378_v56, %v2408_v27  ;;  %v3826_v32 = vld [vmem:[%s5848_s21 + $0x18] sm:$0xff]   ;;  %v3828_v43 = vld [vmem:[%s5848_s21 + $0x10] sm:$0xff]   ;;  %v3829_v12 = vld [vmem:[%s5848_s21 + $0x48] sm:$0xff]  }
 0x550   :  { %v2454_v19 = vadd.f32 %v5381_v34, %v2411_v55  ;;  %v2456_v20 = vadd.f32 %v5381_v34, %v2413_v48  ;;  %v2412_v51 = vmul.f32 %v5357_v60, %v5237_v14  ;;  %v2415_v38 = vmul.f32 %v5360_v8, %v5256_v30  ;;  %v3830_v58 = vld [vmem:[%s5848_s21 + $0x8] sm:$0xff]  }
 0x551   :  { %v2477_v23 = vpack.c.bf16 %v2451_v57, %v2449_v4  ;;  %v2417_v0 = vmul.f32 %v5360_v8, %v5267_v47  ;;  %v2453_v16 = vadd.f32 %v5378_v56, %v2410_v1  ;;  %v2414_v14 = vmul.f32 %v5357_v60, %v5246_v11  ;;  %v2521_v4 = vld [vmem:[%s5845_s18] sm:$0x3] }
 0x552   :  { %v2480_v2 = vpack.c.bf16 %v2456_v20, %v2454_v19  ;;  %v2455_v37 = vadd.f32 %v5378_v56, %v2412_v51  ;;  %v2458_v59 = vadd.f32 %v5381_v34, %v2415_v38  ;;  %v2416_v30 = vmul.f32 %v5357_v60, %v5259_v36 }
 0x553   :  { %v2460_v28 = vadd.f32 %v5381_v34, %v2417_v0  ;;  %v2419_v47 = vmul.f32 %v5360_v8, %v5280_v3  ;;  %v2421_v17 = vmul.f32 %v5360_v8, %v5289_v46  ;;  %v2457_v40 = vadd.f32 %v5378_v56, %v2414_v14 }
 0x554   :  { %v2479_v5 = vpack.c.bf16 %v2455_v37, %v2453_v16  ;;  %v2459_v33 = vadd.f32 %v5378_v56, %v2416_v30  ;;  %v2418_v36 = vmul.f32 %v5357_v60, %v5271_v29  ;;  %v2420_v3 = vmul.f32 %v5357_v60, %v5282_v63  ;;  %v3817_v63 = vld [vmem:[%s5848_s21 + $0x78] sm:$0xff]  }
 0x555   :  { %v2482_v62 = vpack.c.bf16 %v2460_v28, %v2458_v59  ;;  %v2462_v10 = vadd.f32 %v5381_v34, %v2419_v47  ;;  %v2464_v24 = vadd.f32 %v5381_v34, %v2421_v17  ;;  %v2422_v15 = vmul.f32 %v5357_v60, %v5291_v50  ;;  %v3818_v50 = vld [vmem:[%s5848_s21 + $0x38] sm:$0xff]   ;;  %3597 = vmatprep.subr.bf16.mxu1 %v3817_v63 }
 0x556   :  { %2736 = vmatmul.mubr.bf16.gmra.mxu0 %v2475_v22  ;;  %v2481_v13 = vpack.c.bf16 %v2459_v33, %v2457_v40  ;;  %v2461_v46 = vadd.f32 %v5378_v56, %v2418_v36  ;;  %v2463_v8 = vadd.f32 %v5378_v56, %v2420_v3  ;;  %v2424_v34 = vmul.f32 %v5357_v60, %v5305_v45  ;;  %v3819_v45 = vld [vmem:[%s5848_s21 + $0x70] sm:$0xff]   ;;  %v3831_v22 = vld [vmem:[%s5848_s21 + $0x40] sm:$0xff]  }
 0x557   :  { %2745 = vmatprep.mubr.bf16.mxu0 %v2478_v49  ;;  %v2484_v11 = vpack.c.bf16 %v2464_v24, %v2462_v10  ;;  %v2465_v26 = vadd.f32 %v5378_v56, %v2422_v15  ;;  %3533 = vmatprep.subr.bf16.mxu0 %v3817_v63  ;;  %v3820_v60 = vld [vmem:[%s5848_s21 + $0x30] sm:$0xff]   ;;  %v5523_v19 = vrot.slane %v2521_v4, %v4179_v6 }
 0x558   :  { %v2483_v35 = vpack.c.bf16 %v2463_v8, %v2461_v46  ;;  %v2467_v29 = vadd.f32 %v5378_v56, %v2424_v34  ;;  %3605 = vmatpush3.bf16.msra.mxu1 %v3818_v50  ;;  %3534 = vmatpush3.bf16.msra.mxu0 %v3818_v50  ;;  %v3821_v56 = vld [vmem:[%s5848_s21 + $0x68] sm:$0xff]  }
 0x559   :  { %3598 = vmatprep.subr.bf16.mxu1 %v3819_v45  ;;  %3535 = vmatprep.subr.bf16.mxu0 %v3819_v45 }
 0x55a   :  { %v2485_v52 = vpack.c.bf16 %v2467_v29, %v2465_v26 }
 0x55c   :  { %3606 = vmatpush3.bf16.msra.mxu1 %v3820_v60  ;;  %3536 = vmatpush3.bf16.msra.mxu0 %v3820_v60 }
 0x55d   :  { %3599 = vmatprep.subr.bf16.mxu1 %v3821_v56  ;;  %3537 = vmatprep.subr.bf16.mxu0 %v3821_v56 }
 0x55e   :  { %2746 = vmatmul.mubr.bf16.gmra.mxu0 %v2477_v23  ;;  %v5526_v23 = vrot.slane %v2521_v4, %v4185_v9 }
 0x55f   :  { %2755 = vmatprep.mubr.bf16.mxu0 %v2480_v2 }
 0x560   :  { %3607 = vmatpush3.bf16.msra.mxu1 %v3822_v21  ;;  %3538 = vmatpush3.bf16.msra.mxu0 %v3822_v21 }
 0x561   :  { %3600 = vmatprep.subr.bf16.mxu1 %v3823_v7  ;;  %3539 = vmatprep.subr.bf16.mxu0 %v3823_v7 }
 0x564   :  { %3608 = vmatpush3.bf16.msra.mxu1 %v3824_v25  ;;  %3540 = vmatpush3.bf16.msra.mxu0 %v3824_v25 }
 0x565   :  { %3601 = vmatprep.subr.bf16.mxu1 %v3825_v54  ;;  %3541 = vmatprep.subr.bf16.mxu0 %v3825_v54 }
 0x566   :  { %2756 = vmatmul.mubr.bf16.gmra.mxu0 %v2479_v5 }
 0x567   :  { %2765 = vmatprep.mubr.bf16.mxu0 %v2482_v62 }
 0x568   :  { %3609 = vmatpush3.bf16.msra.mxu1 %v3826_v32  ;;  %3542 = vmatpush3.bf16.msra.mxu0 %v3826_v32 }
 0x569   :  { %3602 = vmatprep.subr.bf16.mxu1 %v3827_v44  ;;  %3543 = vmatprep.subr.bf16.mxu0 %v3827_v44 }
 0x56c   :  { %3610 = vmatpush3.bf16.msra.mxu1 %v3828_v43  ;;  %3544 = vmatpush3.bf16.msra.mxu0 %v3828_v43 }
 0x56d   :  { %3603 = vmatprep.subr.bf16.mxu1 %v3829_v12  ;;  %3545 = vmatprep.subr.bf16.mxu0 %v3829_v12 }
 0x56e   :  { %2766 = vmatmul.mubr.bf16.gmra.mxu0 %v2481_v13 }
 0x56f   :  { %2775 = vmatprep.mubr.bf16.mxu0 %v2484_v11 }
 0x570   :  { %3611 = vmatpush3.bf16.msra.mxu1 %v3830_v58  ;;  %3546 = vmatpush3.bf16.msra.mxu0 %v3830_v58 }
 0x571   :  { %3604 = vmatprep.subr.bf16.mxu1 %v3831_v22  ;;  %3547 = vmatprep.subr.bf16.mxu0 %v3831_v22 }
 0x576   :  { %2776 = vmatmul.mubr.bf16.gmra.mxu0 %v2483_v35 }
 0x577   :  { %2785 = vmatprep.mubr.bf16.mxu0 %v2486_v39 }
 0x57e   :  { %2786 = vmatmul.mubr.bf16.gmra.mxu0 %v2485_v52 }
 0x57f   :  { %2795 = vmatprep.mubr.bf16.mxu0 %v2488_v42  ;;  %v3832_v42 = vld [vmem:[%s5848_s21] sm:$0xff]  }
 0x580   :  { %3612 = vmatpush3.bf16.msra.mxu1 %v3832_v42  ;;  %3548 = vmatpush3.bf16.msra.mxu0 %v3832_v42 }
 0x586   :  { %2796 = vmatmul.mubr.bf16.gmra.mxu0 %v2487_v31 }
 0x60e   :  { %v2727_v39 = vpop.f32.mrf.mxu0 }
 0x60f   :  { %v2728_v38 = vadd.f32 %v2727_v39, %v5523_v19 }
 0x610   :  { %v2729_v53 = vpop.f32.mrf.mxu0 }
 0x611   :  { %v2730_v37 = vadd.f32 %v2729_v53, %v5526_v23  ;;  %v5539_v30 = vmax.f32 %v2728_v38, 0.0 }
 0x612   :  { %v2731_v61 = vpop.f32.mrf.mxu0 }
 0x613   :  { %v2732_v2 = vadd.f32 %v2731_v61, %v5523_v19  ;;  %v5544_v33 = vmax.f32 %v2730_v37, 0.0  ;;  %v2880_v8 = vmul.f32 %v5539_v30, %v5539_v30 }
 0x614   :  { %v2733_v49 = vpop.f32.mrf.mxu0 }
 0x615   :  { %v2734_v51 = vadd.f32 %v2733_v49, %v5526_v23  ;;  %v5533_v59 = vmax.f32 %v2732_v2, 0.0  ;;  %v2881_v29 = vmul.f32 %v5544_v33, %v5544_v33 }
 0x616   :  { %v2737_v18 = vpop.f32.mrf.mxu0 }
 0x617   :  { %v2738_v0 = vadd.f32 %v2737_v18, %v5523_v19  ;;  %v5536_v62 = vmax.f32 %v2734_v51, 0.0  ;;  %v2882_v10 = vmul.f32 %v5533_v59, %v5533_v59  ;;  %v2838_v52 = vadd.f32 %v5533_v59, %v5539_v30 }
 0x618   :  { %v2739_v27 = vpop.f32.mrf.mxu0 }
 0x619   :  { %v2740_v28 = vadd.f32 %v2739_v27, %v5526_v23  ;;  %v5541_v47 = vmax.f32 %v2738_v0, 0.0  ;;  %v2883_v3 = vmul.f32 %v5536_v62, %v5536_v62  ;;  %v2912_v50 = vadd.f32 %v2882_v10, %v2880_v8 }
 0x61a   :  { %v2741_v31 = vpop.f32.mrf.mxu0  ;;  %v2859_v7 = vadd.f32 %v5536_v62, %v5544_v33 }
 0x61b   :  { %v2742_v14 = vadd.f32 %v2741_v31, %v5523_v19  ;;  %v5548_v24 = vmax.f32 %v2740_v28, 0.0  ;;  %v2884_v35 = vmul.f32 %v5541_v47, %v5541_v47  ;;  %v2933_v25 = vadd.f32 %v2883_v3, %v2881_v29 }
 0x61c   :  { %v2743_v55 = vpop.f32.mrf.mxu0  ;;  %v2839_v44 = vadd.f32 %v2838_v52, %v5541_v47 }
 0x61d   :  { %v2744_v17 = vadd.f32 %v2743_v55, %v5526_v23  ;;  %v5554_v46 = vmax.f32 %v2742_v14, 0.0  ;;  %v2885_v45 = vmul.f32 %v5548_v24, %v5548_v24  ;;  %v2913_v43 = vadd.f32 %v2912_v50, %v2884_v35 }
 0x61e   :  { %v2747_v48 = vpop.f32.mrf.mxu0  ;;  %v2860_v58 = vadd.f32 %v2859_v7, %v5548_v24 }
 0x61f   :  { %v2748_v13 = vadd.f32 %v2747_v48, %v5523_v19  ;;  %v5560_v15 = vmax.f32 %v2744_v17, 0.0  ;;  %v2886_v54 = vmul.f32 %v5554_v46, %v5554_v46  ;;  %v2934_v42 = vadd.f32 %v2933_v25, %v2885_v45 }
 0x620   :  { %v2749_v57 = vpop.f32.mrf.mxu0  ;;  %v2840_v18 = vadd.f32 %v2839_v44, %v5554_v46 }
 0x621   :  { %v2750_v11 = vadd.f32 %v2749_v57, %v5526_v23  ;;  %v5570_v60 = vmax.f32 %v2748_v13, 0.0  ;;  %v2887_v12 = vmul.f32 %v5560_v15, %v5560_v15  ;;  %v2914_v48 = vadd.f32 %v2913_v43, %v2886_v54 }
 0x622   :  { %v2751_v20 = vpop.f32.mrf.mxu0  ;;  %v2861_v2 = vadd.f32 %v2860_v58, %v5560_v15 }
 0x623   :  { %v2752_v34 = vadd.f32 %v2751_v20, %v5523_v19  ;;  %v5572_v56 = vmax.f32 %v2750_v11, 0.0  ;;  %v2888_v27 = vmul.f32 %v5570_v60, %v5570_v60  ;;  %v2841_v51 = vadd.f32 %v2840_v18, %v5570_v60 }
 0x624   :  { %v2753_v1 = vpop.f32.mrf.mxu0 }
 0x625   :  { %v2754_v63 = vadd.f32 %v2753_v1, %v5526_v23  ;;  %v5582_v39 = vmax.f32 %v2752_v34, 0.0  ;;  %v2889_v31 = vmul.f32 %v5572_v56, %v5572_v56  ;;  %v2935_v1 = vadd.f32 %v2934_v42, %v2887_v12 }
 0x626   :  { %v2757_v16 = vpop.f32.mrf.mxu0  ;;  %v2915_v14 = vadd.f32 %v2914_v48, %v2888_v27  ;;  %v2862_v17 = vadd.f32 %v2861_v2, %v5572_v56 }
 0x627   :  { %v2758_v32 = vadd.f32 %v2757_v16, %v5523_v19  ;;  %v5585_v22 = vmax.f32 %v2754_v63, 0.0  ;;  %v2890_v38 = vmul.f32 %v5582_v39, %v5582_v39  ;;  %v2842_v35 = vadd.f32 %v2841_v51, %v5582_v39 }
 0x628   :  { %v2759_v5 = vpop.f32.mrf.mxu0 }
 0x629   :  { %v2760_v61 = vadd.f32 %v2759_v5, %v5526_v23  ;;  %v5594_v4 = vmax.f32 %v2758_v32, 0.0  ;;  %v2891_v16 = vmul.f32 %v5585_v22, %v5585_v22  ;;  %v2916_v34 = vadd.f32 %v2915_v14, %v2890_v38 }
 0x62a   :  { %v2761_v40 = vpop.f32.mrf.mxu0 }
 0x62b   :  { %v2762_v49 = vadd.f32 %v2761_v40, %v5523_v19  ;;  %v5604_v37 = vmax.f32 %v2760_v61, 0.0  ;;  %v2936_v40 = vadd.f32 %v2935_v1, %v2889_v31  ;;  %v2892_v11 = vmul.f32 %v5594_v4, %v5594_v4 }
 0x62c   :  { %v2763_v36 = vpop.f32.mrf.mxu0  ;;  %v2843_v7 = vadd.f32 %v2842_v35, %v5594_v4 }
 0x62d   :  { %v2764_v57 = vadd.f32 %v2763_v36, %v5526_v23  ;;  %v5606_v28 = vmax.f32 %v2762_v49, 0.0  ;;  %v2937_v63 = vadd.f32 %v2936_v40, %v2891_v16  ;;  %v2893_v50 = vmul.f32 %v5604_v37, %v5604_v37 }
 0x62e   :  { %v2767_v26 = vpop.f32.mrf.mxu0  ;;  %v2917_v43 = vadd.f32 %v2916_v34, %v2892_v11 }
 0x62f   :  { %v2768_v20 = vadd.f32 %v2767_v26, %v5523_v19  ;;  %v5613_v36 = vmax.f32 %v2764_v57, 0.0  ;;  %v2863_v26 = vadd.f32 %v2862_v17, %v5585_v22  ;;  %v2894_v45 = vmul.f32 %v5606_v28, %v5606_v28 }
 0x630   :  { %v2769_v21 = vpop.f32.mrf.mxu0  ;;  %v2844_v49 = vadd.f32 %v2843_v7, %v5606_v28  ;;  %v2938_v31 = vadd.f32 %v2937_v63, %v2893_v50 }
 0x631   :  { %v2770_v5 = vadd.f32 %v2769_v21, %v5526_v23  ;;  %v5615_v3 = vmax.f32 %v2768_v20, 0.0  ;;  %v2895_v12 = vmul.f32 %v5613_v36, %v5613_v36  ;;  %v2864_v61 = vadd.f32 %v2863_v26, %v5604_v37 }
 0x632   :  { %v2771_v53 = vpop.f32.mrf.mxu0 }
 0x633   :  { %v2772_v10 = vadd.f32 %v2771_v53, %v5523_v19  ;;  %v5625_v21 = vmax.f32 %v2770_v5, 0.0  ;;  %v2896_v53 = vmul.f32 %v5615_v3, %v5615_v3  ;;  %v2865_v20 = vadd.f32 %v2864_v61, %v5613_v36 }
 0x634   :  { %v2773_v55 = vpop.f32.mrf.mxu0  ;;  %v2845_v16 = vadd.f32 %v2844_v49, %v5615_v3 }
 0x635   :  { %v2774_v8 = vadd.f32 %v2773_v55, %v5526_v23  ;;  %v5628_v25 = vmax.f32 %v2772_v10, 0.0  ;;  %v2918_v55 = vadd.f32 %v2917_v43, %v2894_v45  ;;  %v2897_v48 = vmul.f32 %v5625_v21, %v5625_v21 }
 0x636   :  { %v2777_v0 = vpop.f32.mrf.mxu0 }
 0x637   :  { %v2778_v29 = vadd.f32 %v2777_v0, %v5523_v19  ;;  %v5636_v58 = vmax.f32 %v2774_v8, 0.0  ;;  %v2898_v2 = vmul.f32 %v5628_v25, %v5628_v25  ;;  %v2939_v0 = vadd.f32 %v2938_v31, %v2895_v12 }
 0x638   :  { %v2779_v13 = vpop.f32.mrf.mxu0  ;;  %v2919_v5 = vadd.f32 %v2918_v55, %v2896_v53  ;;  %v2866_v8 = vadd.f32 %v2865_v20, %v5625_v21  ;;  %v2846_v34 = vadd.f32 %v2845_v16, %v5628_v25 }
 0x639   :  { %v2780_v54 = vadd.f32 %v2779_v13, %v5526_v23  ;;  %v5640_v42 = vmax.f32 %v2778_v29, 0.0  ;;  %v2899_v14 = vmul.f32 %v5636_v58, %v5636_v58  ;;  %v2940_v35 = vadd.f32 %v2939_v0, %v2897_v48 }
 0x63a   :  { %v2781_v52 = vpop.f32.mrf.mxu0  ;;  %v2920_v29 = vadd.f32 %v2919_v5, %v2898_v2  ;;  %v2867_v7 = vadd.f32 %v2866_v8, %v5636_v58 }
 0x63b   :  { %v2782_v32 = vadd.f32 %v2781_v52, %v5523_v19  ;;  %v5649_v1 = vmax.f32 %v2780_v54, 0.0  ;;  %v2900_v17 = vmul.f32 %v5640_v42, %v5640_v42  ;;  %v2847_v54 = vadd.f32 %v2846_v34, %v5640_v42 }
 0x63c   :  { %v2783_v44 = vpop.f32.mrf.mxu0  ;;  %v2941_v43 = vadd.f32 %v2940_v35, %v2899_v14 }
 0x63d   :  { %v2784_v18 = vadd.f32 %v2783_v44, %v5526_v23  ;;  %v5651_v51 = vmax.f32 %v2782_v32, 0.0  ;;  %v2901_v52 = vmul.f32 %v5649_v1, %v5649_v1  ;;  %v2921_v12 = vadd.f32 %v2920_v29, %v2900_v17 }
 0x63e   :  { %v2787_v27 = vpop.f32.mrf.mxu0 }
 0x63f   :  { %v2788_v57 = vadd.f32 %v2787_v27, %v5523_v19  ;;  %v5658_v40 = vmax.f32 %v2784_v18, 0.0  ;;  %v2902_v63 = vmul.f32 %v5651_v51, %v5651_v51  ;;  %v2868_v18 = vadd.f32 %v2867_v7, %v5649_v1 }
 0x640   :  { %v2789_v38 = vpop.f32.mrf.mxu0  ;;  %v2848_v27 = vadd.f32 %v2847_v54, %v5651_v51  ;;  %v2942_v48 = vadd.f32 %v2941_v43, %v2901_v52 }
 0x641   :  { %v5660_v10 = vmax.f32 %v2788_v57, 0.0  ;;  %v2790_v13 = vadd.f32 %v2789_v38, %v5526_v23  ;;  %v2903_v53 = vmul.f32 %v5658_v40, %v5658_v40  ;;  %v2922_v57 = vadd.f32 %v2921_v12, %v2902_v63 }
 0x642   :  { %v2791_v11 = vpop.f32.mrf.mxu0  ;;  %v2869_v0 = vadd.f32 %v2868_v18, %v5658_v40 }
 0x643   :  { %v2792_v26 = vadd.f32 %v2791_v11, %v5523_v19  ;;  %v5670_v50 = vmax.f32 %v2790_v13, 0.0  ;;  %v2904_v61 = vmul.f32 %v5660_v10, %v5660_v10  ;;  %v2849_v16 = vadd.f32 %v2848_v27, %v5660_v10 }
 0x644   :  { %v2793_v45 = vpop.f32.mrf.mxu0  ;;  %v2943_v14 = vadd.f32 %v2942_v48, %v2903_v53 }
 0x645   :  { %v5674_v32 = vmax.f32 %v2792_v26, 0.0  ;;  %v2794_v44 = vadd.f32 %v2793_v45, %v5526_v23  ;;  %v2905_v20 = vmul.f32 %v5670_v50, %v5670_v50  ;;  %v2923_v17 = vadd.f32 %v2922_v57, %v2904_v61 }
 0x646   :  { %v2797_v49 = vpop.f32.mrf.mxu0  ;;  %v2870_v35 = vadd.f32 %v2869_v0, %v5670_v50 }
 0x647   :  { %v5683_v31 = vmax.f32 %v2794_v44, 0.0  ;;  %v2798_v55 = vadd.f32 %v2797_v49, %v5523_v19  ;;  %v2906_v2 = vmul.f32 %v5674_v32, %v5674_v32  ;;  %v2850_v34 = vadd.f32 %v2849_v16, %v5674_v32 }
 0x648   :  { %v2799_v38 = vpop.f32.mrf.mxu0  ;;  %v2944_v52 = vadd.f32 %v2943_v14, %v2905_v20 }
 0x649   :  { %v5692_v5 = vmax.f32 %v2798_v55, 0.0  ;;  %v2907_v13 = vmul.f32 %v5683_v31, %v5683_v31  ;;  %v2800_v11 = vadd.f32 %v2799_v38, %v5526_v23  ;;  %v2924_v63 = vadd.f32 %v2923_v17, %v2906_v2 }
 0x64a   :  { %v2801_v8 = vpop.f32.mrf.mxu0  ;;  %v2871_v54 = vadd.f32 %v2870_v35, %v5683_v31 }
 0x64b   :  { %v2908_v26 = vmul.f32 %v5692_v5, %v5692_v5  ;;  %v2802_v29 = vadd.f32 %v2801_v8, %v5523_v19  ;;  %v5702_v45 = vmax.f32 %v2800_v11, 0.0  ;;  %v2851_v44 = vadd.f32 %v2850_v34, %v5692_v5 }
 0x64c   :  { %v2803_v7 = vpop.f32.mrf.mxu0  ;;  %v2945_v53 = vadd.f32 %v2944_v52, %v2907_v13 }
 0x64d   :  { %v5706_v43 = vmax.f32 %v2802_v29, 0.0  ;;  %v2804_v12 = vadd.f32 %v2803_v7, %v5526_v23  ;;  %v2925_v61 = vadd.f32 %v2924_v63, %v2908_v26  ;;  %v2909_v49 = vmul.f32 %v5702_v45, %v5702_v45 }
 0x64e   :  { %v2872_v19 = vadd.f32 %v2871_v54, %v5702_v45 }
 0x64f   :  { %v2852_v18 = vadd.f32 %v2851_v44, %v5706_v43  ;;  %v2910_v27 = vmul.f32 %v5706_v43, %v5706_v43  ;;  %v2837_v55 = vmax.f32 %v2804_v12, 0.0  ;;  %v2946_v48 = vadd.f32 %v2945_v53, %v2909_v49 }
 0x651   :  { %v2853_v57 = vrot.slane %v2852_v18, 4  ;;  %v2926_v20 = vadd.f32 %v2925_v61, %v2910_v27  ;;  %v2873_v2 = vadd.f32 %v2872_v19, %v2837_v55  ;;  %v2911_v38 = vmul.f32 %v2837_v55, %v2837_v55 }
 0x653   :  { %v2854_v0 = vadd.f32 %v2853_v57, %v2852_v18  ;;  %v2927_v23 = vrot.slane %v2926_v20, 4  ;;  %v2874_v16 = vrot.slane %v2873_v2, 4  ;;  %v2947_v14 = vadd.f32 %v2946_v48, %v2911_v38 }
 0x655   :  { %v2855_v17 = vrot.slane %v2854_v0, 2  ;;  %v2928_v13 = vadd.f32 %v2927_v23, %v2926_v20  ;;  %v2875_v11 = vadd.f32 %v2874_v16, %v2873_v2  ;;  %v2948_v8 = vrot.slane %v2947_v14, 4 }
 0x657   :  { %v2856_v35 = vadd.f32 %v2855_v17, %v2854_v0  ;;  %v2929_v34 = vrot.slane %v2928_v13, 2  ;;  %v2876_v26 = vrot.slane %v2875_v11, 2  ;;  %v2949_v29 = vadd.f32 %v2948_v8, %v2947_v14 }
 0x659   :  { %v2857_v52 = vrot.slane %v2856_v35, 1  ;;  %v2930_v63 = vadd.f32 %v2929_v34, %v2928_v13  ;;  %v2877_v7 = vadd.f32 %v2876_v26, %v2875_v11  ;;  %v2950_v54 = vrot.slane %v2949_v29, 2  ;;  %v2962_v34 = vld [vmem:[%s5846_s19] sm:$0x3] }
 0x65b   :  { %v2858_v44 = vadd.f32 %v2857_v52, %v2856_v35  ;;  %v2931_v12 = vrot.slane %v2930_v63, 1  ;;  %v2878_v53 = vrot.slane %v2877_v7, 1  ;;  %v2951_v61 = vadd.f32 %v2950_v54, %v2949_v29 }
 0x65d   :  { %v2932_v49 = vadd.f32 %v2931_v12, %v2930_v63  ;;  %v2954_v19 = vmul.f32 0.0078125, %v2858_v44  ;;  %v2879_v18 = vadd.f32 %v2878_v53, %v2877_v7  ;;  %v2952_v27 = vrot.slane %v2951_v61, 1  ;;  %v2986_v53 = vld [vmem:[%s5847_s20] sm:$0x3] }
 0x65f   :  { %v2956_v48 = vmul.f32 0.0078125, %v2932_v49  ;;  %v2958_v57 = vmul.f32 %v2954_v19, %v2954_v19  ;;  %v2953_v20 = vadd.f32 %v2952_v27, %v2951_v61  ;;  %v2955_v2 = vmul.f32 0.0078125, %v2879_v18 }
 0x661   :  { %v2960_v38 = vsub.f32 %v2956_v48, %v2958_v57  ;;  %v2957_v0 = vmul.f32 0.0078125, %v2953_v20  ;;  %v2959_v23 = vmul.f32 %v2955_v2, %v2955_v2 }
 0x663   :  { %v2963_v16 = vadd.f32 1e-05, %v2960_v38  ;;  %v2961_v14 = vsub.f32 %v2957_v0, %v2959_v23 }
 0x665   :  { %v2964_v17 = vadd.f32 1e-05, %v2961_v14  ;;  %3849 = vrsqrt.f32 %v2963_v16 }
 0x667   :  { %3851 = vrsqrt.f32 %v2964_v17 }
 0x672   :  { %v3850_v13 = vpop.eup %3849 }
 0x674   :  { %v3852_v11 = vpop.eup %3851 }
 0x675   :  { %v2969_v8 = vcombine.low %v3850_v13, %v3852_v11 }
 0x677   :  { %v2976_v35 = vrot.slane %v2969_v8, %v4386_v41 }
 0x679   :  { %v2983_v26 = vrot.slane %v2976_v35, %v4386_v41 }
 0x67b   :  { %v2985_v29 = vmul.f32 %v2983_v26, %v2962_v34 }
 0x67d   :  { %v5721_v52 = vrot.slane %v2985_v29, %v4179_v6  ;;  %v2995_v63 = vrot.slane %v2985_v29, %v4185_v9 }
 0x67f   :  { %v2998_v7 = vmul.f32 %v5721_v52, %v2954_v19  ;;  %v2999_v54 = vmul.f32 %v2995_v63, %v2955_v2  ;;  %v5730_v49 = vmul.f32 %v2995_v63, %v2837_v55  ;;  %v3020_v18 = vmul.f32 %v2995_v63, %v5544_v33 }
 0x680   :  { %v3022_v27 = vmul.f32 %v2995_v63, %v5536_v62  ;;  %v3032_v48 = vmul.f32 %v2995_v63, %v5604_v37  ;;  %v3034_v19 = vmul.f32 %v2995_v63, %v5613_v36  ;;  %v3019_v20 = vmul.f32 %v5721_v52, %v5539_v30 }
 0x681   :  { %v3002_v44 = vcombine.low %v2998_v7, %v2999_v54  ;;  %v3021_v2 = vmul.f32 %v5721_v52, %v5533_v59  ;;  %v3033_v55 = vmul.f32 %v5721_v52, %v5606_v28  ;;  %v3024_v33 = vmul.f32 %v2995_v63, %v5548_v24 }
 0x682   :  { %v3026_v62 = vmul.f32 %v2995_v63, %v5560_v15  ;;  %v3036_v30 = vmul.f32 %v2995_v63, %v5625_v21  ;;  %v3038_v38 = vmul.f32 %v2995_v63, %v5636_v58  ;;  %v3023_v59 = vmul.f32 %v5721_v52, %v5541_v47 }
 0x683   :  { %v3009_v12 = vrot.slane %v3002_v44, %v4386_v41  ;;  %v3035_v24 = vmul.f32 %v5721_v52, %v5615_v3  ;;  %v3037_v15 = vmul.f32 %v5721_v52, %v5628_v25  ;;  %v3028_v35 = vmul.f32 %v2995_v63, %v5572_v56 }
 0x684   :  { %v3030_v34 = vmul.f32 %v2995_v63, %v5585_v22  ;;  %v3040_v29 = vmul.f32 %v2995_v63, %v5649_v1  ;;  %v3042_v7 = vmul.f32 %v2995_v63, %v5658_v40 }
 0x685   :  { %v3016_v61 = vrot.slane %v3009_v12, %v4386_v41  ;;  %v3031_v41 = vmul.f32 %v5721_v52, %v5594_v4  ;;  %v3025_v4 = vmul.f32 %v5721_v52, %v5554_v46  ;;  %v3044_v12 = vmul.f32 %v2995_v63, %v5670_v50 }
 0x686   :  { %v3049_v50 = vmul.f32 %v5721_v52, %v5706_v43  ;;  %v3041_v43 = vmul.f32 %v5721_v52, %v5651_v51  ;;  %v3045_v51 = vmul.f32 %v5721_v52, %v5674_v32 }
 0x687   :  { %v3018_v57 = vsub.f32 %v2986_v53, %v3016_v61  ;;  %v3046_v53 = vmul.f32 %v2995_v63, %v5683_v31 }
 0x689   :  { %v5747_v37 = vrot.slane %v3018_v57, %v4179_v6  ;;  %v3059_v36 = vrot.slane %v3018_v57, %v4185_v9 }
 0x68b   :  { %v3063_v6 = vadd.f32 %v3059_v36, %v3020_v18  ;;  %v3065_v28 = vadd.f32 %v3059_v36, %v3022_v27  ;;  %v3075_v0 = vadd.f32 %v3059_v36, %v3032_v48  ;;  %v3077_v9 = vadd.f32 %v3059_v36, %v3034_v19 }
 0x68c   :  { %v3062_v21 = vadd.f32 %v5747_v37, %v3019_v20  ;;  %v3064_v58 = vadd.f32 %v5747_v37, %v3021_v2  ;;  %v3074_v23 = vadd.f32 %v5747_v37, %v3031_v41  ;;  %v3076_v47 = vadd.f32 %v5747_v37, %v3033_v55 }
 0x68d   :  { %v3095_v16 = vpack.c.bf16 %v3065_v28, %v3063_v6  ;;  %v3101_v46 = vpack.c.bf16 %v3077_v9, %v3075_v0  ;;  %v3067_v14 = vadd.f32 %v3059_v36, %v3024_v33  ;;  %v3069_v17 = vadd.f32 %v3059_v36, %v3026_v62 }
 0x68e   :  { %v3094_v3 = vpack.c.bf16 %v3064_v58, %v3062_v21  ;;  %v3100_v13 = vpack.c.bf16 %v3076_v47, %v3074_v23  ;;  %v3079_v11 = vadd.f32 %v3059_v36, %v3036_v30  ;;  %v3081_v25 = vadd.f32 %v3059_v36, %v3038_v38  ;;  %v5803_v58 = vld [vmem:[%s5849_s22] ss:$0 sm:$0xff]  ;;  %s3969_s22 = smov [#allocation10]  }
 0x68f   :  { %3277 = vmatprep.mubr.bf16.mxu0 %v3095_v16  ;;  %3301 = vmatprep.mubr.bf16.mxu1 %v3101_v46  ;;  %v3097_v8 = vpack.c.bf16 %v3069_v17, %v3067_v14  ;;  %v3066_v54 = vadd.f32 %v5747_v37, %v3023_v59  ;;  %v3068_v44 = vadd.f32 %v5747_v37, %v3025_v4  ;;  %s3363_s10 = sshll.u32 %s3969_s22, 4  ;;  %s3364_s10 = int_to_ptr.vmem [resolvable:$true] %s3363_s10 }
 0x690   :  { %3278 = vmatmul.mubr.bf16.vlgmr.msra.gmra.mxu0 %v3094_v3  ;;  %3302 = vmatmul.mubr.bf16.vlgmr.msra.gmra.mxu1 %v3100_v13  ;;  %v3103_v26 = vpack.c.bf16 %v3081_v25, %v3079_v11  ;;  %v3078_v56 = vadd.f32 %v5747_v37, %v3035_v24  ;;  %v3080_v22 = vadd.f32 %v5747_v37, %v3037_v15  ;;  %s3933_s24 = scalar_lea.vmem %s3364_s10, 2048  ;;  %p3938_p7 = scmp.lt.s32.totalorder %s3364_s10, %s3364_s10 }
 0x691   :  { %3285 = vmatprep.mubr.bf16.mxu0 %v3097_v8  ;;  %v3071_v61 = vadd.f32 %v3059_v36, %v3028_v35  ;;  %v3048_v18 = vmul.f32 %v2995_v63, %v5702_v45  ;;  %v3073_v1 = vadd.f32 %v3059_v36, %v3030_v34  ;;  %v3083_v27 = vadd.f32 %v3059_v36, %v3040_v29  ;;  %p3934_p6 = scmp.ne.s32.totalorder %s3364_s10, %s3933_s24  ;;  %p3939_p8 = scmp.lt.s32.totalorder %s3933_s24, %s3933_s24 }
 0x692   :  { %3309 = vmatprep.mubr.bf16.mxu1 %v3103_v26  ;;  %v3085_v40 = vadd.f32 %v3059_v36, %v3042_v7  ;;  %v3087_v48 = vadd.f32 %v3059_v36, %v3044_v12  ;;  %v3089_v57 = vadd.f32 %v3059_v36, %v3046_v53  ;;  %v3047_v19 = vmul.f32 %v5721_v52, %v5692_v5 }
 0x693   :  { %v3096_v31 = vpack.c.bf16 %v3068_v44, %v3066_v54  ;;  %v3027_v20 = vmul.f32 %v5721_v52, %v5570_v60  ;;  %v3091_v2 = vadd.f32 %v3059_v36, %v3048_v18  ;;  %v3093_v41 = vadd.f32 %v3059_v36, %v5730_v49  ;;  %p3940_p9 = por %p3939_p8, %p3938_p7 }
 0x694   :  { %v3102_v55 = vpack.c.bf16 %v3080_v22, %v3078_v56  ;;  %v3107_v45 = vpack.c.bf16 %v3089_v57, %v3087_v48  ;;  %v3090_v63 = vadd.f32 %v5747_v37, %v3047_v19  ;;  %v3092_v33 = vadd.f32 %v5747_v37, %v3049_v50 }
 0x695   :  { %v3099_v62 = vpack.c.bf16 %v3073_v1, %v3071_v61  ;;  %v3105_v30 = vpack.c.bf16 %v3085_v40, %v3083_v27  ;;  %v3029_v5 = vmul.f32 %v5721_v52, %v5582_v39  ;;  %v3109_v38 = vpack.c.bf16 %v3093_v41, %v3091_v2  ;;  %p3941_p10 = pnand %p3940_p9, %p3934_p6 }
 0x696   :  { %v3039_v60 = vmul.f32 %v5721_v52, %v5640_v42  ;;  %v3108_v49 = vpack.c.bf16 %v3092_v33, %v3090_v63  ;;  %v3070_v36 = vadd.f32 %v5747_v37, %v3027_v20  ;;  %v3084_v39 = vadd.f32 %v5747_v37, %v3041_v43 }
 0x697   :  { %v3072_v59 = vadd.f32 %v5747_v37, %v3029_v5  ;;  %v3043_v42 = vmul.f32 %v5721_v52, %v5660_v10  ;;  %v3088_v28 = vadd.f32 %v5747_v37, %v3045_v51 }
 0x698   :  { %3286 = vmatmul.mubr.bf16.gmra.mxu0 %v3096_v31  ;;  %3310 = vmatmul.mubr.bf16.gmra.mxu1 %v3102_v55  ;;  %v3082_v4 = vadd.f32 %v5747_v37, %v3039_v60 }
 0x699   :  { %3293 = vmatprep.mubr.bf16.mxu0 %v3099_v62  ;;  %3317 = vmatprep.mubr.bf16.mxu1 %v3105_v30  ;;  %v3098_v24 = vpack.c.bf16 %v3072_v59, %v3070_v36  ;;  %v3086_v6 = vadd.f32 %v5747_v37, %v3043_v42 }
 0x69a   :  { %v3104_v15 = vpack.c.bf16 %v3084_v39, %v3082_v4 }
 0x69b   :  { %v3106_v0 = vpack.c.bf16 %v3088_v28, %v3086_v6 }
 0x6a0   :  { %3294 = vmatmul.mubr.bf16.gmra.mxu0 %v3098_v24  ;;  %3318 = vmatmul.mubr.bf16.gmra.mxu1 %v3104_v15 }
 0x6a1   :  { %3325 = vmatprep.mubr.bf16.mxu1 %v3107_v45 }
 0x6a8   :  { %3326 = vmatmul.mubr.bf16.gmra.mxu1 %v3106_v0 }
 0x6a9   :  { %3333 = vmatprep.mubr.bf16.mxu1 %v3109_v38 }
 0x6b0   :  { %3334 = vmatmul.mubr.bf16.gmra.mxu1 %v3108_v49 }
 0x750   :  { %v3549_v9 = vpop.f32.mrf.mxu0  ;;  %v3567_v21 = vpop.f32.mrf.mxu1 }
 0x752   :  { %v3550_v10 = vpop.f32.mrf.mxu0  ;;  %v3568_v23 = vpop.f32.mrf.mxu1 }
 0x753   :  { %v3551_v47 = vadd.f32 %v3550_v10, %v3549_v9  ;;  %v3569_v32 = vadd.f32 %v3568_v23, %v3567_v21 }
 0x754   :  { %v3552_v52 = vpop.f32.mrf.mxu0  ;;  %v3570_v16 = vpop.f32.mrf.mxu1 }
 0x755   :  { %v3280_v46 = vadd.f32 %v3551_v47, %v5803_v58  ;;  %v3304_v37 = vadd.f32 %v3569_v32, %v5803_v58 }
 0x756   :  { %v3553_v14 = vpop.f32.mrf.mxu0  ;;  %v3571_v17 = vpop.f32.mrf.mxu1 }
 0x757   :  { %3342 = vst [vmem:[#allocation10] sm:$0xff] %v3280_v46  ;;  %3348 = vst [vmem:[#allocation10 + $0x30] sm:$0xff] %v3304_v37  ;;  %v3554_v3 = vadd.f32 %v3553_v14, %v3552_v52  ;;  %v3572_v13 = vadd.f32 %v3571_v17, %v3570_v16 }
 0x758   :  { %v3555_v11 = vpop.f32.mrf.mxu0  ;;  %v3573_v25 = vpop.f32.mrf.mxu1 }
 0x759   :  { %v3283_v8 = vadd.f32 %v3554_v3, %v5803_v58  ;;  %v3307_v35 = vadd.f32 %v3572_v13, %v5803_v58 }
 0x75a   :  { %v3556_v34 = vpop.f32.mrf.mxu0  ;;  %v3574_v26 = vpop.f32.mrf.mxu1 }
 0x75b   :  { %3343 = vst [vmem:[#allocation10 + $0x8] sm:$0xff] %v3283_v8  ;;  %3349 = vst [vmem:[#allocation10 + $0x38] sm:$0xff] %v3307_v35  ;;  %v3557_v29 = vadd.f32 %v3556_v34, %v3555_v11  ;;  %v3575_v7 = vadd.f32 %v3574_v26, %v3573_v25 }
 0x75c   :  { %v3558_v54 = vpop.f32.mrf.mxu0  ;;  %v3576_v44 = vpop.f32.mrf.mxu1 }
 0x75d   :  { %v3288_v12 = vadd.f32 %v3557_v29, %v5803_v58  ;;  %v3312_v53 = vadd.f32 %v3575_v7, %v5803_v58 }
 0x75e   :  { %v3559_v56 = vpop.f32.mrf.mxu0  ;;  %v3577_v22 = vpop.f32.mrf.mxu1 }
 0x75f   :  { %3344 = vst [vmem:[#allocation10 + $0x10] sm:$0xff] %v3288_v12  ;;  %3350 = vst [vmem:[#allocation10 + $0x40] sm:$0xff] %v3312_v53  ;;  %v3560_v61 = vadd.f32 %v3559_v56, %v3558_v54  ;;  %v3578_v18 = vadd.f32 %v3577_v22, %v3576_v44 }
 0x760   :  { %v3561_v1 = vpop.f32.mrf.mxu0  ;;  %v3579_v27 = vpop.f32.mrf.mxu1 }
 0x761   :  { %v3291_v40 = vadd.f32 %v3560_v61, %v5803_v58  ;;  %v3315_v48 = vadd.f32 %v3578_v18, %v5803_v58 }
 0x762   :  { %v3562_v57 = vpop.f32.mrf.mxu0  ;;  %v3580_v19 = vpop.f32.mrf.mxu1 }
 0x763   :  { %3345 = vst [vmem:[#allocation10 + $0x18] sm:$0xff] %v3291_v40  ;;  %3351 = vst [vmem:[#allocation10 + $0x48] sm:$0xff] %v3315_v48  ;;  %v3563_v50 = vadd.f32 %v3562_v57, %v3561_v1  ;;  %v3581_v31 = vadd.f32 %v3580_v19, %v3579_v27 }
 0x764   :  { %v3564_v20 = vpop.f32.mrf.mxu0  ;;  %v3582_v2 = vpop.f32.mrf.mxu1 }
 0x765   :  { %v3296_v41 = vadd.f32 %v3563_v50, %v5803_v58  ;;  %v3320_v55 = vadd.f32 %v3581_v31, %v5803_v58 }
 0x766   :  { %v3565_v45 = vpop.f32.mrf.mxu0  ;;  %v3583_v63 = vpop.f32.mrf.mxu1 }
 0x767   :  { %3346 = vst [vmem:[#allocation10 + $0x20] sm:$0xff] %v3296_v41  ;;  %3352 = vst [vmem:[#allocation10 + $0x50] sm:$0xff] %v3320_v55  ;;  %v3566_v33 = vadd.f32 %v3565_v45, %v3564_v20  ;;  %v3584_v62 = vadd.f32 %v3583_v63, %v3582_v2 }
 0x768   :  { %v3585_v30 = vpop.f32.mrf.mxu1 }
 0x769   :  { %v3299_v5 = vadd.f32 %v3566_v33, %v5803_v58  ;;  %v3323_v38 = vadd.f32 %v3584_v62, %v5803_v58 }
 0x76a   :  { %v3586_v60 = vpop.f32.mrf.mxu1 }
 0x76b   :  { %3347 = vst [vmem:[#allocation10 + $0x28] sm:$0xff] %v3299_v5  ;;  %3353 = vst [vmem:[#allocation10 + $0x58] sm:$0xff] %v3323_v38  ;;  %v3587_v43 = vadd.f32 %v3586_v60, %v3585_v30 }
 0x76c   :  { %v3588_v49 = vpop.f32.mrf.mxu1 }
 0x76d   :  { %v3328_v36 = vadd.f32 %v3587_v43, %v5803_v58 }
 0x76e   :  { %v3589_v59 = vpop.f32.mrf.mxu1 }
 0x76f   :  { %3354 = vst [vmem:[#allocation10 + $0x60] sm:$0xff] %v3328_v36  ;;  %v3590_v4 = vadd.f32 %v3589_v59, %v3588_v49 }
 0x770   :  { %v3591_v39 = vpop.f32.mrf.mxu1 }
 0x771   :  { %v3331_v24 = vadd.f32 %v3590_v4, %v5803_v58 }
 0x772   :  { %v3592_v15 = vpop.f32.mrf.mxu1 }
 0x773   :  { %3355 = vst [vmem:[#allocation10 + $0x68] sm:$0xff] %v3331_v24  ;;  %v3593_v42 = vadd.f32 %v3592_v15, %v3591_v39 }
 0x774   :  { %v3594_v51 = vpop.f32.mrf.mxu1 }
 0x775   :  { %v3336_v6 = vadd.f32 %v3593_v42, %v5803_v58 }
 0x776   :  { %v3595_v28 = vpop.f32.mrf.mxu1 }
 0x777   :  { %3356 = vst [vmem:[#allocation10 + $0x70] sm:$0xff] %v3336_v6  ;;  %v3596_v0 = vadd.f32 %v3595_v28, %v3594_v51 }
 0x779   :  { %v3339_v9 = vadd.f32 %v3596_v0, %v5803_v58 }
 0x77b   :  { %3357 = vst [vmem:[#allocation10 + $0x78] sm:$0xff] %v3339_v9 }
 0x77c   :  { %3944 = shalt.err (!%p3941_p10)
}
 0x77d   :  { %3369 = dma.vmem_to_hbm [thread:$0]  %s3364_s10, 2048, %s5850_s23, [#allocation4], %s3963_s1, %s3963_s1, %s3964_s26  }
 0x77e   :  { %3959 = dma.done.wait [#allocation4], 2048  }
 0x77f   :  { %3960 = vsyncadd [#allocation4], 4294965248 }
 0x780   :  { %3373 = vsyncpa [#allocation3], 1 }
 0x781   :  { %3374 = vsyncpa [#allocation6], 1 }
 0x782   :  { %3375 = vsyncpa [#allocation9], 1 }
 0x783   :  { %3376 = vsyncpa [#allocation4], 1 }

</bundles_post_ra>
